<compile_context>
chip_gen: v5e
topology: v5e:2x2
jax: 0.10.0
libtpu: 0.0.40
codegen_flags: <defaults>
</compile_context>

<pallas_src>
import jax
import jax.numpy as jnp
from jax import lax
from jax.experimental import pallas as pl
from jax.experimental.pallas import tpu as pltpu

MATMUL_DTYPE = jnp.bfloat16    # MXU operand dtype; accumulation stays float32
M_TILE_CONV1 = 1024            # rows of the merged (batch*spatial) axis per grid step
M_TILE_CONV2 = 512
B_TILE_FC = 128


def _round_up(x, m):
    return ((x + m - 1) // m) * m


# --------------------------------------------------------------------------------------
# XLA glue: im2col + pool-offset sort (pure data movement on small arrays).
# Returns patches of shape (4, M_pad, K) where row r of offset o = 2*a + b is the
# KHxKWxC patch whose conv output lands at spatial position (2*qh + a, 2*qw + b)
# of image n, with r = (n*Hp + qh)*Wp + qw.  Feature order is (kh, kw, cin),
# matching the prepared weight layout.  M is zero-padded up to a tile multiple.
# --------------------------------------------------------------------------------------
def _pool_sorted_patches(x, k=5, m_tile=1024):
    N, H, W, C = x.shape
    Ho, Wo = H - k + 1, W - k + 1
    Hp, Wp = Ho // 2, Wo // 2
    K = k * k * C
    cols = [x[:, kh:kh + Ho, kw:kw + Wo, :] for kh in range(k) for kw in range(k)]
    p = jnp.concatenate(cols, axis=-1)                  # (N, Ho, Wo, K)
    p = p.reshape(N, Hp, 2, Wp, 2, K)                   # (N, qh, a, qw, b, K)
    p = p.transpose(2, 4, 0, 1, 3, 5)                   # (a, b, N, qh, qw, K)
    M = N * Hp * Wp
    p = p.reshape(4, M, K)
    mt = m_tile if M >= m_tile else _round_up(M, 8)     # tile (mult. of 8 sublanes)
    M_pad = _round_up(M, mt)
    if M_pad != M:
        p = jnp.pad(p, ((0, 0), (0, M_pad - M), (0, 0)))
    return p, M, mt


# --------------------------------------------------------------------------------------
# Fused conv + 2x2 maxpool + ReLU over a merged batch*spatial M axis.
# One deep matmul per grid step: (4*MT, K) @ (K, Cout) -> max over the 4 pool
# offsets -> +bias -> ReLU -> bf16 store.
# --------------------------------------------------------------------------------------
def _conv_pool_relu_kernel(p_ref, w_ref, b_ref, o_ref):
    # p_ref: (4, MT, K) bf16   w_ref: (K, Cout) bf16
    # b_ref: (1, Cout) f32     o_ref: (MT, Cout) bf16
    po, mt, k = p_ref.shape
    y = jnp.dot(p_ref[...].reshape(po * mt, k), w_ref[...],
                preferred_element_type=jnp.float32)      # (4*MT, Cout) f32
    y = y.reshape(po, mt, y.shape[-1])
    m = jnp.max(y, axis=0)                               # max over pool offsets (VPU)
    o_ref[...] = jnp.maximum(m + b_ref[...], 0.0).astype(o_ref.dtype)


def conv_pool_relu(patches, w, b, m_tile):
    PO, M_pad, K = patches.shape
    Cout = w.shape[1]
    grid = (M_pad // m_tile,)
    return pl.pallas_call(
        _conv_pool_relu_kernel,
        out_shape=jax.ShapeDtypeStruct((M_pad, Cout), MATMUL_DTYPE),
        grid=grid,
        in_specs=[
            pl.BlockSpec((PO, m_tile, K), lambda i: (0, i, 0)),
            pl.BlockSpec((K, Cout), lambda i: (0, 0)),        # weights stay resident
            pl.BlockSpec((1, Cout), lambda i: (0, 0)),
        ],
        out_specs=pl.BlockSpec((m_tile, Cout), lambda i: (i, 0)),
        compiler_params=pltpu.CompilerParams(
            dimension_semantics=("parallel",),
            vmem_limit_bytes=32 * 1024 * 1024),
    )(patches, w, b)


# --------------------------------------------------------------------------------------
# Fused fc1 + ReLU + fc2 + log_softmax, batch-tiled grid (weights resident).
# --------------------------------------------------------------------------------------
def _fc_fused_kernel(x_ref, w1_ref, b1_ref, w2_ref, b2_ref, o_ref):
    h = jnp.dot(x_ref[...], w1_ref[...], preferred_element_type=jnp.float32) + b1_ref[...]
    h = jnp.maximum(h, 0.0).astype(w2_ref.dtype)
    y = jnp.dot(h, w2_ref[...], preferred_element_type=jnp.float32) + b2_ref[...]
    m = jnp.max(y, axis=-1, keepdims=True)
    lse = m + jnp.log(jnp.sum(jnp.exp(y - m), axis=-1, keepdims=True))
    o_ref[...] = y - lse


def fc_head(x, w1, b1, w2, b2, b_tile=B_TILE_FC):
    B, Din = x.shape
    Dh, Dout = w1.shape[1], w2.shape[1]
    bt = b_tile if B >= b_tile else _round_up(B, 8)
    B_pad = _round_up(B, bt)
    if B_pad != B:
        x = jnp.pad(x, ((0, B_pad - B), (0, 0)))
    out = pl.pallas_call(
        _fc_fused_kernel,
        out_shape=jax.ShapeDtypeStruct((B_pad, Dout), jnp.float32),
        grid=(B_pad // bt,),
        in_specs=[
            pl.BlockSpec((bt, Din), lambda i: (i, 0)),
            pl.BlockSpec((Din, Dh), lambda i: (0, 0)),
            pl.BlockSpec((1, Dh), lambda i: (0, 0)),
            pl.BlockSpec((Dh, Dout), lambda i: (0, 0)),
            pl.BlockSpec((1, Dout), lambda i: (0, 0)),
        ],
        out_specs=pl.BlockSpec((bt, Dout), lambda i: (i, 0)),
        compiler_params=pltpu.CompilerParams(
            dimension_semantics=("parallel",),
            vmem_limit_bytes=32 * 1024 * 1024),
        cost_estimate=pl.CostEstimate(
            flops=2 * B_pad * (Din * Dh + Dh * Dout),
            transcendentals=B_pad * (Dout + 1),
            bytes_accessed=2 * (B_pad * Din + Din * Dh + Dh * Dout) + 4 * B_pad * Dout),
    )(x, w1, b1, w2, b2)
    return out[:B]


# --------------------------------------------------------------------------------------
# Parameters (PyTorch shapes/conventions) and one-time layout preparation.
# --------------------------------------------------------------------------------------
def init_params(key):
    ks = jax.random.split(key, 8)

    def u(k, shape, fan_in):
        bound = 1.0 / jnp.sqrt(jnp.float32(fan_in))
        return jax.random.uniform(k, shape, jnp.float32, -bound, bound)

    return {
        "conv1_w": u(ks[0], (20, 3, 5, 5), 3 * 5 * 5),    # OIHW
        "conv1_b": u(ks[1], (20,), 3 * 5 * 5),
        "conv2_w": u(ks[2], (50, 20, 5, 5), 20 * 5 * 5),
        "conv2_b": u(ks[3], (50,), 20 * 5 * 5),
        "fc1_w":   u(ks[4], (500, 1250), 1250),           # (out, in) like nn.Linear
        "fc1_b":   u(ks[5], (500,), 1250),
        "fc2_w":   u(ks[6], (10, 500), 500),
        "fc2_b":   u(ks[7], (10,), 500),
    }


def prepare_params(params, matmul_dtype=MATMUL_DTYPE):
    """One-time layout prep (kept OUTSIDE the jitted forward):
       * conv weights OIHW -> (KH*KW*Cin, Cout) patch-major (kh,kw,cin order),
       * fc1 columns permuted from PyTorch's NCHW-flatten order to this kernel's
         NHWC-flatten order, then transposed to (1250, 500),
       * fc2 transposed; biases reshaped to (1, C); matmul operands cast to bf16."""
    c1 = jnp.transpose(params["conv1_w"], (2, 3, 1, 0)).reshape(5 * 5 * 3, 20)
    c2 = jnp.transpose(params["conv2_w"], (2, 3, 1, 0)).reshape(5 * 5 * 20, 50)
    fc1 = params["fc1_w"].reshape(500, 50, 5, 5).transpose(0, 2, 3, 1).reshape(500, 1250)
    return {
        "c1_w": c1.astype(matmul_dtype),
        "c1_b": params["conv1_b"].reshape(1, -1).astype(jnp.float32),
        "c2_w": c2.astype(matmul_dtype),
        "c2_b": params["conv2_b"].reshape(1, -1).astype(jnp.float32),
        "fc1_w": fc1.T.astype(matmul_dtype),
        "fc1_b": params["fc1_b"].reshape(1, -1).astype(jnp.float32),
        "fc2_w": params["fc2_w"].T.astype(matmul_dtype),
        "fc2_b": params["fc2_b"].reshape(1, -1).astype(jnp.float32),
    }


# --------------------------------------------------------------------------------------
# Forward pass: 3 pallas_calls total (conv1-stage, conv2-stage, fused FC head).
# --------------------------------------------------------------------------------------
@jax.jit
def cnn_forward(prep, x_nchw):
    N = x_nchw.shape[0]
    x = jnp.transpose(x_nchw, (0, 2, 3, 1)).astype(MATMUL_DTYPE)     # NCHW -> NHWC bf16

    p1, m1, mt1 = _pool_sorted_patches(x, m_tile=M_TILE_CONV1)        # (4, M1_pad, 75)
    h1 = conv_pool_relu(p1, prep["c1_w"], prep["c1_b"], mt1)          # (M1_pad, 20) bf16
    h1 = h1[:m1].reshape(N, 14, 14, 20)                               # no extra cast

    p2, m2, mt2 = _pool_sorted_patches(h1, m_tile=M_TILE_CONV2)       # (4, M2_pad, 500)
    h2 = conv_pool_relu(p2, prep["c2_w"], prep["c2_b"], mt2)          # (M2_pad, 50) bf16

    # NHWC flatten (fc1 weight columns were pre-permuted to match this order)
    feats = h2[:m2].reshape(N, 25 * 50)                               # (N, 1250) bf16
    return fc_head(feats, prep["fc1_w"], prep["fc1_b"], prep["fc2_w"], prep["fc2_b"])


def cnn_forward_ref(params, x_nchw):
    # pure-JAX f32 reference (no Pallas) for the correctness check
    hi = lax.Precision.HIGHEST
    x = x_nchw.astype(jnp.float32)

    def conv(x, w, b):
        y = lax.conv_general_dilated(x, w, (1, 1), "VALID",
                                     dimension_numbers=("NCHW", "OIHW", "NCHW"),
                                     precision=hi)
        return y + b.reshape(1, -1, 1, 1)

    def maxpool2(x):
        return lax.reduce_window(x, -jnp.inf, lax.max,
                                 (1, 1, 2, 2), (1, 1, 2, 2), "VALID")

    x = jax.nn.relu(maxpool2(conv(x, params["conv1_w"], params["conv1_b"])))
    x = jax.nn.relu(maxpool2(conv(x, params["conv2_w"], params["conv2_b"])))
    x = x.reshape(x.shape[0], -1)
    x = jax.nn.relu(jnp.dot(x, params["fc1_w"].T, precision=hi) + params["fc1_b"])
    x = jnp.dot(x, params["fc2_w"].T, precision=hi) + params["fc2_b"]
    return jax.nn.log_softmax(x, axis=1)


if __name__ == "__main__":
    key = jax.random.PRNGKey(0)
    pkey, xkey = jax.random.split(key)
    params = init_params(pkey)
    prep = prepare_params(params)          # one-time weight layout prep (outside jit)
    # smallest input consistent with the module: 1250 = 50*5*5 => 32x32 RGB images
    x = jax.random.normal(xkey, (2, 3, 32, 32), jnp.float32)

    out = jax.block_until_ready(cnn_forward(prep, x))
    assert out.shape == (2, 10)

    ref = cnn_forward_ref(params, x)
    # bf16 MXU operands / bf16 inter-stage activations (f32 accumulation) -> bf16 tolerance
    if not bool(jnp.allclose(out, ref, atol=1e-2, rtol=1e-2)):
        raise AssertionError(f"mismatch vs reference: max abs err = "
                             f"{float(jnp.max(jnp.abs(out - ref)))}")
    print("KERNEL_OK")
</pallas_src>

<mosaic_0001>
module attributes {stable_mosaic.version = 11 : i64} {
  func.func @_conv_pool_relu_kernel(%arg0: i32, %arg1: memref<4x392x75xbf16, #tpu.memory_space<vmem>>, %arg2: memref<75x20xbf16, #tpu.memory_space<vmem>>, %arg3: memref<1x20xf32, #tpu.memory_space<vmem>>, %arg4: memref<392x20xbf16, #tpu.memory_space<vmem>>) attributes {dimension_semantics = [#tpu.dimension_semantics<parallel>], iteration_bounds = array<i64: 1>, scalar_prefetch = 0 : i64, scratch_operands = 0 : i64, tpu.core_type = #tpu.core_type<tc>, window_params = [{transform_indices = @transform_0, window_bounds = array<i64: 4, 392, 75>}, {pipeline_mode = #tpu.pipeline_mode<synchronous>, transform_indices = @transform_1, window_bounds = array<i64: 75, 20>}, {pipeline_mode = #tpu.pipeline_mode<synchronous>, transform_indices = @transform_2, window_bounds = array<i64: 1, 20>}, {transform_indices = @transform_3, window_bounds = array<i64: 392, 20>}]} {
    %c0 = arith.constant 0 : index
    %c0_0 = arith.constant 0 : index
    %c0_1 = arith.constant 0 : index
    %0 = vector.load %arg1[%c0, %c0_0, %c0_1] : memref<4x392x75xbf16, #tpu.memory_space<vmem>>, vector<4x392x75xbf16>
    %1 = vector.shape_cast %0 : vector<4x392x75xbf16> to vector<1568x75xbf16>
    %c0_2 = arith.constant 0 : index
    %c0_3 = arith.constant 0 : index
    %2 = vector.load %arg2[%c0_2, %c0_3] : memref<75x20xbf16, #tpu.memory_space<vmem>>, vector<75x20xbf16>
    %cst = arith.constant dense<0.000000e+00> : vector<1568x20xf32>
    %3 = tpu.matmul %1, %2, %cst {dimension_numbers = #tpu.dot_dimension_numbers<[1], [0], [0], [1], [0, 0, 1, 1], [], []>} : vector<1568x75xbf16>, vector<75x20xbf16>, vector<1568x20xf32> -> vector<1568x20xf32>
    %4 = vector.shape_cast %3 : vector<1568x20xf32> to vector<4x392x20xf32>
    %cst_4 = arith.constant dense<0xFF800000> : vector<392x20xf32>
    %5 = vector.multi_reduction <maximumf>, %4, %cst_4 [0] : vector<4x392x20xf32> to vector<392x20xf32>
    %c0_5 = arith.constant 0 : index
    %c0_6 = arith.constant 0 : index
    %6 = vector.load %arg3[%c0_5, %c0_6] : memref<1x20xf32, #tpu.memory_space<vmem>>, vector<1x20xf32>
    %7 = vector.broadcast %6 : vector<1x20xf32> to vector<392x20xf32>
    %8 = arith.addf %5, %7 : vector<392x20xf32>
    %cst_7 = arith.constant 0.000000e+00 : f32
    %9 = vector.broadcast %cst_7 : f32 to vector<392x20xf32>
    %10 = arith.maximumf %8, %9 : vector<392x20xf32>
    %11 = arith.truncf %10 : vector<392x20xf32> to vector<392x20xbf16>
    %c0_8 = arith.constant 0 : index
    %c0_9 = arith.constant 0 : index
    %12 = vector.load %arg4[%c0_8, %c0_9] : memref<392x20xbf16, #tpu.memory_space<vmem>>, vector<392x20xbf16>
    tpu.vector_store %arg4[%c0_8, %c0_9], %11 {strides = array<i32>} : memref<392x20xbf16, #tpu.memory_space<vmem>>, vector<392x20xbf16>,
    return
  }
  func.func @transform_0(%arg0: i32) -> (i32, i32, i32) {
    %c0_i32 = arith.constant 0 : i32
    %c0_i32_0 = arith.constant 0 : i32
    %c0_i32_1 = arith.constant 0 : i32
    return %c0_i32, %arg0, %c0_i32_0 : i32, i32, i32
  }
  func.func @transform_1(%arg0: i32) -> (i32, i32) {
    %c0_i32 = arith.constant 0 : i32
    %c0_i32_0 = arith.constant 0 : i32
    %c0_i32_1 = arith.constant 0 : i32
    return %c0_i32, %c0_i32_0 : i32, i32
  }
  func.func @transform_2(%arg0: i32) -> (i32, i32) {
    %c0_i32 = arith.constant 0 : i32
    %c0_i32_0 = arith.constant 0 : i32
    %c0_i32_1 = arith.constant 0 : i32
    return %c0_i32, %c0_i32_0 : i32, i32
  }
  func.func @transform_3(%arg0: i32) -> (i32, i32) {
    %c0_i32 = arith.constant 0 : i32
    %c0_i32_0 = arith.constant 0 : i32
    return %arg0, %c0_i32 : i32, i32
  }
}

module attributes {stable_mosaic.version = 11 : i64} {
  func.func @_conv_pool_relu_kernel(%arg0: i32, %arg1: memref<4x56x500xbf16, #tpu.memory_space<vmem>>, %arg2: memref<500x50xbf16, #tpu.memory_space<vmem>>, %arg3: memref<1x50xf32, #tpu.memory_space<vmem>>, %arg4: memref<56x50xbf16, #tpu.memory_space<vmem>>) attributes {dimension_semantics = [#tpu.dimension_semantics<parallel>], iteration_bounds = array<i64: 1>, scalar_prefetch = 0 : i64, scratch_operands = 0 : i64, tpu.core_type = #tpu.core_type<tc>, window_params = [{transform_indices = @transform_0, window_bounds = array<i64: 4, 56, 500>}, {pipeline_mode = #tpu.pipeline_mode<synchronous>, transform_indices = @transform_1, window_bounds = array<i64: 500, 50>}, {pipeline_mode = #tpu.pipeline_mode<synchronous>, transform_indices = @transform_2, window_bounds = array<i64: 1, 50>}, {transform_indices = @transform_3, window_bounds = array<i64: 56, 50>}]} {
    %c0 = arith.constant 0 : index
    %c0_0 = arith.constant 0 : index
    %c0_1 = arith.constant 0 : index
    %0 = vector.load %arg1[%c0, %c0_0, %c0_1] : memref<4x56x500xbf16, #tpu.memory_space<vmem>>, vector<4x56x500xbf16>
    %1 = vector.shape_cast %0 : vector<4x56x500xbf16> to vector<224x500xbf16>
    %c0_2 = arith.constant 0 : index
    %c0_3 = arith.constant 0 : index
    %2 = vector.load %arg2[%c0_2, %c0_3] : memref<500x50xbf16, #tpu.memory_space<vmem>>, vector<500x50xbf16>
    %cst = arith.constant dense<0.000000e+00> : vector<224x50xf32>
    %3 = tpu.matmul %1, %2, %cst {dimension_numbers = #tpu.dot_dimension_numbers<[1], [0], [0], [1], [0, 0, 1, 1], [], []>} : vector<224x500xbf16>, vector<500x50xbf16>, vector<224x50xf32> -> vector<224x50xf32>
    %4 = vector.shape_cast %3 : vector<224x50xf32> to vector<4x56x50xf32>
    %cst_4 = arith.constant dense<0xFF800000> : vector<56x50xf32>
    %5 = vector.multi_reduction <maximumf>, %4, %cst_4 [0] : vector<4x56x50xf32> to vector<56x50xf32>
    %c0_5 = arith.constant 0 : index
    %c0_6 = arith.constant 0 : index
    %6 = vector.load %arg3[%c0_5, %c0_6] : memref<1x50xf32, #tpu.memory_space<vmem>>, vector<1x50xf32>
    %7 = vector.broadcast %6 : vector<1x50xf32> to vector<56x50xf32>
    %8 = arith.addf %5, %7 : vector<56x50xf32>
    %cst_7 = arith.constant 0.000000e+00 : f32
    %9 = vector.broadcast %cst_7 : f32 to vector<56x50xf32>
    %10 = arith.maximumf %8, %9 : vector<56x50xf32>
    %11 = arith.truncf %10 : vector<56x50xf32> to vector<56x50xbf16>
    %c0_8 = arith.constant 0 : index
    %c0_9 = arith.constant 0 : index
    %12 = vector.load %arg4[%c0_8, %c0_9] : memref<56x50xbf16, #tpu.memory_space<vmem>>, vector<56x50xbf16>
    tpu.vector_store %arg4[%c0_8, %c0_9], %11 {strides = array<i32>} : memref<56x50xbf16, #tpu.memory_space<vmem>>, vector<56x50xbf16>,
    return
  }
  func.func @transform_0(%arg0: i32) -> (i32, i32, i32) {
    %c0_i32 = arith.constant 0 : i32
    %c0_i32_0 = arith.constant 0 : i32
    %c0_i32_1 = arith.constant 0 : i32
    return %c0_i32, %arg0, %c0_i32_0 : i32, i32, i32
  }
  func.func @transform_1(%arg0: i32) -> (i32, i32) {
    %c0_i32 = arith.constant 0 : i32
    %c0_i32_0 = arith.constant 0 : i32
    %c0_i32_1 = arith.constant 0 : i32
    return %c0_i32, %c0_i32_0 : i32, i32
  }
  func.func @transform_2(%arg0: i32) -> (i32, i32) {
    %c0_i32 = arith.constant 0 : i32
    %c0_i32_0 = arith.constant 0 : i32
    %c0_i32_1 = arith.constant 0 : i32
    return %c0_i32, %c0_i32_0 : i32, i32
  }
  func.func @transform_3(%arg0: i32) -> (i32, i32) {
    %c0_i32 = arith.constant 0 : i32
    %c0_i32_0 = arith.constant 0 : i32
    return %arg0, %c0_i32 : i32, i32
  }
}

module attributes {stable_mosaic.version = 11 : i64} {
  func.func @_fc_fused_kernel(%arg0: i32, %arg1: memref<8x1250xbf16, #tpu.memory_space<vmem>>, %arg2: memref<1250x500xbf16, #tpu.memory_space<vmem>>, %arg3: memref<1x500xf32, #tpu.memory_space<vmem>>, %arg4: memref<500x10xbf16, #tpu.memory_space<vmem>>, %arg5: memref<1x10xf32, #tpu.memory_space<vmem>>, %arg6: memref<8x10xf32, #tpu.memory_space<vmem>>) attributes {dimension_semantics = [#tpu.dimension_semantics<parallel>], iteration_bounds = array<i64: 1>, scalar_prefetch = 0 : i64, scratch_operands = 0 : i64, tpu.core_type = #tpu.core_type<tc>, window_params = [{transform_indices = @transform_0, window_bounds = array<i64: 8, 1250>}, {pipeline_mode = #tpu.pipeline_mode<synchronous>, transform_indices = @transform_1, window_bounds = array<i64: 1250, 500>}, {pipeline_mode = #tpu.pipeline_mode<synchronous>, transform_indices = @transform_2, window_bounds = array<i64: 1, 500>}, {pipeline_mode = #tpu.pipeline_mode<synchronous>, transform_indices = @transform_3, window_bounds = array<i64: 500, 10>}, {pipeline_mode = #tpu.pipeline_mode<synchronous>, transform_indices = @transform_4, window_bounds = array<i64: 1, 10>}, {transform_indices = @transform_5, window_bounds = array<i64: 8, 10>}]} {
    %c0 = arith.constant 0 : index
    %c0_0 = arith.constant 0 : index
    %0 = vector.load %arg1[%c0, %c0_0] : memref<8x1250xbf16, #tpu.memory_space<vmem>>, vector<8x1250xbf16>
    %c0_1 = arith.constant 0 : index
    %c0_2 = arith.constant 0 : index
    %1 = vector.load %arg2[%c0_1, %c0_2] : memref<1250x500xbf16, #tpu.memory_space<vmem>>, vector<1250x500xbf16>
    %cst = arith.constant dense<0.000000e+00> : vector<8x500xf32>
    %2 = tpu.matmul %0, %1, %cst {dimension_numbers = #tpu.dot_dimension_numbers<[1], [0], [0], [1], [0, 0, 1, 1], [], []>} : vector<8x1250xbf16>, vector<1250x500xbf16>, vector<8x500xf32> -> vector<8x500xf32>
    %c0_3 = arith.constant 0 : index
    %c0_4 = arith.constant 0 : index
    %3 = vector.load %arg3[%c0_3, %c0_4] : memref<1x500xf32, #tpu.memory_space<vmem>>, vector<1x500xf32>
    %4 = vector.broadcast %3 : vector<1x500xf32> to vector<8x500xf32>
    %5 = arith.addf %2, %4 : vector<8x500xf32>
    %cst_5 = arith.constant 0.000000e+00 : f32
    %6 = vector.broadcast %cst_5 : f32 to vector<8x500xf32>
    %7 = arith.maximumf %5, %6 : vector<8x500xf32>
    %8 = arith.truncf %7 : vector<8x500xf32> to vector<8x500xbf16>
    %c0_6 = arith.constant 0 : index
    %c0_7 = arith.constant 0 : index
    %9 = vector.load %arg4[%c0_6, %c0_7] : memref<500x10xbf16, #tpu.memory_space<vmem>>, vector<500x10xbf16>
    %cst_8 = arith.constant dense<0.000000e+00> : vector<8x10xf32>
    %10 = tpu.matmul %8, %9, %cst_8 {dimension_numbers = #tpu.dot_dimension_numbers<[1], [0], [0], [1], [0, 0, 1, 1], [], []>} : vector<8x500xbf16>, vector<500x10xbf16>, vector<8x10xf32> -> vector<8x10xf32>
    %c0_9 = arith.constant 0 : index
    %c0_10 = arith.constant 0 : index
    %11 = vector.load %arg5[%c0_9, %c0_10] : memref<1x10xf32, #tpu.memory_space<vmem>>, vector<1x10xf32>
    %12 = vector.broadcast %11 : vector<1x10xf32> to vector<8x10xf32>
    %13 = arith.addf %10, %12 : vector<8x10xf32>
    %cst_11 = arith.constant dense<0xFF800000> : vector<8xf32>
    %14 = vector.multi_reduction <maximumf>, %13, %cst_11 [1] : vector<8x10xf32> to vector<8xf32>
    %15 = vector.shape_cast %14 : vector<8xf32> to vector<8x1xf32>
    %16 = vector.broadcast %15 : vector<8x1xf32> to vector<8x10xf32>
    %17 = arith.subf %13, %16 : vector<8x10xf32>
    %18 = math.exp %17 : vector<8x10xf32>
    %cst_12 = arith.constant dense<0.000000e+00> : vector<8xf32>
    %19 = vector.multi_reduction <add>, %18, %cst_12 [1] : vector<8x10xf32> to vector<8xf32>
    %20 = vector.shape_cast %19 : vector<8xf32> to vector<8x1xf32>
    %21 = math.log %20 : vector<8x1xf32>
    %22 = arith.addf %15, %21 : vector<8x1xf32>
    %23 = vector.broadcast %22 : vector<8x1xf32> to vector<8x10xf32>
    %24 = arith.subf %13, %23 : vector<8x10xf32>
    %c0_13 = arith.constant 0 : index
    %c0_14 = arith.constant 0 : index
    %25 = vector.load %arg6[%c0_13, %c0_14] : memref<8x10xf32, #tpu.memory_space<vmem>>, vector<8x10xf32>
    tpu.vector_store %arg6[%c0_13, %c0_14], %24 {strides = array<i32>} : memref<8x10xf32, #tpu.memory_space<vmem>>, vector<8x10xf32>,
    return
  }
  func.func @transform_0(%arg0: i32) -> (i32, i32) {
    %c0_i32 = arith.constant 0 : i32
    %c0_i32_0 = arith.constant 0 : i32
    return %arg0, %c0_i32 : i32, i32
  }
  func.func @transform_1(%arg0: i32) -> (i32, i32) {
    %c0_i32 = arith.constant 0 : i32
    %c0_i32_0 = arith.constant 0 : i32
    %c0_i32_1 = arith.constant 0 : i32
    return %c0_i32, %c0_i32_0 : i32, i32
  }
  func.func @transform_2(%arg0: i32) -> (i32, i32) {
    %c0_i32 = arith.constant 0 : i32
    %c0_i32_0 = arith.constant 0 : i32
    %c0_i32_1 = arith.constant 0 : i32
    return %c0_i32, %c0_i32_0 : i32, i32
  }
  func.func @transform_3(%arg0: i32) -> (i32, i32) {
    %c0_i32 = arith.constant 0 : i32
    %c0_i32_0 = arith.constant 0 : i32
    %c0_i32_1 = arith.constant 0 : i32
    return %c0_i32, %c0_i32_0 : i32, i32
  }
  func.func @transform_4(%arg0: i32) -> (i32, i32) {
    %c0_i32 = arith.constant 0 : i32
    %c0_i32_0 = arith.constant 0 : i32
    %c0_i32_1 = arith.constant 0 : i32
    return %c0_i32, %c0_i32_0 : i32, i32
  }
  func.func @transform_5(%arg0: i32) -> (i32, i32) {
    %c0_i32 = arith.constant 0 : i32
    %c0_i32_0 = arith.constant 0 : i32
    return %arg0, %c0_i32 : i32, i32
  }
}

</mosaic_0001>

<bundles_post_ra>
// kernel: cnn_forward.3
= control target key start
LH: loop header
LB: loop body
LE: loop exit
PB: predicated region body
PF: predicated region fallthrough
CT: control target
= control target key end

     0   :  { %vm1035_vm0 = vcmask 1044480   ;;  %vm1036_vm1 = vcmask 1045504   ;;  %v2721_v2 = vmov 65535   ;;  %vm740_vm2 = vcmask 613376   ;;  %s3609_s1 = inlined_call_operand.vmem [shape: bf16[75,20], index: 1, kind: input, shape index: {}]   ;;  %s3610_s0 = inlined_call_operand.vmem [shape: bf16[4,392,75], index: 0, kind: input, shape index: {}]   ;;  %s3611_s2 = inlined_call_operand.vmem [shape: f32[1,20], index: 2, kind: input, shape index: {}]   ;;  %s3612_s3 = inlined_call_operand.vmem [shape: bf16[392,20], index: 3, kind: output, shape index: {}]  }
   0x1   :  { %v2500_v0 = vld [vmem:[%s3609_s1 + $0x20] sm:$0xf]  ;;  %v2702_v1 = vld [vmem:[%s3609_s1 + $0x20] sm:$0x30]  ;;  %v1037_v3 = vsel %vm1035_vm0, 4294967295, %v2721_v2  ;;  %v2701_v7 = vld [vmem:[%s3609_s1 + $0x18] sm:$0xff] }
   0x2   :  { %v2501_v4 = vor.u32 %v2702_v1, %v2500_v0  ;;  %v1038_v5 = vsel %vm1036_vm1, %v1037_v3, 0  ;;  %v2700_v8 = vld [vmem:[%s3609_s1 + $0x10] sm:$0xff]  ;;  %v2699_v9 = vld [vmem:[%s3609_s1 + $0x8] sm:$0xff]  ;;  %v2698_v10 = vld [vmem:[%s3609_s1] sm:$0xff]  ;;  %vm1541_vm3 = vcmask 162816   ;;  %vm2036_vm4 = vcmask 158720  }
   0x3   :  { %v2624_v11 = vld [vmem:[%s3610_s0 + $0xc0] sm:$0xff]  ;;  %v2649_v12 = vld [vmem:[%s3610_s0 + $0x188] sm:$0xff]  ;;  %v2674_v14 = vld [vmem:[%s3610_s0 + $0x250] sm:$0xff] }
   0x4   :  { %v1040_v6 = vand.u32 %v2501_v4, %v1038_v5  ;;  %v2600_v13 = vld [vmem:[%s3610_s0] sm:$0xff]  ;;  %v2625_v15 = vld [vmem:[%s3610_s0 + $0xc8] sm:$0xff]  ;;  %v2650_v16 = vld [vmem:[%s3610_s0 + $0x190] sm:$0xff] }
   0x5   :  { %v2601_v17 = vld [vmem:[%s3610_s0 + $0x8] sm:$0xff]  ;;  %v2675_v18 = vld [vmem:[%s3610_s0 + $0x258] sm:$0xff]  ;;  %v2626_v19 = vld [vmem:[%s3610_s0 + $0xd0] sm:$0xff] }
   0x6   :  { %2703 = vmatpush.bf16.msra.mxu1 %v1040_v6  ;;  %2704 = vmatpush.bf16.msra.mxu2 %v1040_v6  ;;  %v2651_v20 = vld [vmem:[%s3610_s0 + $0x198] sm:$0xff]  ;;  %v2602_v21 = vld [vmem:[%s3610_s0 + $0x10] sm:$0xff]  ;;  %v2676_v22 = vld [vmem:[%s3610_s0 + $0x260] sm:$0xff] }
   0x7   :  { %1045 = vmatpush.bf16.msra.mxu0 %v1040_v6  ;;  %2705 = vmatpush.bf16.msra.mxu3 %v1040_v6  ;;  %v2627_v23 = vld [vmem:[%s3610_s0 + $0xd8] sm:$0xff]  ;;  %v2652_v24 = vld [vmem:[%s3610_s0 + $0x1a0] sm:$0xff]  ;;  %v2677_v26 = vld [vmem:[%s3610_s0 + $0x268] sm:$0xff] }
   0x8   :  { %v2603_v25 = vld [vmem:[%s3610_s0 + $0x18] sm:$0xff]  ;;  %v2628_v27 = vld [vmem:[%s3610_s0 + $0xe0] sm:$0xff]  ;;  %v2653_v28 = vld [vmem:[%s3610_s0 + $0x1a8] sm:$0xff] }
   0x9   :  { %v2604_v29 = vld [vmem:[%s3610_s0 + $0x20] sm:$0xff]  ;;  %v2678_v30 = vld [vmem:[%s3610_s0 + $0x270] sm:$0xff]  ;;  %v2629_v31 = vld [vmem:[%s3610_s0 + $0xe8] sm:$0xff] }
   0xa   :  { %2706 = vmatpush.bf16.msra.mxu1 %v2701_v7  ;;  %2707 = vmatpush.bf16.msra.mxu2 %v2701_v7  ;;  %v2654_v32 = vld [vmem:[%s3610_s0 + $0x1b0] sm:$0xff]  ;;  %v2605_v33 = vld [vmem:[%s3610_s0 + $0x28] sm:$0xff]  ;;  %v2679_v34 = vld [vmem:[%s3610_s0 + $0x278] sm:$0xff] }
   0xb   :  { %1046 = vmatpush.bf16.msra.mxu0 %v2701_v7  ;;  %2708 = vmatpush.bf16.msra.mxu3 %v2701_v7  ;;  %v2630_v35 = vld [vmem:[%s3610_s0 + $0xf0] sm:$0xff]  ;;  %v2655_v36 = vld [vmem:[%s3610_s0 + $0x1b8] sm:$0xff]  ;;  %v2680_v38 = vld [vmem:[%s3610_s0 + $0x280] sm:$0xff] }
   0xc   :  { %v2606_v37 = vld [vmem:[%s3610_s0 + $0x30] sm:$0xff]  ;;  %v2631_v39 = vld [vmem:[%s3610_s0 + $0xf8] sm:$0xff]  ;;  %v2656_v40 = vld [vmem:[%s3610_s0 + $0x1c0] sm:$0xff] }
   0xd   :  { %v2607_v41 = vld [vmem:[%s3610_s0 + $0x38] sm:$0xff]  ;;  %v2681_v42 = vld [vmem:[%s3610_s0 + $0x288] sm:$0xff]  ;;  %v2632_v43 = vld [vmem:[%s3610_s0 + $0x100] sm:$0xff] }
   0xe   :  { %2709 = vmatpush.bf16.msra.mxu1 %v2700_v8  ;;  %2710 = vmatpush.bf16.msra.mxu2 %v2700_v8  ;;  %v2657_v44 = vld [vmem:[%s3610_s0 + $0x1c8] sm:$0xff]  ;;  %v2608_v46 = vld [vmem:[%s3610_s0 + $0x40] sm:$0xff]  ;;  %v2682_v47 = vld [vmem:[%s3610_s0 + $0x290] sm:$0xff] }
   0xf   :  { %1047 = vmatpush.bf16.msra.mxu0 %v2700_v8  ;;  %2711 = vmatpush.bf16.msra.mxu3 %v2700_v8  ;;  %v2633_v60 = vld [vmem:[%s3610_s0 + $0x108] sm:$0xff]  ;;  %v2658_v61 = vld [vmem:[%s3610_s0 + $0x1d0] sm:$0xff]  ;;  %v2683_v1 = vld [vmem:[%s3610_s0 + $0x298] sm:$0xff] }
  0x10   :  { %v2609_v0 = vld [vmem:[%s3610_s0 + $0x48] sm:$0xff]  ;;  %v2932_v8 = vld [vmem:[%s3611_s2] ss:$0 sm:$0xff] }
  0x12   :  { %2712 = vmatpush.bf16.msra.mxu1 %v2699_v9  ;;  %2713 = vmatpush.bf16.msra.mxu2 %v2699_v9 }
  0x13   :  { %1048 = vmatpush.bf16.msra.mxu0 %v2699_v9  ;;  %2714 = vmatpush.bf16.msra.mxu3 %v2699_v9 }
  0x16   :  { %2715 = vmatpush.bf16.msra.mxu1 %v2698_v10  ;;  %2716 = vmatpush.bf16.msra.mxu2 %v2698_v10 }
  0x17   :  { %1049 = vmatpush.bf16.msra.mxu0 %v2698_v10  ;;  %2717 = vmatpush.bf16.msra.mxu3 %v2698_v10 }
  0x19   :  { %2526 = vmatmul.msk.bf16.vlgmr.msra.gmra.mxu1 %vm740_vm2, %v2624_v11  ;;  %2551 = vmatmul.msk.bf16.vlgmr.msra.gmra.mxu2 %vm740_vm2, %v2649_v12 }
  0x1a   :  { %2502 = vmatmul.msk.bf16.vlgmr.msra.gmra.mxu0 %vm740_vm2, %v2600_v13  ;;  %2576 = vmatmul.msk.bf16.vlgmr.msra.gmra.mxu3 %vm740_vm2, %v2674_v14 }
  0x29   :  { %2527 = vmatmul.msk.bf16.gmra.mxu1 %vm740_vm2, %v2625_v15  ;;  %2552 = vmatmul.msk.bf16.gmra.mxu2 %vm740_vm2, %v2650_v16 }
  0x2a   :  { %2503 = vmatmul.msk.bf16.gmra.mxu0 %vm740_vm2, %v2601_v17  ;;  %2577 = vmatmul.msk.bf16.gmra.mxu3 %vm740_vm2, %v2675_v18 }
  0x39   :  { %2528 = vmatmul.msk.bf16.gmra.mxu1 %vm740_vm2, %v2626_v19  ;;  %2553 = vmatmul.msk.bf16.gmra.mxu2 %vm740_vm2, %v2651_v20 }
  0x3a   :  { %2504 = vmatmul.msk.bf16.gmra.mxu0 %vm740_vm2, %v2602_v21  ;;  %2578 = vmatmul.msk.bf16.gmra.mxu3 %vm740_vm2, %v2676_v22 }
  0x49   :  { %2529 = vmatmul.msk.bf16.gmra.mxu1 %vm740_vm2, %v2627_v23  ;;  %2554 = vmatmul.msk.bf16.gmra.mxu2 %vm740_vm2, %v2652_v24 }
  0x4a   :  { %2505 = vmatmul.msk.bf16.gmra.mxu0 %vm740_vm2, %v2603_v25  ;;  %2579 = vmatmul.msk.bf16.gmra.mxu3 %vm740_vm2, %v2677_v26  ;;  %v2634_v26 = vld [vmem:[%s3610_s0 + $0x110] sm:$0xff] }
  0x59   :  { %2530 = vmatmul.msk.bf16.gmra.mxu1 %vm740_vm2, %v2628_v27  ;;  %2555 = vmatmul.msk.bf16.gmra.mxu2 %vm740_vm2, %v2653_v28  ;;  %v2659_v27 = vld [vmem:[%s3610_s0 + $0x1d8] sm:$0xff] }
  0x5a   :  { %2506 = vmatmul.msk.bf16.gmra.mxu0 %vm740_vm2, %v2604_v29  ;;  %2580 = vmatmul.msk.bf16.gmra.mxu3 %vm740_vm2, %v2678_v30 }
  0x69   :  { %2531 = vmatmul.msk.bf16.gmra.mxu1 %vm740_vm2, %v2629_v31  ;;  %2556 = vmatmul.msk.bf16.gmra.mxu2 %vm740_vm2, %v2654_v32  ;;  %v2610_v31 = vld [vmem:[%s3610_s0 + $0x50] sm:$0xff]  ;;  %v2684_v32 = vld [vmem:[%s3610_s0 + $0x2a0] sm:$0xff] }
  0x6a   :  { %2507 = vmatmul.msk.bf16.gmra.mxu0 %vm740_vm2, %v2605_v33  ;;  %2581 = vmatmul.msk.bf16.gmra.mxu3 %vm740_vm2, %v2679_v34 }
  0x79   :  { %2532 = vmatmul.msk.bf16.gmra.mxu1 %vm740_vm2, %v2630_v35  ;;  %2557 = vmatmul.msk.bf16.gmra.mxu2 %vm740_vm2, %v2655_v36 }
  0x7a   :  { %2508 = vmatmul.msk.bf16.gmra.mxu0 %vm740_vm2, %v2606_v37  ;;  %2582 = vmatmul.msk.bf16.gmra.mxu3 %vm740_vm2, %v2680_v38 }
  0x89   :  { %2533 = vmatmul.msk.bf16.gmra.mxu1 %vm740_vm2, %v2631_v39  ;;  %2558 = vmatmul.msk.bf16.gmra.mxu2 %vm740_vm2, %v2656_v40 }
  0x8a   :  { %2509 = vmatmul.msk.bf16.gmra.mxu0 %vm740_vm2, %v2607_v41  ;;  %2583 = vmatmul.msk.bf16.gmra.mxu3 %vm740_vm2, %v2681_v42 }
  0x96   :  { %v2894_v45 = vpop.f32.mrf.mxu1 }
  0x97   :  { %v1051_v48 = vpop.f32.mrf.mxu0 }
  0x98   :  { %v1542_v50 = vsel %vm1541_vm3, %v1051_v48, -inf }
  0x99   :  { %2534 = vmatmul.msk.bf16.gmra.mxu1 %vm740_vm2, %v2632_v43  ;;  %2559 = vmatmul.msk.bf16.gmra.mxu2 %vm740_vm2, %v2657_v44 }
  0x9a   :  { %2510 = vmatmul.msk.bf16.gmra.mxu0 %vm740_vm2, %v2608_v46  ;;  %2584 = vmatmul.msk.bf16.gmra.mxu3 %vm740_vm2, %v2682_v47 }
  0x9c   :  { %v1296_v49 = vpop.f32.mrf.mxu2 }
  0x9d   :  { %v1421_v51 = vpop.f32.mrf.mxu3  ;;  %v1545_v56 = vsel %vm1541_vm3, %v1296_v49, -inf }
  0x9e   :  { %v1173_v52 = vpop.f32.mrf.mxu1  ;;  %v1554_v6 = vsel %vm1541_vm3, %v1421_v51, -inf }
  0x9f   :  { %v1543_v53 = vsel %vm1541_vm3, %v1173_v52, -inf  ;;  %v1053_v54 = vpop.f32.mrf.mxu0 }
  0xa0   :  { %v1544_v55 = vmax.f32 %v1542_v50, %v1543_v53  ;;  %v1549_v59 = vsel %vm1541_vm3, %v1053_v54, -inf }
  0xa2   :  { %v2909_v57 = vmax.f32 %v1544_v55, %v1545_v56 }
  0xa4   :  { %v1298_v58 = vpop.f32.mrf.mxu2 }
  0xa5   :  { %v1423_v62 = vpop.f32.mrf.mxu3  ;;  %v1552_v5 = vsel %vm1541_vm3, %v1298_v58, -inf }
  0xa6   :  { %v1176_v63 = vpop.f32.mrf.mxu1  ;;  %v1561_v22 = vsel %vm1541_vm3, %v1423_v62, -inf }
  0xa7   :  { %v1550_v2 = vsel %vm1541_vm3, %v1176_v63, -inf  ;;  %v1056_v3 = vpop.f32.mrf.mxu0 }
  0xa8   :  { %v1551_v4 = vmax.f32 %v1549_v59, %v1550_v2  ;;  %v1556_v11 = vsel %vm1541_vm3, %v1056_v3, -inf  ;;  %v2685_v2 = vld [vmem:[%s3610_s0 + $0x2a8] sm:$0xff] }
  0xa9   :  { %2535 = vmatmul.msk.bf16.gmra.mxu1 %vm740_vm2, %v2633_v60  ;;  %2560 = vmatmul.msk.bf16.gmra.mxu2 %vm740_vm2, %v2658_v61  ;;  %v2635_v60 = vld [vmem:[%s3610_s0 + $0x118] sm:$0xff]  ;;  %v2660_v61 = vld [vmem:[%s3610_s0 + $0x1e0] sm:$0xff] }
  0xaa   :  { %v1553_v7 = vmax.f32 %v1551_v4, %v1552_v5  ;;  %2511 = vmatmul.msk.bf16.gmra.mxu0 %vm740_vm2, %v2609_v0  ;;  %2585 = vmatmul.msk.bf16.gmra.mxu3 %vm740_vm2, %v2683_v1  ;;  %v2611_v1 = vld [vmem:[%s3610_s0 + $0x58] sm:$0xff] }
  0xac   :  { %v1555_v9 = vmax.f32 %v1553_v7, %v1554_v6  ;;  %v1301_v10 = vpop.f32.mrf.mxu2 }
  0xad   :  { %v1426_v12 = vpop.f32.mrf.mxu3  ;;  %v1559_v19 = vsel %vm1541_vm3, %v1301_v10, -inf }
  0xae   :  { %v1890_v13 = vadd.f32 %v2932_v8, %v1555_v9  ;;  %v1178_v14 = vpop.f32.mrf.mxu1  ;;  %v1568_v38 = vsel %vm1541_vm3, %v1426_v12, -inf }
  0xaf   :  { %v1557_v15 = vsel %vm1541_vm3, %v1178_v14, -inf  ;;  %v1058_v16 = vpop.f32.mrf.mxu0 }
  0xb0   :  { %v1939_v17 = vmax.f32 %v1890_v13, 0.0  ;;  %v1558_v18 = vmax.f32 %v1556_v11, %v1557_v15  ;;  %v1563_v25 = vsel %vm1541_vm3, %v1058_v16, -inf }
  0xb2   :  { %v1988_v20 = vpack.c.bf16 %v1939_v17, %v1939_v17  ;;  %v1560_v21 = vmax.f32 %v1558_v18, %v1559_v19 }
  0xb4   :  { %2038 = vst.msk [vmem:[%s3612_s3 + $0x4] sm:$0xf] %vm2036_vm4, %v1988_v20  ;;  %v1562_v23 = vmax.f32 %v1560_v21, %v1561_v22  ;;  %v1303_v24 = vpop.f32.mrf.mxu2 }
  0xb5   :  { %v1428_v28 = vpop.f32.mrf.mxu3  ;;  %v1566_v37 = vsel %vm1541_vm3, %v1303_v24, -inf }
  0xb6   :  { %v1891_v29 = vadd.f32 %v2932_v8, %v1562_v23  ;;  %v1181_v30 = vpop.f32.mrf.mxu1  ;;  %v1575_v55 = vsel %vm1541_vm3, %v1428_v28, -inf }
  0xb7   :  { %v1564_v33 = vsel %vm1541_vm3, %v1181_v30, -inf  ;;  %v1061_v34 = vpop.f32.mrf.mxu0  ;;  %v2661_v30 = vld [vmem:[%s3610_s0 + $0x1e8] sm:$0xff] }
  0xb8   :  { %v1940_v35 = vmax.f32 %v1891_v29, 0.0  ;;  %v1565_v36 = vmax.f32 %v1563_v25, %v1564_v33  ;;  %v1570_v43 = vsel %vm1541_vm3, %v1061_v34, -inf  ;;  %v2636_v29 = vld [vmem:[%s3610_s0 + $0x120] sm:$0xff] }
  0xb9   :  { %2536 = vmatmul.msk.bf16.gmra.mxu1 %vm740_vm2, %v2634_v26  ;;  %2561 = vmatmul.msk.bf16.gmra.mxu2 %vm740_vm2, %v2659_v27  ;;  %v2612_v34 = vld [vmem:[%s3610_s0 + $0x60] sm:$0xff] }
  0xba   :  { %v1989_v39 = vpack.c.bf16 %v1940_v35, %v1940_v35  ;;  %v1567_v40 = vmax.f32 %v1565_v36, %v1566_v37  ;;  %2512 = vmatmul.msk.bf16.gmra.mxu0 %vm740_vm2, %v2610_v31  ;;  %2586 = vmatmul.msk.bf16.gmra.mxu3 %vm740_vm2, %v2684_v32  ;;  %v2686_v35 = vld [vmem:[%s3610_s0 + $0x2b0] sm:$0xff] }
  0xbc   :  { %2039 = vst.msk [vmem:[%s3612_s3 + $0x8] sm:$0xf] %vm2036_vm4, %v1989_v39  ;;  %v1569_v41 = vmax.f32 %v1567_v40, %v1568_v38  ;;  %v1306_v42 = vpop.f32.mrf.mxu2 }
  0xbd   :  { %v1431_v44 = vpop.f32.mrf.mxu3  ;;  %v1573_v52 = vsel %vm1541_vm3, %v1306_v42, -inf }
  0xbe   :  { %v1892_v46 = vadd.f32 %v2932_v8, %v1569_v41  ;;  %v1183_v47 = vpop.f32.mrf.mxu1  ;;  %v1582_v9 = vsel %vm1541_vm3, %v1431_v44, -inf }
  0xbf   :  { %v1571_v48 = vsel %vm1541_vm3, %v1183_v47, -inf  ;;  %v1063_v49 = vpop.f32.mrf.mxu0 }
  0xc0   :  { %v1941_v50 = vmax.f32 %v1892_v46, 0.0  ;;  %v1572_v51 = vmax.f32 %v1570_v43, %v1571_v48  ;;  %v1577_v59 = vsel %vm1541_vm3, %v1063_v49, -inf }
  0xc2   :  { %v1990_v53 = vpack.c.bf16 %v1941_v50, %v1941_v50  ;;  %v1574_v54 = vmax.f32 %v1572_v51, %v1573_v52 }
  0xc4   :  { %2040 = vst.msk [vmem:[%s3612_s3 + $0xc] sm:$0xf] %vm2036_vm4, %v1990_v53  ;;  %v1576_v56 = vmax.f32 %v1574_v54, %v1575_v55  ;;  %v1308_v58 = vpop.f32.mrf.mxu2 }
  0xc5   :  { %v1433_v62 = vpop.f32.mrf.mxu3  ;;  %v1580_v7 = vsel %vm1541_vm3, %v1308_v58, -inf }
  0xc6   :  { %v1893_v63 = vadd.f32 %v2932_v8, %v1576_v56  ;;  %v1186_v0 = vpop.f32.mrf.mxu1  ;;  %v1589_v25 = vsel %vm1541_vm3, %v1433_v62, -inf }
  0xc7   :  { %v1578_v3 = vsel %vm1541_vm3, %v1186_v0, -inf  ;;  %v1066_v4 = vpop.f32.mrf.mxu0  ;;  %v2662_v0 = vld [vmem:[%s3610_s0 + $0x1f0] sm:$0xff] }
  0xc8   :  { %v1942_v5 = vmax.f32 %v1893_v63, 0.0  ;;  %v1579_v6 = vmax.f32 %v1577_v59, %v1578_v3  ;;  %v1584_v14 = vsel %vm1541_vm3, %v1066_v4, -inf  ;;  %v2637_v63 = vld [vmem:[%s3610_s0 + $0x128] sm:$0xff] }
  0xc9   :  { %2537 = vmatmul.msk.bf16.gmra.mxu1 %vm740_vm2, %v2635_v60  ;;  %2562 = vmatmul.msk.bf16.gmra.mxu2 %vm740_vm2, %v2660_v61  ;;  %v2613_v4 = vld [vmem:[%s3610_s0 + $0x68] sm:$0xff] }
  0xca   :  { %v1991_v10 = vpack.c.bf16 %v1942_v5, %v1942_v5  ;;  %v1581_v11 = vmax.f32 %v1579_v6, %v1580_v7  ;;  %2513 = vmatmul.msk.bf16.gmra.mxu0 %vm740_vm2, %v2611_v1  ;;  %2587 = vmatmul.msk.bf16.gmra.mxu3 %vm740_vm2, %v2685_v2  ;;  %v2687_v5 = vld [vmem:[%s3610_s0 + $0x2b8] sm:$0xff] }
  0xcc   :  { %2041 = vst.msk [vmem:[%s3612_s3 + $0x10] sm:$0xf] %vm2036_vm4, %v1991_v10  ;;  %v1583_v12 = vmax.f32 %v1581_v11, %v1582_v9  ;;  %v1311_v13 = vpop.f32.mrf.mxu2 }
  0xcd   :  { %v1436_v15 = vpop.f32.mrf.mxu3  ;;  %v1587_v22 = vsel %vm1541_vm3, %v1311_v13, -inf }
  0xce   :  { %v1894_v16 = vadd.f32 %v2932_v8, %v1583_v12  ;;  %v1188_v17 = vpop.f32.mrf.mxu1  ;;  %v1596_v41 = vsel %vm1541_vm3, %v1436_v15, -inf }
  0xcf   :  { %v1585_v18 = vsel %vm1541_vm3, %v1188_v17, -inf  ;;  %v1068_v19 = vpop.f32.mrf.mxu0 }
  0xd0   :  { %v1943_v20 = vmax.f32 %v1894_v16, 0.0  ;;  %v1586_v21 = vmax.f32 %v1584_v14, %v1585_v18  ;;  %v1591_v28 = vsel %vm1541_vm3, %v1068_v19, -inf }
  0xd2   :  { %v1992_v23 = vpack.c.bf16 %v1943_v20, %v1943_v20  ;;  %v1588_v24 = vmax.f32 %v1586_v21, %v1587_v22 }
  0xd4   :  { %2042 = vst.msk [vmem:[%s3612_s3 + $0x14] sm:$0xf] %vm2036_vm4, %v1992_v23  ;;  %v1590_v26 = vmax.f32 %v1588_v24, %v1589_v25  ;;  %v1313_v27 = vpop.f32.mrf.mxu2 }
  0xd5   :  { %v1438_v31 = vpop.f32.mrf.mxu3  ;;  %v1594_v40 = vsel %vm1541_vm3, %v1313_v27, -inf }
  0xd6   :  { %v1895_v32 = vadd.f32 %v2932_v8, %v1590_v26  ;;  %v1191_v33 = vpop.f32.mrf.mxu1  ;;  %v1603_v59 = vsel %vm1541_vm3, %v1438_v31, -inf }
  0xd7   :  { %v1592_v36 = vsel %vm1541_vm3, %v1191_v33, -inf  ;;  %v1071_v37 = vpop.f32.mrf.mxu0  ;;  %v2663_v33 = vld [vmem:[%s3610_s0 + $0x1f8] sm:$0xff] }
  0xd8   :  { %v1944_v38 = vmax.f32 %v1895_v32, 0.0  ;;  %v1593_v39 = vmax.f32 %v1591_v28, %v1592_v36  ;;  %v1598_v47 = vsel %vm1541_vm3, %v1071_v37, -inf  ;;  %v2638_v32 = vld [vmem:[%s3610_s0 + $0x130] sm:$0xff] }
  0xd9   :  { %2538 = vmatmul.msk.bf16.gmra.mxu1 %vm740_vm2, %v2636_v29  ;;  %2563 = vmatmul.msk.bf16.gmra.mxu2 %vm740_vm2, %v2661_v30  ;;  %v2614_v37 = vld [vmem:[%s3610_s0 + $0x70] sm:$0xff] }
  0xda   :  { %v1993_v42 = vpack.c.bf16 %v1944_v38, %v1944_v38  ;;  %v1595_v43 = vmax.f32 %v1593_v39, %v1594_v40  ;;  %2514 = vmatmul.msk.bf16.gmra.mxu0 %vm740_vm2, %v2612_v34  ;;  %2588 = vmatmul.msk.bf16.gmra.mxu3 %vm740_vm2, %v2686_v35  ;;  %v2688_v38 = vld [vmem:[%s3610_s0 + $0x2c0] sm:$0xff] }
  0xdc   :  { %2043 = vst.msk [vmem:[%s3612_s3 + $0x18] sm:$0xf] %vm2036_vm4, %v1993_v42  ;;  %v1597_v44 = vmax.f32 %v1595_v43, %v1596_v41  ;;  %v1316_v46 = vpop.f32.mrf.mxu2 }
  0xdd   :  { %v1441_v48 = vpop.f32.mrf.mxu3  ;;  %v1601_v55 = vsel %vm1541_vm3, %v1316_v46, -inf }
  0xde   :  { %v1896_v49 = vadd.f32 %v2932_v8, %v1597_v44  ;;  %v1193_v50 = vpop.f32.mrf.mxu1  ;;  %v1610_v12 = vsel %vm1541_vm3, %v1441_v48, -inf }
  0xdf   :  { %v1599_v51 = vsel %vm1541_vm3, %v1193_v50, -inf  ;;  %v1073_v52 = vpop.f32.mrf.mxu0 }
  0xe0   :  { %v1945_v53 = vmax.f32 %v1896_v49, 0.0  ;;  %v1600_v54 = vmax.f32 %v1598_v47, %v1599_v51  ;;  %v1605_v62 = vsel %vm1541_vm3, %v1073_v52, -inf }
  0xe2   :  { %v1994_v56 = vpack.c.bf16 %v1945_v53, %v1945_v53  ;;  %v1602_v58 = vmax.f32 %v1600_v54, %v1601_v55 }
  0xe4   :  { %2044 = vst.msk [vmem:[%s3612_s3 + $0x1c] sm:$0xf] %vm2036_vm4, %v1994_v56  ;;  %v1604_v60 = vmax.f32 %v1602_v58, %v1603_v59  ;;  %v1318_v61 = vpop.f32.mrf.mxu2 }
  0xe5   :  { %v1443_v1 = vpop.f32.mrf.mxu3  ;;  %v1608_v11 = vsel %vm1541_vm3, %v1318_v61, -inf }
  0xe6   :  { %v1897_v2 = vadd.f32 %v2932_v8, %v1604_v60  ;;  %v1196_v3 = vpop.f32.mrf.mxu1  ;;  %v1617_v28 = vsel %vm1541_vm3, %v1443_v1, -inf }
  0xe7   :  { %v1606_v6 = vsel %vm1541_vm3, %v1196_v3, -inf  ;;  %v1076_v7 = vpop.f32.mrf.mxu0  ;;  %v2664_v3 = vld [vmem:[%s3610_s0 + $0x200] sm:$0xff] }
  0xe8   :  { %v1946_v9 = vmax.f32 %v1897_v2, 0.0  ;;  %v1607_v10 = vmax.f32 %v1605_v62, %v1606_v6  ;;  %v1612_v17 = vsel %vm1541_vm3, %v1076_v7, -inf  ;;  %v2639_v2 = vld [vmem:[%s3610_s0 + $0x138] sm:$0xff] }
  0xe9   :  { %2539 = vmatmul.msk.bf16.gmra.mxu1 %vm740_vm2, %v2637_v63  ;;  %2564 = vmatmul.msk.bf16.gmra.mxu2 %vm740_vm2, %v2662_v0  ;;  %v2615_v7 = vld [vmem:[%s3610_s0 + $0x78] sm:$0xff] }
  0xea   :  { %v1995_v13 = vpack.c.bf16 %v1946_v9, %v1946_v9  ;;  %v1609_v14 = vmax.f32 %v1607_v10, %v1608_v11  ;;  %2515 = vmatmul.msk.bf16.gmra.mxu0 %vm740_vm2, %v2613_v4  ;;  %2589 = vmatmul.msk.bf16.gmra.mxu3 %vm740_vm2, %v2687_v5  ;;  %v2689_v9 = vld [vmem:[%s3610_s0 + $0x2c8] sm:$0xff] }
  0xec   :  { %2045 = vst.msk [vmem:[%s3612_s3 + $0x20] sm:$0xf] %vm2036_vm4, %v1995_v13  ;;  %v1611_v15 = vmax.f32 %v1609_v14, %v1610_v12  ;;  %v1321_v16 = vpop.f32.mrf.mxu2 }
  0xed   :  { %v1446_v18 = vpop.f32.mrf.mxu3  ;;  %v1615_v25 = vsel %vm1541_vm3, %v1321_v16, -inf }
  0xee   :  { %v1898_v19 = vadd.f32 %v2932_v8, %v1611_v15  ;;  %v1198_v20 = vpop.f32.mrf.mxu1  ;;  %v1624_v44 = vsel %vm1541_vm3, %v1446_v18, -inf }
  0xef   :  { %v1613_v21 = vsel %vm1541_vm3, %v1198_v20, -inf  ;;  %v1078_v22 = vpop.f32.mrf.mxu0 }
  0xf0   :  { %v1947_v23 = vmax.f32 %v1898_v19, 0.0  ;;  %v1614_v24 = vmax.f32 %v1612_v17, %v1613_v21  ;;  %v1619_v31 = vsel %vm1541_vm3, %v1078_v22, -inf }
  0xf2   :  { %v1996_v26 = vpack.c.bf16 %v1947_v23, %v1947_v23  ;;  %v1616_v27 = vmax.f32 %v1614_v24, %v1615_v25 }
  0xf4   :  { %2046 = vst.msk [vmem:[%s3612_s3 + $0x24] sm:$0xf] %vm2036_vm4, %v1996_v26  ;;  %v1618_v29 = vmax.f32 %v1616_v27, %v1617_v28  ;;  %v1323_v30 = vpop.f32.mrf.mxu2 }
  0xf5   :  { %v1448_v34 = vpop.f32.mrf.mxu3  ;;  %v1622_v43 = vsel %vm1541_vm3, %v1323_v30, -inf }
  0xf6   :  { %v1899_v35 = vadd.f32 %v2932_v8, %v1618_v29  ;;  %v1201_v36 = vpop.f32.mrf.mxu1  ;;  %v1631_v62 = vsel %vm1541_vm3, %v1448_v34, -inf }
  0xf7   :  { %v1620_v39 = vsel %vm1541_vm3, %v1201_v36, -inf  ;;  %v1081_v40 = vpop.f32.mrf.mxu0  ;;  %v2665_v36 = vld [vmem:[%s3610_s0 + $0x208] sm:$0xff] }
  0xf8   :  { %v1948_v41 = vmax.f32 %v1899_v35, 0.0  ;;  %v1621_v42 = vmax.f32 %v1619_v31, %v1620_v39  ;;  %v1626_v50 = vsel %vm1541_vm3, %v1081_v40, -inf  ;;  %v2640_v35 = vld [vmem:[%s3610_s0 + $0x140] sm:$0xff] }
  0xf9   :  { %2540 = vmatmul.msk.bf16.gmra.mxu1 %vm740_vm2, %v2638_v32  ;;  %2565 = vmatmul.msk.bf16.gmra.mxu2 %vm740_vm2, %v2663_v33  ;;  %v2616_v40 = vld [vmem:[%s3610_s0 + $0x80] sm:$0xff] }
  0xfa   :  { %v1997_v46 = vpack.c.bf16 %v1948_v41, %v1948_v41  ;;  %v1623_v47 = vmax.f32 %v1621_v42, %v1622_v43  ;;  %2516 = vmatmul.msk.bf16.gmra.mxu0 %vm740_vm2, %v2614_v37  ;;  %2590 = vmatmul.msk.bf16.gmra.mxu3 %vm740_vm2, %v2688_v38  ;;  %v2690_v41 = vld [vmem:[%s3610_s0 + $0x2d0] sm:$0xff] }
  0xfc   :  { %2047 = vst.msk [vmem:[%s3612_s3 + $0x28] sm:$0xf] %vm2036_vm4, %v1997_v46  ;;  %v1625_v48 = vmax.f32 %v1623_v47, %v1624_v44  ;;  %v1326_v49 = vpop.f32.mrf.mxu2 }
  0xfd   :  { %v1451_v51 = vpop.f32.mrf.mxu3  ;;  %v1629_v59 = vsel %vm1541_vm3, %v1326_v49, -inf }
  0xfe   :  { %v1900_v52 = vadd.f32 %v2932_v8, %v1625_v48  ;;  %v1203_v53 = vpop.f32.mrf.mxu1  ;;  %v1638_v15 = vsel %vm1541_vm3, %v1451_v51, -inf }
  0xff   :  { %v1627_v54 = vsel %vm1541_vm3, %v1203_v53, -inf  ;;  %v1083_v55 = vpop.f32.mrf.mxu0 }
 0x100   :  { %v1949_v56 = vmax.f32 %v1900_v52, 0.0  ;;  %v1628_v58 = vmax.f32 %v1626_v50, %v1627_v54  ;;  %v1633_v1 = vsel %vm1541_vm3, %v1083_v55, -inf }
 0x102   :  { %v1998_v60 = vpack.c.bf16 %v1949_v56, %v1949_v56  ;;  %v1630_v61 = vmax.f32 %v1628_v58, %v1629_v59 }
 0x104   :  { %2048 = vst.msk [vmem:[%s3612_s3 + $0x2c] sm:$0xf] %vm2036_vm4, %v1998_v60  ;;  %v1632_v63 = vmax.f32 %v1630_v61, %v1631_v62  ;;  %v1328_v0 = vpop.f32.mrf.mxu2 }
 0x105   :  { %v1453_v4 = vpop.f32.mrf.mxu3  ;;  %v1636_v14 = vsel %vm1541_vm3, %v1328_v0, -inf }
 0x106   :  { %v1901_v5 = vadd.f32 %v2932_v8, %v1632_v63  ;;  %v1206_v6 = vpop.f32.mrf.mxu1  ;;  %v1645_v31 = vsel %vm1541_vm3, %v1453_v4, -inf }
 0x107   :  { %v1634_v10 = vsel %vm1541_vm3, %v1206_v6, -inf  ;;  %v1086_v11 = vpop.f32.mrf.mxu0  ;;  %v2666_v6 = vld [vmem:[%s3610_s0 + $0x210] sm:$0xff] }
 0x108   :  { %v1950_v12 = vmax.f32 %v1901_v5, 0.0  ;;  %v1635_v13 = vmax.f32 %v1633_v1, %v1634_v10  ;;  %v1640_v20 = vsel %vm1541_vm3, %v1086_v11, -inf  ;;  %v2641_v5 = vld [vmem:[%s3610_s0 + $0x148] sm:$0xff] }
 0x109   :  { %2541 = vmatmul.msk.bf16.gmra.mxu1 %vm740_vm2, %v2639_v2  ;;  %2566 = vmatmul.msk.bf16.gmra.mxu2 %vm740_vm2, %v2664_v3  ;;  %v2617_v11 = vld [vmem:[%s3610_s0 + $0x88] sm:$0xff] }
 0x10a   :  { %v1999_v16 = vpack.c.bf16 %v1950_v12, %v1950_v12  ;;  %v1637_v17 = vmax.f32 %v1635_v13, %v1636_v14  ;;  %2517 = vmatmul.msk.bf16.gmra.mxu0 %vm740_vm2, %v2615_v7  ;;  %2591 = vmatmul.msk.bf16.gmra.mxu3 %vm740_vm2, %v2689_v9  ;;  %v2691_v12 = vld [vmem:[%s3610_s0 + $0x2d8] sm:$0xff] }
 0x10c   :  { %2049 = vst.msk [vmem:[%s3612_s3 + $0x30] sm:$0xf] %vm2036_vm4, %v1999_v16  ;;  %v1639_v18 = vmax.f32 %v1637_v17, %v1638_v15  ;;  %v1331_v19 = vpop.f32.mrf.mxu2 }
 0x10d   :  { %v1456_v21 = vpop.f32.mrf.mxu3  ;;  %v1643_v28 = vsel %vm1541_vm3, %v1331_v19, -inf }
 0x10e   :  { %v1902_v22 = vadd.f32 %v2932_v8, %v1639_v18  ;;  %v1208_v23 = vpop.f32.mrf.mxu1  ;;  %v1652_v48 = vsel %vm1541_vm3, %v1456_v21, -inf }
 0x10f   :  { %v1641_v24 = vsel %vm1541_vm3, %v1208_v23, -inf  ;;  %v1088_v25 = vpop.f32.mrf.mxu0 }
 0x110   :  { %v1951_v26 = vmax.f32 %v1902_v22, 0.0  ;;  %v1642_v27 = vmax.f32 %v1640_v20, %v1641_v24  ;;  %v1647_v34 = vsel %vm1541_vm3, %v1088_v25, -inf }
 0x112   :  { %v2000_v29 = vpack.c.bf16 %v1951_v26, %v1951_v26  ;;  %v1644_v30 = vmax.f32 %v1642_v27, %v1643_v28 }
 0x114   :  { %2050 = vst.msk [vmem:[%s3612_s3 + $0x34] sm:$0xf] %vm2036_vm4, %v2000_v29  ;;  %v1646_v32 = vmax.f32 %v1644_v30, %v1645_v31  ;;  %v1333_v33 = vpop.f32.mrf.mxu2 }
 0x115   :  { %v1458_v37 = vpop.f32.mrf.mxu3  ;;  %v1650_v47 = vsel %vm1541_vm3, %v1333_v33, -inf }
 0x116   :  { %v1903_v38 = vadd.f32 %v2932_v8, %v1646_v32  ;;  %v1211_v39 = vpop.f32.mrf.mxu1  ;;  %v1659_v1 = vsel %vm1541_vm3, %v1458_v37, -inf }
 0x117   :  { %v1648_v42 = vsel %vm1541_vm3, %v1211_v39, -inf  ;;  %v1091_v43 = vpop.f32.mrf.mxu0  ;;  %v2667_v39 = vld [vmem:[%s3610_s0 + $0x218] sm:$0xff] }
 0x118   :  { %v1952_v44 = vmax.f32 %v1903_v38, 0.0  ;;  %v1649_v46 = vmax.f32 %v1647_v34, %v1648_v42  ;;  %v1654_v53 = vsel %vm1541_vm3, %v1091_v43, -inf  ;;  %v2642_v38 = vld [vmem:[%s3610_s0 + $0x150] sm:$0xff] }
 0x119   :  { %2542 = vmatmul.msk.bf16.gmra.mxu1 %vm740_vm2, %v2640_v35  ;;  %2567 = vmatmul.msk.bf16.gmra.mxu2 %vm740_vm2, %v2665_v36  ;;  %v2618_v43 = vld [vmem:[%s3610_s0 + $0x90] sm:$0xff] }
 0x11a   :  { %v2001_v49 = vpack.c.bf16 %v1952_v44, %v1952_v44  ;;  %v1651_v50 = vmax.f32 %v1649_v46, %v1650_v47  ;;  %2518 = vmatmul.msk.bf16.gmra.mxu0 %vm740_vm2, %v2616_v40  ;;  %2592 = vmatmul.msk.bf16.gmra.mxu3 %vm740_vm2, %v2690_v41  ;;  %v2692_v44 = vld [vmem:[%s3610_s0 + $0x2e0] sm:$0xff] }
 0x11c   :  { %2051 = vst.msk [vmem:[%s3612_s3 + $0x38] sm:$0xf] %vm2036_vm4, %v2001_v49  ;;  %v1653_v51 = vmax.f32 %v1651_v50, %v1652_v48  ;;  %v1336_v52 = vpop.f32.mrf.mxu2 }
 0x11d   :  { %v1461_v54 = vpop.f32.mrf.mxu3  ;;  %v1657_v62 = vsel %vm1541_vm3, %v1336_v52, -inf }
 0x11e   :  { %v1904_v55 = vadd.f32 %v2932_v8, %v1653_v51  ;;  %v1213_v56 = vpop.f32.mrf.mxu1  ;;  %v1666_v18 = vsel %vm1541_vm3, %v1461_v54, -inf }
 0x11f   :  { %v1655_v58 = vsel %vm1541_vm3, %v1213_v56, -inf  ;;  %v1093_v59 = vpop.f32.mrf.mxu0 }
 0x120   :  { %v1953_v60 = vmax.f32 %v1904_v55, 0.0  ;;  %v1656_v61 = vmax.f32 %v1654_v53, %v1655_v58  ;;  %v1661_v4 = vsel %vm1541_vm3, %v1093_v59, -inf }
 0x122   :  { %v2002_v63 = vpack.c.bf16 %v1953_v60, %v1953_v60  ;;  %v1658_v0 = vmax.f32 %v1656_v61, %v1657_v62 }
 0x124   :  { %2052 = vst.msk [vmem:[%s3612_s3 + $0x3c] sm:$0xf] %vm2036_vm4, %v2002_v63  ;;  %v1660_v2 = vmax.f32 %v1658_v0, %v1659_v1  ;;  %v1338_v3 = vpop.f32.mrf.mxu2 }
 0x125   :  { %v1463_v7 = vpop.f32.mrf.mxu3  ;;  %v1664_v17 = vsel %vm1541_vm3, %v1338_v3, -inf }
 0x126   :  { %v1905_v9 = vadd.f32 %v2932_v8, %v1660_v2  ;;  %v1216_v10 = vpop.f32.mrf.mxu1  ;;  %v1673_v34 = vsel %vm1541_vm3, %v1463_v7, -inf }
 0x127   :  { %v1662_v13 = vsel %vm1541_vm3, %v1216_v10, -inf  ;;  %v1096_v14 = vpop.f32.mrf.mxu0  ;;  %v2668_v10 = vld [vmem:[%s3610_s0 + $0x220] sm:$0xff] }
 0x128   :  { %v1954_v15 = vmax.f32 %v1905_v9, 0.0  ;;  %v1663_v16 = vmax.f32 %v1661_v4, %v1662_v13  ;;  %v1668_v23 = vsel %vm1541_vm3, %v1096_v14, -inf  ;;  %v2643_v9 = vld [vmem:[%s3610_s0 + $0x158] sm:$0xff] }
 0x129   :  { %2543 = vmatmul.msk.bf16.gmra.mxu1 %vm740_vm2, %v2641_v5  ;;  %2568 = vmatmul.msk.bf16.gmra.mxu2 %vm740_vm2, %v2666_v6  ;;  %v2619_v14 = vld [vmem:[%s3610_s0 + $0x98] sm:$0xff] }
 0x12a   :  { %v2003_v19 = vpack.c.bf16 %v1954_v15, %v1954_v15  ;;  %v1665_v20 = vmax.f32 %v1663_v16, %v1664_v17  ;;  %2519 = vmatmul.msk.bf16.gmra.mxu0 %vm740_vm2, %v2617_v11  ;;  %2593 = vmatmul.msk.bf16.gmra.mxu3 %vm740_vm2, %v2691_v12  ;;  %v2693_v15 = vld [vmem:[%s3610_s0 + $0x2e8] sm:$0xff] }
 0x12c   :  { %2053 = vst.msk [vmem:[%s3612_s3 + $0x40] sm:$0xf] %vm2036_vm4, %v2003_v19  ;;  %v1667_v21 = vmax.f32 %v1665_v20, %v1666_v18  ;;  %v1341_v22 = vpop.f32.mrf.mxu2 }
 0x12d   :  { %v1466_v24 = vpop.f32.mrf.mxu3  ;;  %v1671_v31 = vsel %vm1541_vm3, %v1341_v22, -inf }
 0x12e   :  { %v1906_v25 = vadd.f32 %v2932_v8, %v1667_v21  ;;  %v1218_v26 = vpop.f32.mrf.mxu1  ;;  %v1680_v51 = vsel %vm1541_vm3, %v1466_v24, -inf }
 0x12f   :  { %v1669_v27 = vsel %vm1541_vm3, %v1218_v26, -inf  ;;  %v1098_v28 = vpop.f32.mrf.mxu0 }
 0x130   :  { %v1955_v29 = vmax.f32 %v1906_v25, 0.0  ;;  %v1670_v30 = vmax.f32 %v1668_v23, %v1669_v27  ;;  %v1675_v37 = vsel %vm1541_vm3, %v1098_v28, -inf }
 0x132   :  { %v2004_v32 = vpack.c.bf16 %v1955_v29, %v1955_v29  ;;  %v1672_v33 = vmax.f32 %v1670_v30, %v1671_v31 }
 0x134   :  { %2054 = vst.msk [vmem:[%s3612_s3 + $0x44] sm:$0xf] %vm2036_vm4, %v2004_v32  ;;  %v1674_v35 = vmax.f32 %v1672_v33, %v1673_v34  ;;  %v1343_v36 = vpop.f32.mrf.mxu2 }
 0x135   :  { %v1468_v40 = vpop.f32.mrf.mxu3  ;;  %v1678_v50 = vsel %vm1541_vm3, %v1343_v36, -inf }
 0x136   :  { %v1907_v41 = vadd.f32 %v2932_v8, %v1674_v35  ;;  %v1221_v42 = vpop.f32.mrf.mxu1  ;;  %v1687_v4 = vsel %vm1541_vm3, %v1468_v40, -inf }
 0x137   :  { %v1676_v46 = vsel %vm1541_vm3, %v1221_v42, -inf  ;;  %v1101_v47 = vpop.f32.mrf.mxu0  ;;  %v2669_v42 = vld [vmem:[%s3610_s0 + $0x228] sm:$0xff] }
 0x138   :  { %v1956_v48 = vmax.f32 %v1907_v41, 0.0  ;;  %v1677_v49 = vmax.f32 %v1675_v37, %v1676_v46  ;;  %v1682_v56 = vsel %vm1541_vm3, %v1101_v47, -inf  ;;  %v2644_v41 = vld [vmem:[%s3610_s0 + $0x160] sm:$0xff] }
 0x139   :  { %2544 = vmatmul.msk.bf16.gmra.mxu1 %vm740_vm2, %v2642_v38  ;;  %2569 = vmatmul.msk.bf16.gmra.mxu2 %vm740_vm2, %v2667_v39  ;;  %v2620_v47 = vld [vmem:[%s3610_s0 + $0xa0] sm:$0xff] }
 0x13a   :  { %v2005_v52 = vpack.c.bf16 %v1956_v48, %v1956_v48  ;;  %v1679_v53 = vmax.f32 %v1677_v49, %v1678_v50  ;;  %2520 = vmatmul.msk.bf16.gmra.mxu0 %vm740_vm2, %v2618_v43  ;;  %2594 = vmatmul.msk.bf16.gmra.mxu3 %vm740_vm2, %v2692_v44  ;;  %v2694_v48 = vld [vmem:[%s3610_s0 + $0x2f0] sm:$0xff] }
 0x13c   :  { %2055 = vst.msk [vmem:[%s3612_s3 + $0x48] sm:$0xf] %vm2036_vm4, %v2005_v52  ;;  %v1681_v54 = vmax.f32 %v1679_v53, %v1680_v51  ;;  %v1346_v55 = vpop.f32.mrf.mxu2 }
 0x13d   :  { %v1471_v58 = vpop.f32.mrf.mxu3  ;;  %v1685_v1 = vsel %vm1541_vm3, %v1346_v55, -inf }
 0x13e   :  { %v1908_v59 = vadd.f32 %v2932_v8, %v1681_v54  ;;  %v1223_v60 = vpop.f32.mrf.mxu1  ;;  %v1694_v21 = vsel %vm1541_vm3, %v1471_v58, -inf }
 0x13f   :  { %v1683_v61 = vsel %vm1541_vm3, %v1223_v60, -inf  ;;  %v1103_v62 = vpop.f32.mrf.mxu0 }
 0x140   :  { %v1957_v63 = vmax.f32 %v1908_v59, 0.0  ;;  %v1684_v0 = vmax.f32 %v1682_v56, %v1683_v61  ;;  %v1689_v7 = vsel %vm1541_vm3, %v1103_v62, -inf }
 0x142   :  { %v2006_v2 = vpack.c.bf16 %v1957_v63, %v1957_v63  ;;  %v1686_v3 = vmax.f32 %v1684_v0, %v1685_v1 }
 0x144   :  { %2056 = vst.msk [vmem:[%s3612_s3 + $0x4c] sm:$0xf] %vm2036_vm4, %v2006_v2  ;;  %v1688_v5 = vmax.f32 %v1686_v3, %v1687_v4  ;;  %v1348_v6 = vpop.f32.mrf.mxu2 }
 0x145   :  { %v1473_v11 = vpop.f32.mrf.mxu3  ;;  %v1692_v20 = vsel %vm1541_vm3, %v1348_v6, -inf }
 0x146   :  { %v1909_v12 = vadd.f32 %v2932_v8, %v1688_v5  ;;  %v1226_v13 = vpop.f32.mrf.mxu1  ;;  %v1701_v37 = vsel %vm1541_vm3, %v1473_v11, -inf }
 0x147   :  { %v1690_v16 = vsel %vm1541_vm3, %v1226_v13, -inf  ;;  %v1106_v17 = vpop.f32.mrf.mxu0  ;;  %v2670_v13 = vld [vmem:[%s3610_s0 + $0x230] sm:$0xff] }
 0x148   :  { %v1958_v18 = vmax.f32 %v1909_v12, 0.0  ;;  %v1691_v19 = vmax.f32 %v1689_v7, %v1690_v16  ;;  %v1696_v26 = vsel %vm1541_vm3, %v1106_v17, -inf  ;;  %v2645_v12 = vld [vmem:[%s3610_s0 + $0x168] sm:$0xff] }
 0x149   :  { %2545 = vmatmul.msk.bf16.gmra.mxu1 %vm740_vm2, %v2643_v9  ;;  %2570 = vmatmul.msk.bf16.gmra.mxu2 %vm740_vm2, %v2668_v10  ;;  %v2621_v17 = vld [vmem:[%s3610_s0 + $0xa8] sm:$0xff] }
 0x14a   :  { %v2007_v22 = vpack.c.bf16 %v1958_v18, %v1958_v18  ;;  %v1693_v23 = vmax.f32 %v1691_v19, %v1692_v20  ;;  %2521 = vmatmul.msk.bf16.gmra.mxu0 %vm740_vm2, %v2619_v14  ;;  %2595 = vmatmul.msk.bf16.gmra.mxu3 %vm740_vm2, %v2693_v15  ;;  %v2695_v18 = vld [vmem:[%s3610_s0 + $0x2f8] sm:$0xff] }
 0x14c   :  { %2057 = vst.msk [vmem:[%s3612_s3 + $0x50] sm:$0xf] %vm2036_vm4, %v2007_v22  ;;  %v1695_v24 = vmax.f32 %v1693_v23, %v1694_v21  ;;  %v1351_v25 = vpop.f32.mrf.mxu2 }
 0x14d   :  { %v1476_v27 = vpop.f32.mrf.mxu3  ;;  %v1699_v34 = vsel %vm1541_vm3, %v1351_v25, -inf }
 0x14e   :  { %v1910_v28 = vadd.f32 %v2932_v8, %v1695_v24  ;;  %v1228_v29 = vpop.f32.mrf.mxu1  ;;  %v1708_v54 = vsel %vm1541_vm3, %v1476_v27, -inf }
 0x14f   :  { %v1697_v30 = vsel %vm1541_vm3, %v1228_v29, -inf  ;;  %v1108_v31 = vpop.f32.mrf.mxu0 }
 0x150   :  { %v1959_v32 = vmax.f32 %v1910_v28, 0.0  ;;  %v1698_v33 = vmax.f32 %v1696_v26, %v1697_v30  ;;  %v1703_v40 = vsel %vm1541_vm3, %v1108_v31, -inf }
 0x152   :  { %v2008_v35 = vpack.c.bf16 %v1959_v32, %v1959_v32  ;;  %v1700_v36 = vmax.f32 %v1698_v33, %v1699_v34 }
 0x154   :  { %2058 = vst.msk [vmem:[%s3612_s3 + $0x54] sm:$0xf] %vm2036_vm4, %v2008_v35  ;;  %v1702_v38 = vmax.f32 %v1700_v36, %v1701_v37  ;;  %v1353_v39 = vpop.f32.mrf.mxu2 }
 0x155   :  { %v1478_v43 = vpop.f32.mrf.mxu3  ;;  %v1706_v53 = vsel %vm1541_vm3, %v1353_v39, -inf }
 0x156   :  { %v1911_v44 = vadd.f32 %v2932_v8, %v1702_v38  ;;  %v1231_v46 = vpop.f32.mrf.mxu1  ;;  %v1715_v7 = vsel %vm1541_vm3, %v1478_v43, -inf }
 0x157   :  { %v1704_v49 = vsel %vm1541_vm3, %v1231_v46, -inf  ;;  %v1111_v50 = vpop.f32.mrf.mxu0  ;;  %v2671_v46 = vld [vmem:[%s3610_s0 + $0x238] sm:$0xff] }
 0x158   :  { %v1960_v51 = vmax.f32 %v1911_v44, 0.0  ;;  %v1705_v52 = vmax.f32 %v1703_v40, %v1704_v49  ;;  %v1710_v60 = vsel %vm1541_vm3, %v1111_v50, -inf  ;;  %v2646_v44 = vld [vmem:[%s3610_s0 + $0x170] sm:$0xff] }
 0x159   :  { %2546 = vmatmul.msk.bf16.gmra.mxu1 %vm740_vm2, %v2644_v41  ;;  %2571 = vmatmul.msk.bf16.gmra.mxu2 %vm740_vm2, %v2669_v42  ;;  %v2622_v50 = vld [vmem:[%s3610_s0 + $0xb0] sm:$0xff] }
 0x15a   :  { %v2009_v55 = vpack.c.bf16 %v1960_v51, %v1960_v51  ;;  %v1707_v56 = vmax.f32 %v1705_v52, %v1706_v53  ;;  %2522 = vmatmul.msk.bf16.gmra.mxu0 %vm740_vm2, %v2620_v47  ;;  %2596 = vmatmul.msk.bf16.gmra.mxu3 %vm740_vm2, %v2694_v48  ;;  %v2696_v51 = vld [vmem:[%s3610_s0 + $0x300] sm:$0xff] }
 0x15c   :  { %2059 = vst.msk [vmem:[%s3612_s3 + $0x58] sm:$0xf] %vm2036_vm4, %v2009_v55  ;;  %v1709_v58 = vmax.f32 %v1707_v56, %v1708_v54  ;;  %v1356_v59 = vpop.f32.mrf.mxu2 }
 0x15d   :  { %v1481_v61 = vpop.f32.mrf.mxu3  ;;  %v1713_v4 = vsel %vm1541_vm3, %v1356_v59, -inf }
 0x15e   :  { %v1912_v62 = vadd.f32 %v2932_v8, %v1709_v58  ;;  %v1233_v63 = vpop.f32.mrf.mxu1  ;;  %v1722_v24 = vsel %vm1541_vm3, %v1481_v61, -inf }
 0x15f   :  { %v1711_v0 = vsel %vm1541_vm3, %v1233_v63, -inf  ;;  %v1113_v1 = vpop.f32.mrf.mxu0 }
 0x160   :  { %v1961_v2 = vmax.f32 %v1912_v62, 0.0  ;;  %v1712_v3 = vmax.f32 %v1710_v60, %v1711_v0  ;;  %v1717_v11 = vsel %vm1541_vm3, %v1113_v1, -inf }
 0x162   :  { %v2010_v5 = vpack.c.bf16 %v1961_v2, %v1961_v2  ;;  %v1714_v6 = vmax.f32 %v1712_v3, %v1713_v4 }
 0x164   :  { %2060 = vst.msk [vmem:[%s3612_s3 + $0x5c] sm:$0xf] %vm2036_vm4, %v2010_v5  ;;  %v1716_v9 = vmax.f32 %v1714_v6, %v1715_v7  ;;  %v1358_v10 = vpop.f32.mrf.mxu2 }
 0x165   :  { %v1483_v14 = vpop.f32.mrf.mxu3  ;;  %v1720_v23 = vsel %vm1541_vm3, %v1358_v10, -inf }
 0x166   :  { %v1913_v15 = vadd.f32 %v2932_v8, %v1716_v9  ;;  %v1236_v16 = vpop.f32.mrf.mxu1  ;;  %v1729_v40 = vsel %vm1541_vm3, %v1483_v14, -inf  ;;  %v2647_v14 = vld [vmem:[%s3610_s0 + $0x178] sm:$0xff] }
 0x167   :  { %v1718_v19 = vsel %vm1541_vm3, %v1236_v16, -inf  ;;  %v1116_v20 = vpop.f32.mrf.mxu0 }
 0x168   :  { %v1962_v21 = vmax.f32 %v1913_v15, 0.0  ;;  %v1719_v22 = vmax.f32 %v1717_v11, %v1718_v19  ;;  %v1724_v29 = vsel %vm1541_vm3, %v1116_v20, -inf  ;;  %v2672_v15 = vld [vmem:[%s3610_s0 + $0x240] sm:$0xff]  ;;  %v2623_v20 = vld [vmem:[%s3610_s0 + $0xb8] sm:$0xff] }
 0x169   :  { %2547 = vmatmul.msk.bf16.gmra.mxu1 %vm740_vm2, %v2645_v12  ;;  %2572 = vmatmul.msk.bf16.gmra.mxu2 %vm740_vm2, %v2670_v13 }
 0x16a   :  { %v2011_v25 = vpack.c.bf16 %v1962_v21, %v1962_v21  ;;  %v1721_v26 = vmax.f32 %v1719_v22, %v1720_v23  ;;  %2523 = vmatmul.msk.bf16.gmra.mxu0 %vm740_vm2, %v2621_v17  ;;  %2597 = vmatmul.msk.bf16.gmra.mxu3 %vm740_vm2, %v2695_v18  ;;  %v3397_v17 = vld [vmem:[%s3611_s2] ss:$0 sm:$0xff]  ;;  %v2697_v21 = vld [vmem:[%s3610_s0 + $0x308] sm:$0xff] }
 0x16c   :  { %2061 = vst.msk [vmem:[%s3612_s3 + $0x60] sm:$0xf] %vm2036_vm4, %v2011_v25  ;;  %v1723_v27 = vmax.f32 %v1721_v26, %v1722_v24  ;;  %v1361_v28 = vpop.f32.mrf.mxu2 }
 0x16d   :  { %v1486_v30 = vpop.f32.mrf.mxu3  ;;  %v1727_v37 = vsel %vm1541_vm3, %v1361_v28, -inf }
 0x16e   :  { %v1914_v31 = vadd.f32 %v2932_v8, %v1723_v27  ;;  %v1238_v32 = vpop.f32.mrf.mxu1  ;;  %v1736_v58 = vsel %vm1541_vm3, %v1486_v30, -inf }
 0x16f   :  { %v1725_v33 = vsel %vm1541_vm3, %v1238_v32, -inf  ;;  %v1118_v34 = vpop.f32.mrf.mxu0 }
 0x170   :  { %v1963_v35 = vmax.f32 %v1914_v31, 0.0  ;;  %v1726_v36 = vmax.f32 %v1724_v29, %v1725_v33  ;;  %v1731_v43 = vsel %vm1541_vm3, %v1118_v34, -inf }
 0x172   :  { %v2012_v38 = vpack.c.bf16 %v1963_v35, %v1963_v35  ;;  %v1728_v39 = vmax.f32 %v1726_v36, %v1727_v37 }
 0x174   :  { %2062 = vst.msk [vmem:[%s3612_s3 + $0x64] sm:$0xf] %vm2036_vm4, %v2012_v38  ;;  %v1730_v41 = vmax.f32 %v1728_v39, %v1729_v40  ;;  %v1363_v42 = vpop.f32.mrf.mxu2 }
 0x175   :  { %v1488_v47 = vpop.f32.mrf.mxu3  ;;  %v1734_v56 = vsel %vm1541_vm3, %v1363_v42, -inf }
 0x176   :  { %v1915_v48 = vadd.f32 %v2932_v8, %v1730_v41  ;;  %v1241_v49 = vpop.f32.mrf.mxu1  ;;  %v1743_v11 = vsel %vm1541_vm3, %v1488_v47, -inf }
 0x177   :  { %v1732_v52 = vsel %vm1541_vm3, %v1241_v49, -inf  ;;  %v1121_v53 = vpop.f32.mrf.mxu0  ;;  %v2673_v49 = vld [vmem:[%s3610_s0 + $0x248] sm:$0xff] }
 0x178   :  { %v1964_v54 = vmax.f32 %v1915_v48, 0.0  ;;  %v1733_v55 = vmax.f32 %v1731_v43, %v1732_v52  ;;  %v1738_v63 = vsel %vm1541_vm3, %v1121_v53, -inf  ;;  %v2648_v48 = vld [vmem:[%s3610_s0 + $0x180] sm:$0xff] }
 0x179   :  { %2548 = vmatmul.msk.bf16.gmra.mxu1 %vm740_vm2, %v2646_v44  ;;  %2573 = vmatmul.msk.bf16.gmra.mxu2 %vm740_vm2, %v2671_v46 }
 0x17a   :  { %v2013_v59 = vpack.c.bf16 %v1964_v54, %v1964_v54  ;;  %v1735_v60 = vmax.f32 %v1733_v55, %v1734_v56  ;;  %2524 = vmatmul.msk.bf16.gmra.mxu0 %vm740_vm2, %v2622_v50  ;;  %2598 = vmatmul.msk.bf16.gmra.mxu3 %vm740_vm2, %v2696_v51 }
 0x17c   :  { %2063 = vst.msk [vmem:[%s3612_s3 + $0x68] sm:$0xf] %vm2036_vm4, %v2013_v59  ;;  %v1737_v61 = vmax.f32 %v1735_v60, %v1736_v58  ;;  %v1366_v62 = vpop.f32.mrf.mxu2 }
 0x17d   :  { %v1491_v0 = vpop.f32.mrf.mxu3  ;;  %v1741_v7 = vsel %vm1541_vm3, %v1366_v62, -inf }
 0x17e   :  { %v1916_v1 = vadd.f32 %v2932_v8, %v1737_v61  ;;  %v1243_v2 = vpop.f32.mrf.mxu1  ;;  %v1750_v27 = vsel %vm1541_vm3, %v1491_v0, -inf }
 0x17f   :  { %v1739_v3 = vsel %vm1541_vm3, %v1243_v2, -inf  ;;  %v1123_v4 = vpop.f32.mrf.mxu0 }
 0x180   :  { %v1965_v5 = vmax.f32 %v1916_v1, 0.0  ;;  %v1740_v6 = vmax.f32 %v1738_v63, %v1739_v3  ;;  %v1745_v8 = vsel %vm1541_vm3, %v1123_v4, -inf }
 0x182   :  { %v2014_v9 = vpack.c.bf16 %v1965_v5, %v1965_v5  ;;  %v1742_v10 = vmax.f32 %v1740_v6, %v1741_v7 }
 0x184   :  { %2064 = vst.msk [vmem:[%s3612_s3 + $0x6c] sm:$0xf] %vm2036_vm4, %v2014_v9  ;;  %v1744_v12 = vmax.f32 %v1742_v10, %v1743_v11  ;;  %v1368_v13 = vpop.f32.mrf.mxu2 }
 0x185   :  { %v1493_v16 = vpop.f32.mrf.mxu3  ;;  %v1748_v26 = vsel %vm1541_vm3, %v1368_v13, -inf }
 0x186   :  { %v1917_v18 = vadd.f32 %v3397_v17, %v1744_v12  ;;  %v1246_v19 = vpop.f32.mrf.mxu1  ;;  %v1757_v43 = vsel %vm1541_vm3, %v1493_v16, -inf }
 0x187   :  { %v1746_v22 = vsel %vm1541_vm3, %v1246_v19, -inf  ;;  %v1126_v23 = vpop.f32.mrf.mxu0 }
 0x188   :  { %v1966_v24 = vmax.f32 %v1917_v18, 0.0  ;;  %v1747_v25 = vmax.f32 %v1745_v8, %v1746_v22  ;;  %v1752_v32 = vsel %vm1541_vm3, %v1126_v23, -inf }
 0x189   :  { %2549 = vmatmul.msk.bf16.gmra.mxu1 %vm740_vm2, %v2647_v14  ;;  %2574 = vmatmul.msk.bf16.gmra.mxu2 %vm740_vm2, %v2672_v15 }
 0x18a   :  { %v2015_v28 = vpack.c.bf16 %v1966_v24, %v1966_v24  ;;  %v1749_v29 = vmax.f32 %v1747_v25, %v1748_v26  ;;  %2525 = vmatmul.msk.bf16.gmra.mxu0 %vm740_vm2, %v2623_v20  ;;  %2599 = vmatmul.msk.bf16.gmra.mxu3 %vm740_vm2, %v2697_v21 }
 0x18c   :  { %2065 = vst.msk [vmem:[%s3612_s3 + $0x70] sm:$0xf] %vm2036_vm4, %v2015_v28  ;;  %v1751_v30 = vmax.f32 %v1749_v29, %v1750_v27  ;;  %v1371_v31 = vpop.f32.mrf.mxu2 }
 0x18d   :  { %v1496_v33 = vpop.f32.mrf.mxu3  ;;  %v1755_v40 = vsel %vm1541_vm3, %v1371_v31, -inf }
 0x18e   :  { %v1918_v34 = vadd.f32 %v3397_v17, %v1751_v30  ;;  %v1248_v35 = vpop.f32.mrf.mxu1  ;;  %v1764_v59 = vsel %vm1541_vm3, %v1496_v33, -inf }
 0x18f   :  { %v1753_v36 = vsel %vm1541_vm3, %v1248_v35, -inf  ;;  %v1128_v37 = vpop.f32.mrf.mxu0 }
 0x190   :  { %v1967_v38 = vmax.f32 %v1918_v34, 0.0  ;;  %v1754_v39 = vmax.f32 %v1752_v32, %v1753_v36  ;;  %v1759_v47 = vsel %vm1541_vm3, %v1128_v37, -inf }
 0x192   :  { %v2016_v41 = vpack.c.bf16 %v1967_v38, %v1967_v38  ;;  %v1756_v42 = vmax.f32 %v1754_v39, %v1755_v40 }
 0x194   :  { %2066 = vst.msk [vmem:[%s3612_s3 + $0x74] sm:$0xf] %vm2036_vm4, %v2016_v41  ;;  %v1758_v44 = vmax.f32 %v1756_v42, %v1757_v43  ;;  %v1373_v46 = vpop.f32.mrf.mxu2 }
 0x195   :  { %v1498_v50 = vpop.f32.mrf.mxu3  ;;  %v1762_v58 = vsel %vm1541_vm3, %v1373_v46, -inf }
 0x196   :  { %v1919_v51 = vadd.f32 %v3397_v17, %v1758_v44  ;;  %v1251_v52 = vpop.f32.mrf.mxu1  ;;  %v1771_v12 = vsel %vm1541_vm3, %v1498_v50, -inf }
 0x197   :  { %v1760_v53 = vsel %vm1541_vm3, %v1251_v52, -inf  ;;  %v1131_v54 = vpop.f32.mrf.mxu0 }
 0x198   :  { %v1968_v55 = vmax.f32 %v1919_v51, 0.0  ;;  %v1761_v56 = vmax.f32 %v1759_v47, %v1760_v53  ;;  %v1766_v0 = vsel %vm1541_vm3, %v1131_v54, -inf }
 0x199   :  { %2550 = vmatmul.msk.bf16.gmra.mxu1 %vm740_vm2, %v2648_v48  ;;  %2575 = vmatmul.msk.bf16.gmra.mxu2 %vm740_vm2, %v2673_v49 }
 0x19a   :  { %v2017_v60 = vpack.c.bf16 %v1968_v55, %v1968_v55  ;;  %v1763_v61 = vmax.f32 %v1761_v56, %v1762_v58 }
 0x19c   :  { %2067 = vst.msk [vmem:[%s3612_s3 + $0x78] sm:$0xf] %vm2036_vm4, %v2017_v60  ;;  %v1765_v62 = vmax.f32 %v1763_v61, %v1764_v59  ;;  %v1376_v63 = vpop.f32.mrf.mxu2 }
 0x19d   :  { %v1501_v1 = vpop.f32.mrf.mxu3  ;;  %v1769_v9 = vsel %vm1541_vm3, %v1376_v63, -inf }
 0x19e   :  { %v1920_v2 = vadd.f32 %v3397_v17, %v1765_v62  ;;  %v1253_v3 = vpop.f32.mrf.mxu1  ;;  %v1778_v24 = vsel %vm1541_vm3, %v1501_v1, -inf }
 0x19f   :  { %v1767_v4 = vsel %vm1541_vm3, %v1253_v3, -inf  ;;  %v1133_v5 = vpop.f32.mrf.mxu0 }
 0x1a0   :  { %v1969_v6 = vmax.f32 %v1920_v2, 0.0  ;;  %v1768_v7 = vmax.f32 %v1766_v0, %v1767_v4  ;;  %v1773_v14 = vsel %vm1541_vm3, %v1133_v5, -inf }
 0x1a2   :  { %v2018_v10 = vpack.c.bf16 %v1969_v6, %v1969_v6  ;;  %v1770_v11 = vmax.f32 %v1768_v7, %v1769_v9 }
 0x1a4   :  { %2068 = vst.msk [vmem:[%s3612_s3 + $0x7c] sm:$0xf] %vm2036_vm4, %v2018_v10  ;;  %v1772_v13 = vmax.f32 %v1770_v11, %v1771_v12  ;;  %v1378_v8 = vpop.f32.mrf.mxu2 }
 0x1a5   :  { %v1503_v15 = vpop.f32.mrf.mxu3  ;;  %v1776_v23 = vsel %vm1541_vm3, %v1378_v8, -inf }
 0x1a6   :  { %v1921_v16 = vadd.f32 %v3397_v17, %v1772_v13  ;;  %v1256_v18 = vpop.f32.mrf.mxu1  ;;  %v1785_v40 = vsel %vm1541_vm3, %v1503_v15, -inf }
 0x1a7   :  { %v1774_v19 = vsel %vm1541_vm3, %v1256_v18, -inf  ;;  %v1136_v20 = vpop.f32.mrf.mxu0 }
 0x1a8   :  { %v1970_v21 = vmax.f32 %v1921_v16, 0.0  ;;  %v1775_v22 = vmax.f32 %v1773_v14, %v1774_v19  ;;  %v1780_v29 = vsel %vm1541_vm3, %v1136_v20, -inf }
 0x1aa   :  { %v2019_v25 = vpack.c.bf16 %v1970_v21, %v1970_v21  ;;  %v1777_v26 = vmax.f32 %v1775_v22, %v1776_v23 }
 0x1ac   :  { %2069 = vst.msk [vmem:[%s3612_s3 + $0x80] sm:$0xf] %vm2036_vm4, %v2019_v25  ;;  %v1779_v27 = vmax.f32 %v1777_v26, %v1778_v24  ;;  %v1381_v28 = vpop.f32.mrf.mxu2 }
 0x1ad   :  { %v1506_v30 = vpop.f32.mrf.mxu3  ;;  %v1783_v37 = vsel %vm1541_vm3, %v1381_v28, -inf }
 0x1ae   :  { %v1922_v31 = vadd.f32 %v3397_v17, %v1779_v27  ;;  %v1258_v32 = vpop.f32.mrf.mxu1  ;;  %v1792_v53 = vsel %vm1541_vm3, %v1506_v30, -inf }
 0x1af   :  { %v1781_v33 = vsel %vm1541_vm3, %v1258_v32, -inf  ;;  %v1138_v34 = vpop.f32.mrf.mxu0 }
 0x1b0   :  { %v1971_v35 = vmax.f32 %v1922_v31, 0.0  ;;  %v1782_v36 = vmax.f32 %v1780_v29, %v1781_v33  ;;  %v1787_v43 = vsel %vm1541_vm3, %v1138_v34, -inf }
 0x1b2   :  { %v2020_v38 = vpack.c.bf16 %v1971_v35, %v1971_v35  ;;  %v1784_v39 = vmax.f32 %v1782_v36, %v1783_v37 }
 0x1b4   :  { %2070 = vst.msk [vmem:[%s3612_s3 + $0x84] sm:$0xf] %vm2036_vm4, %v2020_v38  ;;  %v1786_v41 = vmax.f32 %v1784_v39, %v1785_v40  ;;  %v1383_v42 = vpop.f32.mrf.mxu2 }
 0x1b5   :  { %v1508_v44 = vpop.f32.mrf.mxu3  ;;  %v1790_v52 = vsel %vm1541_vm3, %v1383_v42, -inf }
 0x1b6   :  { %v1923_v46 = vadd.f32 %v3397_v17, %v1786_v41  ;;  %v1261_v47 = vpop.f32.mrf.mxu1  ;;  %v1799_v6 = vsel %vm1541_vm3, %v1508_v44, -inf }
 0x1b7   :  { %v1788_v48 = vsel %vm1541_vm3, %v1261_v47, -inf  ;;  %v1141_v49 = vpop.f32.mrf.mxu0 }
 0x1b8   :  { %v1972_v50 = vmax.f32 %v1923_v46, 0.0  ;;  %v1789_v51 = vmax.f32 %v1787_v43, %v1788_v48  ;;  %v1794_v59 = vsel %vm1541_vm3, %v1141_v49, -inf }
 0x1ba   :  { %v2021_v54 = vpack.c.bf16 %v1972_v50, %v1972_v50  ;;  %v1791_v55 = vmax.f32 %v1789_v51, %v1790_v52 }
 0x1bc   :  { %2071 = vst.msk [vmem:[%s3612_s3 + $0x88] sm:$0xf] %vm2036_vm4, %v2021_v54  ;;  %v1793_v56 = vmax.f32 %v1791_v55, %v1792_v53  ;;  %v1386_v58 = vpop.f32.mrf.mxu2 }
 0x1bd   :  { %v1511_v60 = vpop.f32.mrf.mxu3  ;;  %v1797_v3 = vsel %vm1541_vm3, %v1386_v58, -inf }
 0x1be   :  { %v1924_v61 = vadd.f32 %v3397_v17, %v1793_v56  ;;  %v1263_v62 = vpop.f32.mrf.mxu1  ;;  %v1806_v19 = vsel %vm1541_vm3, %v1511_v60, -inf }
 0x1bf   :  { %v1795_v63 = vsel %vm1541_vm3, %v1263_v62, -inf  ;;  %v1143_v0 = vpop.f32.mrf.mxu0 }
 0x1c0   :  { %v1973_v1 = vmax.f32 %v1924_v61, 0.0  ;;  %v1796_v2 = vmax.f32 %v1794_v59, %v1795_v63  ;;  %v1801_v10 = vsel %vm1541_vm3, %v1143_v0, -inf }
 0x1c2   :  { %v2022_v4 = vpack.c.bf16 %v1973_v1, %v1973_v1  ;;  %v1798_v5 = vmax.f32 %v1796_v2, %v1797_v3 }
 0x1c4   :  { %2072 = vst.msk [vmem:[%s3612_s3 + $0x8c] sm:$0xf] %vm2036_vm4, %v2022_v4  ;;  %v1800_v7 = vmax.f32 %v1798_v5, %v1799_v6  ;;  %v1388_v9 = vpop.f32.mrf.mxu2 }
 0x1c5   :  { %v1513_v11 = vpop.f32.mrf.mxu3  ;;  %v1804_v18 = vsel %vm1541_vm3, %v1388_v9, -inf }
 0x1c6   :  { %v1925_v12 = vadd.f32 %v3397_v17, %v1800_v7  ;;  %v1266_v13 = vpop.f32.mrf.mxu1  ;;  %v1813_v35 = vsel %vm1541_vm3, %v1513_v11, -inf }
 0x1c7   :  { %v1802_v8 = vsel %vm1541_vm3, %v1266_v13, -inf  ;;  %v1146_v14 = vpop.f32.mrf.mxu0 }
 0x1c8   :  { %v1974_v15 = vmax.f32 %v1925_v12, 0.0  ;;  %v1803_v16 = vmax.f32 %v1801_v10, %v1802_v8  ;;  %v1808_v24 = vsel %vm1541_vm3, %v1146_v14, -inf }
 0x1ca   :  { %v2023_v20 = vpack.c.bf16 %v1974_v15, %v1974_v15  ;;  %v1805_v21 = vmax.f32 %v1803_v16, %v1804_v18 }
 0x1cc   :  { %2073 = vst.msk [vmem:[%s3612_s3 + $0x90] sm:$0xf] %vm2036_vm4, %v2023_v20  ;;  %v1807_v22 = vmax.f32 %v1805_v21, %v1806_v19  ;;  %v1391_v23 = vpop.f32.mrf.mxu2 }
 0x1cd   :  { %v1516_v25 = vpop.f32.mrf.mxu3  ;;  %v1811_v32 = vsel %vm1541_vm3, %v1391_v23, -inf }
 0x1ce   :  { %v1926_v26 = vadd.f32 %v3397_v17, %v1807_v22  ;;  %v1268_v27 = vpop.f32.mrf.mxu1  ;;  %v1820_v48 = vsel %vm1541_vm3, %v1516_v25, -inf }
 0x1cf   :  { %v1809_v28 = vsel %vm1541_vm3, %v1268_v27, -inf  ;;  %v1148_v29 = vpop.f32.mrf.mxu0 }
 0x1d0   :  { %v1975_v30 = vmax.f32 %v1926_v26, 0.0  ;;  %v1810_v31 = vmax.f32 %v1808_v24, %v1809_v28  ;;  %v1815_v38 = vsel %vm1541_vm3, %v1148_v29, -inf }
 0x1d2   :  { %v2024_v33 = vpack.c.bf16 %v1975_v30, %v1975_v30  ;;  %v1812_v34 = vmax.f32 %v1810_v31, %v1811_v32 }
 0x1d4   :  { %2074 = vst.msk [vmem:[%s3612_s3 + $0x94] sm:$0xf] %vm2036_vm4, %v2024_v33  ;;  %v1814_v36 = vmax.f32 %v1812_v34, %v1813_v35  ;;  %v1393_v37 = vpop.f32.mrf.mxu2 }
 0x1d5   :  { %v1518_v39 = vpop.f32.mrf.mxu3  ;;  %v1818_v47 = vsel %vm1541_vm3, %v1393_v37, -inf }
 0x1d6   :  { %v1927_v40 = vadd.f32 %v3397_v17, %v1814_v36  ;;  %v1271_v41 = vpop.f32.mrf.mxu1  ;;  %v1827_v1 = vsel %vm1541_vm3, %v1518_v39, -inf }
 0x1d7   :  { %v1816_v42 = vsel %vm1541_vm3, %v1271_v41, -inf  ;;  %v1151_v43 = vpop.f32.mrf.mxu0 }
 0x1d8   :  { %v1976_v44 = vmax.f32 %v1927_v40, 0.0  ;;  %v1817_v46 = vmax.f32 %v1815_v38, %v1816_v42  ;;  %v1822_v53 = vsel %vm1541_vm3, %v1151_v43, -inf }
 0x1da   :  { %v2025_v49 = vpack.c.bf16 %v1976_v44, %v1976_v44  ;;  %v1819_v50 = vmax.f32 %v1817_v46, %v1818_v47 }
 0x1dc   :  { %2075 = vst.msk [vmem:[%s3612_s3 + $0x98] sm:$0xf] %vm2036_vm4, %v2025_v49  ;;  %v1821_v51 = vmax.f32 %v1819_v50, %v1820_v48  ;;  %v1396_v52 = vpop.f32.mrf.mxu2 }
 0x1dd   :  { %v1521_v54 = vpop.f32.mrf.mxu3  ;;  %v1825_v62 = vsel %vm1541_vm3, %v1396_v52, -inf }
 0x1de   :  { %v1928_v55 = vadd.f32 %v3397_v17, %v1821_v51  ;;  %v1273_v56 = vpop.f32.mrf.mxu1  ;;  %v1834_v8 = vsel %vm1541_vm3, %v1521_v54, -inf }
 0x1df   :  { %v1823_v58 = vsel %vm1541_vm3, %v1273_v56, -inf  ;;  %v1153_v59 = vpop.f32.mrf.mxu0 }
 0x1e0   :  { %v1977_v60 = vmax.f32 %v1928_v55, 0.0  ;;  %v1824_v61 = vmax.f32 %v1822_v53, %v1823_v58  ;;  %v1829_v4 = vsel %vm1541_vm3, %v1153_v59, -inf }
 0x1e2   :  { %v2026_v63 = vpack.c.bf16 %v1977_v60, %v1977_v60  ;;  %v1826_v0 = vmax.f32 %v1824_v61, %v1825_v62 }
 0x1e4   :  { %2076 = vst.msk [vmem:[%s3612_s3 + $0x9c] sm:$0xf] %vm2036_vm4, %v2026_v63  ;;  %v1828_v2 = vmax.f32 %v1826_v0, %v1827_v1  ;;  %v1398_v3 = vpop.f32.mrf.mxu2 }
 0x1e5   :  { %v1523_v5 = vpop.f32.mrf.mxu3  ;;  %v1832_v13 = vsel %vm1541_vm3, %v1398_v3, -inf }
 0x1e6   :  { %v1929_v6 = vadd.f32 %v3397_v17, %v1828_v2  ;;  %v1276_v7 = vpop.f32.mrf.mxu1  ;;  %v1841_v30 = vsel %vm1541_vm3, %v1523_v5, -inf }
 0x1e7   :  { %v1830_v9 = vsel %vm1541_vm3, %v1276_v7, -inf  ;;  %v1156_v10 = vpop.f32.mrf.mxu0 }
 0x1e8   :  { %v1978_v11 = vmax.f32 %v1929_v6, 0.0  ;;  %v1831_v12 = vmax.f32 %v1829_v4, %v1830_v9  ;;  %v1836_v19 = vsel %vm1541_vm3, %v1156_v10, -inf }
 0x1ea   :  { %v2027_v14 = vpack.c.bf16 %v1978_v11, %v1978_v11  ;;  %v1833_v15 = vmax.f32 %v1831_v12, %v1832_v13 }
 0x1ec   :  { %2077 = vst.msk [vmem:[%s3612_s3 + $0xa0] sm:$0xf] %vm2036_vm4, %v2027_v14  ;;  %v1835_v16 = vmax.f32 %v1833_v15, %v1834_v8  ;;  %v1401_v18 = vpop.f32.mrf.mxu2 }
 0x1ed   :  { %v1526_v22 = vpop.f32.mrf.mxu3  ;;  %v1839_v27 = vsel %vm1541_vm3, %v1401_v18, -inf }
 0x1ee   :  { %v1930_v20 = vadd.f32 %v3397_v17, %v1835_v16  ;;  %v1278_v21 = vpop.f32.mrf.mxu1  ;;  %v1848_v42 = vsel %vm1541_vm3, %v1526_v22, -inf }
 0x1ef   :  { %v1837_v23 = vsel %vm1541_vm3, %v1278_v21, -inf  ;;  %v1158_v24 = vpop.f32.mrf.mxu0 }
 0x1f0   :  { %v1979_v25 = vmax.f32 %v1930_v20, 0.0  ;;  %v1838_v26 = vmax.f32 %v1836_v19, %v1837_v23  ;;  %v1843_v33 = vsel %vm1541_vm3, %v1158_v24, -inf }
 0x1f2   :  { %v2028_v28 = vpack.c.bf16 %v1979_v25, %v1979_v25  ;;  %v1840_v29 = vmax.f32 %v1838_v26, %v1839_v27 }
 0x1f4   :  { %2078 = vst.msk [vmem:[%s3612_s3 + $0xa4] sm:$0xf] %vm2036_vm4, %v2028_v28  ;;  %v1842_v31 = vmax.f32 %v1840_v29, %v1841_v30  ;;  %v1403_v32 = vpop.f32.mrf.mxu2 }
 0x1f5   :  { %v1528_v40 = vpop.f32.mrf.mxu3  ;;  %v1846_v41 = vsel %vm1541_vm3, %v1403_v32, -inf }
 0x1f6   :  { %v1931_v34 = vadd.f32 %v3397_v17, %v1842_v31  ;;  %v1281_v35 = vpop.f32.mrf.mxu1  ;;  %v1855_v60 = vsel %vm1541_vm3, %v1528_v40, -inf }
 0x1f7   :  { %v1844_v36 = vsel %vm1541_vm3, %v1281_v35, -inf  ;;  %v1161_v37 = vpop.f32.mrf.mxu0 }
 0x1f8   :  { %v1980_v38 = vmax.f32 %v1931_v34, 0.0  ;;  %v1845_v39 = vmax.f32 %v1843_v33, %v1844_v36  ;;  %v1850_v48 = vsel %vm1541_vm3, %v1161_v37, -inf }
 0x1fa   :  { %v2029_v43 = vpack.c.bf16 %v1980_v38, %v1980_v38  ;;  %v1847_v44 = vmax.f32 %v1845_v39, %v1846_v41 }
 0x1fc   :  { %2079 = vst.msk [vmem:[%s3612_s3 + $0xa8] sm:$0xf] %vm2036_vm4, %v2029_v43  ;;  %v1849_v46 = vmax.f32 %v1847_v44, %v1848_v42  ;;  %v1406_v47 = vpop.f32.mrf.mxu2  ;;  %v1878_v42 = vsel %vm1541_vm3, %v2894_v45, -inf }
 0x1fd   :  { %v1853_v55 = vsel %vm1541_vm3, %v1406_v47, -inf  ;;  %v1531_v59 = vpop.f32.mrf.mxu3 }
 0x1fe   :  { %v1932_v49 = vadd.f32 %v3397_v17, %v1849_v46  ;;  %v1283_v50 = vpop.f32.mrf.mxu1  ;;  %v1862_v7 = vsel %vm1541_vm3, %v1531_v59, -inf }
 0x1ff   :  { %v1851_v51 = vsel %vm1541_vm3, %v1283_v50, -inf  ;;  %v1163_v52 = vpop.f32.mrf.mxu0 }
 0x200   :  { %v1981_v53 = vmax.f32 %v1932_v49, 0.0  ;;  %v1852_v54 = vmax.f32 %v1850_v48, %v1851_v51  ;;  %v1857_v63 = vsel %vm1541_vm3, %v1163_v52, -inf }
 0x202   :  { %v2030_v56 = vpack.c.bf16 %v1981_v53, %v1981_v53  ;;  %v1854_v58 = vmax.f32 %v1852_v54, %v1853_v55 }
 0x204   :  { %2080 = vst.msk [vmem:[%s3612_s3 + $0xac] sm:$0xf] %vm2036_vm4, %v2030_v56  ;;  %v1856_v61 = vmax.f32 %v1854_v58, %v1855_v60  ;;  %v1408_v62 = vpop.f32.mrf.mxu2 }
 0x205   :  { %v1860_v6 = vsel %vm1541_vm3, %v1408_v62, -inf  ;;  %v1533_v13 = vpop.f32.mrf.mxu3 }
 0x206   :  { %v1933_v0 = vadd.f32 %v3397_v17, %v1856_v61  ;;  %v1286_v1 = vpop.f32.mrf.mxu1  ;;  %v1869_v24 = vsel %vm1541_vm3, %v1533_v13, -inf }
 0x207   :  { %v1858_v2 = vsel %vm1541_vm3, %v1286_v1, -inf  ;;  %v1166_v5 = vpop.f32.mrf.mxu0 }
 0x208   :  { %v1982_v3 = vmax.f32 %v1933_v0, 0.0  ;;  %v1859_v4 = vmax.f32 %v1857_v63, %v1858_v2  ;;  %v1864_v8 = vsel %vm1541_vm3, %v1166_v5, -inf }
 0x20a   :  { %v2031_v9 = vpack.c.bf16 %v1982_v3, %v1982_v3  ;;  %v1861_v10 = vmax.f32 %v1859_v4, %v1860_v6 }
 0x20c   :  { %2081 = vst.msk [vmem:[%s3612_s3 + $0xb0] sm:$0xf] %vm2036_vm4, %v2031_v9  ;;  %v1863_v11 = vmax.f32 %v1861_v10, %v1862_v7  ;;  %v1411_v12 = vpop.f32.mrf.mxu2 }
 0x20d   :  { %v1867_v20 = vsel %vm1541_vm3, %v1411_v12, -inf  ;;  %v1536_v29 = vpop.f32.mrf.mxu3 }
 0x20e   :  { %v1934_v14 = vadd.f32 %v3397_v17, %v1863_v11  ;;  %v1288_v15 = vpop.f32.mrf.mxu1  ;;  %v1876_v35 = vsel %vm1541_vm3, %v1536_v29, -inf }
 0x20f   :  { %v1865_v16 = vsel %vm1541_vm3, %v1288_v15, -inf  ;;  %v1168_v23 = vpop.f32.mrf.mxu0 }
 0x210   :  { %v1983_v18 = vmax.f32 %v1934_v14, 0.0  ;;  %v1866_v19 = vmax.f32 %v1864_v8, %v1865_v16  ;;  %v1871_v27 = vsel %vm1541_vm3, %v1168_v23, -inf }
 0x212   :  { %v2032_v21 = vpack.c.bf16 %v1983_v18, %v1983_v18  ;;  %v1868_v22 = vmax.f32 %v1866_v19, %v1867_v20 }
 0x214   :  { %2082 = vst.msk [vmem:[%s3612_s3 + $0xb4] sm:$0xf] %vm2036_vm4, %v2032_v21  ;;  %v1870_v25 = vmax.f32 %v1868_v22, %v1869_v24  ;;  %v1413_v26 = vpop.f32.mrf.mxu2 }
 0x215   :  { %v1874_v34 = vsel %vm1541_vm3, %v1413_v26, -inf  ;;  %v1538_v46 = vpop.f32.mrf.mxu3 }
 0x216   :  { %v1935_v28 = vadd.f32 %v3397_v17, %v1870_v25  ;;  %v1291_v30 = vpop.f32.mrf.mxu1  ;;  %v1883_v51 = vsel %vm1541_vm3, %v1538_v46, -inf }
 0x217   :  { %v1872_v31 = vsel %vm1541_vm3, %v1291_v30, -inf }
 0x218   :  { %v1984_v32 = vmax.f32 %v1935_v28, 0.0  ;;  %v1873_v33 = vmax.f32 %v1871_v27, %v1872_v31 }
 0x21a   :  { %v2033_v36 = vpack.c.bf16 %v1984_v32, %v1984_v32  ;;  %v1875_v37 = vmax.f32 %v1873_v33, %v1874_v34 }
 0x21c   :  { %2083 = vst.msk [vmem:[%s3612_s3 + $0xb8] sm:$0xf] %vm2036_vm4, %v2033_v36  ;;  %v1877_v38 = vmax.f32 %v1875_v37, %v1876_v35  ;;  %v1416_v39 = vpop.f32.mrf.mxu2 }
 0x21d   :  { %v1881_v48 = vsel %vm1541_vm3, %v1416_v39, -inf }
 0x21e   :  { %v1936_v40 = vadd.f32 %v3397_v17, %v1877_v38  ;;  %v1293_v41 = vpop.f32.mrf.mxu1 }
 0x21f   :  { %v1879_v43 = vsel %vm1541_vm3, %v1293_v41, -inf }
 0x220   :  { %v1985_v44 = vmax.f32 %v1936_v40, 0.0  ;;  %v1880_v47 = vmax.f32 %v1878_v42, %v1879_v43 }
 0x222   :  { %v2034_v49 = vpack.c.bf16 %v1985_v44, %v1985_v44  ;;  %v1882_v50 = vmax.f32 %v1880_v47, %v1881_v48 }
 0x224   :  { %2084 = vst.msk [vmem:[%s3612_s3 + $0xbc] sm:$0xf] %vm2036_vm4, %v2034_v49  ;;  %v1884_v52 = vmax.f32 %v1882_v50, %v1883_v51  ;;  %v1418_v53 = vpop.f32.mrf.mxu2 }
 0x225   :  { %v1547_v45 = vsel %vm1541_vm3, %v1418_v53, -inf }
 0x226   :  { %v1937_v54 = vadd.f32 %v3397_v17, %v1884_v52  ;;  %v1548_v55 = vmax.f32 %v2909_v57, %v1547_v45 }
 0x228   :  { %v1986_v56 = vmax.f32 %v1937_v54, 0.0  ;;  %v1889_v58 = vadd.f32 %v3397_v17, %v1548_v55 }
 0x22a   :  { %v2035_v59 = vpack.c.bf16 %v1986_v56, %v1986_v56  ;;  %v1938_v60 = vmax.f32 %v1889_v58, 0.0 }
 0x22c   :  { %2085 = vst.msk [vmem:[%s3612_s3 + $0xc0] sm:$0xf] %vm2036_vm4, %v2035_v59  ;;  %v1987_v61 = vpack.c.bf16 %v1938_v60, %v1938_v60 }
 0x22e   :  { %2037 = vst.msk [vmem:[%s3612_s3] sm:$0xf] %vm2036_vm4, %v1987_v61 }

// kernel: cnn_forward.4
= control target key start
LH: loop header
LB: loop body
LE: loop exit
PB: predicated region body
PF: predicated region fallthrough
CT: control target
= control target key end

     0   :  { %vm631_vm0 = vcmask 1041408   ;;  %vm588_vm1 = vcmask 949248   ;;  %vm951_vm2 = vcmask 408576   ;;  %vm1026_vm3 = vcmask 404480   ;;  %s2148_s1 = inlined_call_operand.vmem [shape: bf16[500,50], index: 1, kind: input, shape index: {}]   ;;  %s2149_s0 = inlined_call_operand.vmem [shape: bf16[4,56,500], index: 0, kind: input, shape index: {}]   ;;  %s2150_s2 = inlined_call_operand.vmem [shape: f32[1,50], index: 2, kind: input, shape index: {}]   ;;  %s2151_s3 = inlined_call_operand.vmem [shape: bf16[56,50], index: 3, kind: output, shape index: {}]  }
   0x1   :  { %v1463_v0 = vld [vmem:[%s2148_s1 + $0x38] sm:$0xff]  ;;  %v1462_v5 = vld [vmem:[%s2148_s1 + $0x30] sm:$0xff]  ;;  %v1461_v10 = vld [vmem:[%s2148_s1 + $0x28] sm:$0xff] }
   0x2   :  { %v1471_v1 = vld [vmem:[%s2148_s1 + $0x78] sm:$0xff]  ;;  %635 = vmatpush.bf16.msra.mxu0 %v1463_v0  ;;  %v1470_v6 = vld [vmem:[%s2148_s1 + $0x70] sm:$0xff]  ;;  %v1469_v11 = vld [vmem:[%s2148_s1 + $0x68] sm:$0xff] }
   0x3   :  { %v1479_v2 = vld [vmem:[%s2148_s1 + $0xb8] sm:$0xff]  ;;  %714 = vmatpush.bf16.msra.mxu1 %v1471_v1  ;;  %v1478_v7 = vld [vmem:[%s2148_s1 + $0xb0] sm:$0xff]  ;;  %v1477_v13 = vld [vmem:[%s2148_s1 + $0xa8] sm:$0xff] }
   0x4   :  { %v132_v3 = vld [vmem:[%s2148_s1 + $0xf8] sm:$0x3]  ;;  %793 = vmatpush.bf16.msra.mxu2 %v1479_v2  ;;  %v1486_v12 = vld [vmem:[%s2148_s1 + $0xf0] sm:$0xff]  ;;  %v1460_v14 = vld [vmem:[%s2148_s1 + $0x20] sm:$0xff] }
   0x5   :  { %v524_v4 = vunpack.c.l.b16 %v132_v3  ;;  %v1468_v15 = vld [vmem:[%s2148_s1 + $0x60] sm:$0xff]  ;;  %v1485_v16 = vld [vmem:[%s2148_s1 + $0xe8] sm:$0xff]  ;;  %v1459_v18 = vld [vmem:[%s2148_s1 + $0x18] sm:$0xff] }
   0x6   :  { %636 = vmatpush.bf16.msra.mxu0 %v1462_v5  ;;  %v1476_v17 = vld [vmem:[%s2148_s1 + $0xa0] sm:$0xff]  ;;  %v1467_v19 = vld [vmem:[%s2148_s1 + $0x58] sm:$0xff]  ;;  %v1458_v22 = vld [vmem:[%s2148_s1 + $0x10] sm:$0xff] }
   0x7   :  { %v556_v8 = vpack.c.b16 %v524_v4, %v524_v4  ;;  %715 = vmatpush.bf16.msra.mxu1 %v1470_v6  ;;  %v1484_v20 = vld [vmem:[%s2148_s1 + $0xe0] sm:$0xff]  ;;  %v1475_v21 = vld [vmem:[%s2148_s1 + $0x98] sm:$0xff]  ;;  %v1466_v23 = vld [vmem:[%s2148_s1 + $0x50] sm:$0xff] }
   0x8   :  { %794 = vmatpush.bf16.msra.mxu2 %v1478_v7  ;;  %v1483_v24 = vld [vmem:[%s2148_s1 + $0xd8] sm:$0xff]  ;;  %v1474_v25 = vld [vmem:[%s2148_s1 + $0x90] sm:$0xff]  ;;  %v1457_v26 = vld [vmem:[%s2148_s1 + $0x8] sm:$0xff] }
   0x9   :  { %v633_v9 = vsel %vm631_vm0, %v556_v8, 0  ;;  %v1465_v27 = vld [vmem:[%s2148_s1 + $0x48] sm:$0xff]  ;;  %v1482_v28 = vld [vmem:[%s2148_s1 + $0xd0] sm:$0xff]  ;;  %v1456_v31 = vld [vmem:[%s2148_s1] sm:$0xff] }
   0xa   :  { %872 = vmatpush.bf16.msra.mxu3 %v633_v9  ;;  %637 = vmatpush.bf16.msra.mxu0 %v1461_v10  ;;  %v1473_v29 = vld [vmem:[%s2148_s1 + $0x88] sm:$0xff]  ;;  %v1464_v32 = vld [vmem:[%s2148_s1 + $0x40] sm:$0xff]  ;;  %v1402_v34 = vld [vmem:[%s2149_s0 + $0xc] sm:$0xf0] }
   0xb   :  { %716 = vmatpush.bf16.msra.mxu1 %v1469_v11  ;;  %v1481_v30 = vld [vmem:[%s2148_s1 + $0xc8] sm:$0xff]  ;;  %v1040_v33 = vld [vmem:[%s2149_s0] sm:$0xf]  ;;  %v1400_v35 = vld [vmem:[%s2149_s0 + $0x4] sm:$0xf] }
   0xc   :  { %795 = vmatpush.bf16.msra.mxu2 %v1477_v13  ;;  %v1042_v36 = vld [vmem:[%s2149_s0 + $0x10] sm:$0xf0]  ;;  %v1472_v37 = vld [vmem:[%s2148_s1 + $0x80] sm:$0xff]  ;;  %v1048_v38 = vld [vmem:[%s2149_s0 + $0x8] sm:$0xf]  ;;  %v1041_v40 = vor.u32 %v1402_v34, %v1040_v33 }
   0xd   :  { %v1403_v39 = vld [vmem:[%s2149_s0 + $0x14] sm:$0xf0]  ;;  %v1045_v41 = vor.u32 %v1400_v35, %v1042_v36  ;;  %v1480_v43 = vld [vmem:[%s2148_s1 + $0xc0] sm:$0xff]  ;;  %v1401_v44 = vld [vmem:[%s2149_s0 + $0xc] sm:$0xf] }
   0xe   :  { %873 = vmatpush.bf16.msra.mxu3 %v1486_v12  ;;  %638 = vmatpush.bf16.msra.mxu0 %v1460_v14  ;;  %v1049_v42 = vor.u32 %v1403_v39, %v1048_v38  ;;  %v1050_v45 = vld [vmem:[%s2149_s0 + $0x18] sm:$0xf0]  ;;  %v1056_v47 = vld [vmem:[%s2149_s0 + $0x20] sm:$0xf]  ;;  %v1406_v48 = vld [vmem:[%s2149_s0 + $0x2c] sm:$0xf0] }
   0xf   :  { %717 = vmatpush.bf16.msra.mxu1 %v1468_v15  ;;  %v1053_v46 = vor.u32 %v1401_v44, %v1050_v45  ;;  %v1404_v49 = vld [vmem:[%s2149_s0 + $0x24] sm:$0xf]  ;;  %v1058_v50 = vld [vmem:[%s2149_s0 + $0x30] sm:$0xf0]  ;;  %v1064_v51 = vld [vmem:[%s2149_s0 + $0x28] sm:$0xf]  ;;  %v1057_v53 = vor.u32 %v1406_v48, %v1056_v47 }
  0x10   :  { %796 = vmatpush.bf16.msra.mxu2 %v1476_v17  ;;  %v1407_v52 = vld [vmem:[%s2149_s0 + $0x34] sm:$0xf0]  ;;  %v1061_v54 = vor.u32 %v1404_v49, %v1058_v50  ;;  %v1405_v56 = vld [vmem:[%s2149_s0 + $0x2c] sm:$0xf]  ;;  %v1066_v57 = vld [vmem:[%s2149_s0 + $0x38] sm:$0xf0] }
  0x11   :  { %v1065_v55 = vor.u32 %v1407_v52, %v1064_v51  ;;  %v1069_v58 = vor.u32 %v1405_v56, %v1066_v57  ;;  %v1072_v59 = vld [vmem:[%s2149_s0 + $0x40] sm:$0xf]  ;;  %v1410_v60 = vld [vmem:[%s2149_s0 + $0x4c] sm:$0xf0]  ;;  %v1408_v61 = vld [vmem:[%s2149_s0 + $0x44] sm:$0xf] }
  0x12   :  { %874 = vmatpush.bf16.msra.mxu3 %v1485_v16  ;;  %639 = vmatpush.bf16.msra.mxu0 %v1459_v18  ;;  %v1074_v62 = vld [vmem:[%s2149_s0 + $0x50] sm:$0xf0]  ;;  %v1080_v63 = vld [vmem:[%s2149_s0 + $0x48] sm:$0xf]  ;;  %v1411_v0 = vld [vmem:[%s2149_s0 + $0x54] sm:$0xf0]  ;;  %v1073_v1 = vor.u32 %v1410_v60, %v1072_v59 }
  0x13   :  { %718 = vmatpush.bf16.msra.mxu1 %v1467_v19  ;;  %v1077_v2 = vor.u32 %v1408_v61, %v1074_v62  ;;  %v1081_v3 = vor.u32 %v1411_v0, %v1080_v63  ;;  %v1409_v4 = vld [vmem:[%s2149_s0 + $0x4c] sm:$0xf]  ;;  %v1082_v5 = vld [vmem:[%s2149_s0 + $0x58] sm:$0xf0]  ;;  %v1088_v7 = vld [vmem:[%s2149_s0 + $0x60] sm:$0xf] }
  0x14   :  { %797 = vmatpush.bf16.msra.mxu2 %v1475_v21  ;;  %v1085_v6 = vor.u32 %v1409_v4, %v1082_v5  ;;  %v1414_v8 = vld [vmem:[%s2149_s0 + $0x6c] sm:$0xf0]  ;;  %v1412_v9 = vld [vmem:[%s2149_s0 + $0x64] sm:$0xf]  ;;  %v1090_v10 = vld [vmem:[%s2149_s0 + $0x70] sm:$0xf0] }
  0x15   :  { %v1096_v11 = vld [vmem:[%s2149_s0 + $0x68] sm:$0xf]  ;;  %v1415_v12 = vld [vmem:[%s2149_s0 + $0x74] sm:$0xf0]  ;;  %v1089_v13 = vor.u32 %v1414_v8, %v1088_v7  ;;  %v1093_v14 = vor.u32 %v1412_v9, %v1090_v10  ;;  %v1413_v16 = vld [vmem:[%s2149_s0 + $0x6c] sm:$0xf] }
  0x16   :  { %875 = vmatpush.bf16.msra.mxu3 %v1484_v20  ;;  %640 = vmatpush.bf16.msra.mxu0 %v1458_v22  ;;  %v1097_v15 = vor.u32 %v1415_v12, %v1096_v11  ;;  %v1098_v17 = vld [vmem:[%s2149_s0 + $0x78] sm:$0xf0]  ;;  %v1104_v19 = vld [vmem:[%s2149_s0 + $0x80] sm:$0xf]  ;;  %v1418_v20 = vld [vmem:[%s2149_s0 + $0x8c] sm:$0xf0] }
  0x17   :  { %719 = vmatpush.bf16.msra.mxu1 %v1466_v23  ;;  %v1101_v18 = vor.u32 %v1413_v16, %v1098_v17  ;;  %v1416_v21 = vld [vmem:[%s2149_s0 + $0x84] sm:$0xf]  ;;  %v1106_v22 = vld [vmem:[%s2149_s0 + $0x90] sm:$0xf0]  ;;  %v1112_v23 = vld [vmem:[%s2149_s0 + $0x88] sm:$0xf] }
  0x18   :  { %798 = vmatpush.bf16.msra.mxu2 %v1474_v25  ;;  %v1105_v25 = vor.u32 %v1418_v20, %v1104_v19  ;;  %v1420_v33 = vld [vmem:[%s2149_s0 + $0xa4] sm:$0xf]  ;;  %v1122_v34 = vld [vmem:[%s2149_s0 + $0xb0] sm:$0xf0]  ;;  %v1128_v35 = vld [vmem:[%s2149_s0 + $0xa8] sm:$0xf] }
  0x19   :  { %v1423_v36 = vld [vmem:[%s2149_s0 + $0xb4] sm:$0xf0]  ;;  %v1125_v38 = vor.u32 %v1420_v33, %v1122_v34  ;;  %v1426_v44 = vld [vmem:[%s2149_s0 + $0xcc] sm:$0xf0]  ;;  %v1424_v45 = vld [vmem:[%s2149_s0 + $0xc4] sm:$0xf] }
  0x1a   :  { %876 = vmatpush.bf16.msra.mxu3 %v1483_v24  ;;  %641 = vmatpush.bf16.msra.mxu0 %v1457_v26  ;;  %v1419_v24 = vld [vmem:[%s2149_s0 + $0x94] sm:$0xf0]  ;;  %v1109_v26 = vor.u32 %v1416_v21, %v1106_v22  ;;  %v1129_v39 = vor.u32 %v1423_v36, %v1128_v35  ;;  %v1144_v47 = vld [vmem:[%s2149_s0 + $0xc8] sm:$0xf]  ;;  %v1425_v52 = vld [vmem:[%s2149_s0 + $0xcc] sm:$0xf] }
  0x1b   :  { %720 = vmatpush.bf16.msra.mxu1 %v1465_v27  ;;  %v1113_v27 = vor.u32 %v1419_v24, %v1112_v23  ;;  %v1427_v48 = vld [vmem:[%s2149_s0 + $0xd4] sm:$0xf0]  ;;  %v1430_v56 = vld [vmem:[%s2149_s0 + $0xec] sm:$0xf0]  ;;  %v1428_v57 = vld [vmem:[%s2149_s0 + $0xe4] sm:$0xf] }
  0x1c   :  { %799 = vmatpush.bf16.msra.mxu2 %v1473_v29  ;;  %v1114_v29 = vld [vmem:[%s2149_s0 + $0x98] sm:$0xf0]  ;;  %v1145_v51 = vor.u32 %v1427_v48, %v1144_v47  ;;  %v1160_v59 = vld [vmem:[%s2149_s0 + $0xe8] sm:$0xf]  ;;  %v1431_v60 = vld [vmem:[%s2149_s0 + $0xf4] sm:$0xf0] }
  0x1d   :  { %v1161_v63 = vor.u32 %v1431_v60, %v1160_v59  ;;  %v1429_v0 = vld [vmem:[%s2149_s0 + $0xec] sm:$0xf]  ;;  %v1434_v4 = vld [vmem:[%s2149_s0 + $0x10c] sm:$0xf0]  ;;  %v1432_v5 = vld [vmem:[%s2149_s0 + $0x104] sm:$0xf] }
  0x1e   :  { %877 = vmatpush.bf16.msra.mxu3 %v1482_v28  ;;  %642 = vmatpush.bf16.msra.mxu0 %v1456_v31  ;;  %v1417_v28 = vld [vmem:[%s2149_s0 + $0x8c] sm:$0xf]  ;;  %v1120_v31 = vld [vmem:[%s2149_s0 + $0xa0] sm:$0xf]  ;;  %v1176_v7 = vld [vmem:[%s2149_s0 + $0x108] sm:$0xf] }
  0x1f   :  { %721 = vmatpush.bf16.msra.mxu1 %v1464_v32  ;;  %v1422_v32 = vld [vmem:[%s2149_s0 + $0xac] sm:$0xf0]  ;;  %v1435_v8 = vld [vmem:[%s2149_s0 + $0x114] sm:$0xf0]  ;;  %v1178_v16 = vld [vmem:[%s2149_s0 + $0x118] sm:$0xf0] }
  0x20   :  { %800 = vmatpush.bf16.msra.mxu2 %v1472_v37  ;;  %v1121_v37 = vor.u32 %v1422_v32, %v1120_v31  ;;  %v1184_v24 = vld [vmem:[%s2149_s0 + $0x120] sm:$0xf] }
  0x21   :  { %643 = vmatmul.bf16.vlgmr.msra.gmra.mxu0 %v1041_v40  ;;  %v1421_v40 = vld [vmem:[%s2149_s0 + $0xac] sm:$0xf] }
  0x22   :  { %878 = vmatpush.bf16.msra.mxu3 %v1481_v30  ;;  %722 = vmatmul.bf16.vlgmr.msra.gmra.mxu1 %v1045_v41  ;;  %v1117_v30 = vor.u32 %v1417_v28, %v1114_v29  ;;  %v1130_v41 = vld [vmem:[%s2149_s0 + $0xb8] sm:$0xf0]  ;;  %v1186_v28 = vld [vmem:[%s2149_s0 + $0x130] sm:$0xf0]  ;;  %v1192_v29 = vld [vmem:[%s2149_s0 + $0x128] sm:$0xf] }
  0x23   :  { %801 = vmatmul.bf16.vlgmr.msra.gmra.mxu2 %v1049_v42  ;;  %v1133_v42 = vor.u32 %v1421_v40, %v1130_v41  ;;  %v1194_v40 = vld [vmem:[%s2149_s0 + $0x138] sm:$0xf0] }
  0x26   :  { %879 = vmatpush.bf16.msra.mxu3 %v1480_v43  ;;  %v1136_v43 = vld [vmem:[%s2149_s0 + $0xc0] sm:$0xf] }
  0x27   :  { %v1137_v49 = vor.u32 %v1426_v44, %v1136_v43 }
  0x29   :  { %1386 = vmatmul.msk.bf16.vlgmr.msra.gmra.mxu3 %vm588_vm1, %v1053_v46  ;;  %v1138_v46 = vld [vmem:[%s2149_s0 + $0xd0] sm:$0xf0] }
  0x2a   :  { %v1141_v50 = vor.u32 %v1424_v45, %v1138_v46 }
  0x31   :  { %648 = vmatmul.bf16.gmra.mxu0 %v1057_v53  ;;  %v1146_v53 = vld [vmem:[%s2149_s0 + $0xd8] sm:$0xf0] }
  0x32   :  { %727 = vmatmul.bf16.gmra.mxu1 %v1061_v54  ;;  %v1149_v54 = vor.u32 %v1425_v52, %v1146_v53  ;;  %v1442_v52 = vld [vmem:[%s2149_s0 + $0x14c] sm:$0xf0]  ;;  %v1440_v53 = vld [vmem:[%s2149_s0 + $0x144] sm:$0xf] }
  0x33   :  { %806 = vmatmul.bf16.gmra.mxu2 %v1065_v55  ;;  %v1152_v55 = vld [vmem:[%s2149_s0 + $0xe0] sm:$0xf] }
  0x34   :  { %v1153_v61 = vor.u32 %v1430_v56, %v1152_v55  ;;  %v1208_v55 = vld [vmem:[%s2149_s0 + $0x148] sm:$0xf]  ;;  %v1443_v56 = vld [vmem:[%s2149_s0 + $0x154] sm:$0xf0] }
  0x39   :  { %1387 = vmatmul.msk.bf16.gmra.mxu3 %vm588_vm1, %v1069_v58  ;;  %v1154_v58 = vld [vmem:[%s2149_s0 + $0xf0] sm:$0xf0] }
  0x3a   :  { %v1157_v62 = vor.u32 %v1428_v57, %v1154_v58 }
  0x41   :  { %653 = vmatmul.bf16.gmra.mxu0 %v1073_v1  ;;  %v1162_v1 = vld [vmem:[%s2149_s0 + $0xf8] sm:$0xf0] }
  0x42   :  { %732 = vmatmul.bf16.gmra.mxu1 %v1077_v2  ;;  %v1165_v2 = vor.u32 %v1429_v0, %v1162_v1  ;;  %v1441_v1 = vld [vmem:[%s2149_s0 + $0x14c] sm:$0xf] }
  0x43   :  { %811 = vmatmul.bf16.gmra.mxu2 %v1081_v3  ;;  %v1168_v3 = vld [vmem:[%s2149_s0 + $0x100] sm:$0xf] }
  0x44   :  { %v1169_v9 = vor.u32 %v1434_v4, %v1168_v3 }
  0x49   :  { %1388 = vmatmul.msk.bf16.gmra.mxu3 %vm588_vm1, %v1085_v6  ;;  %v1170_v6 = vld [vmem:[%s2149_s0 + $0x110] sm:$0xf0] }
  0x4a   :  { %v1173_v10 = vor.u32 %v1432_v5, %v1170_v6 }
  0x51   :  { %658 = vmatmul.bf16.gmra.mxu0 %v1089_v13  ;;  %v1177_v13 = vor.u32 %v1435_v8, %v1176_v7 }
  0x52   :  { %737 = vmatmul.bf16.gmra.mxu1 %v1093_v14 }
  0x53   :  { %816 = vmatmul.bf16.gmra.mxu2 %v1097_v15  ;;  %v1433_v15 = vld [vmem:[%s2149_s0 + $0x10c] sm:$0xf] }
  0x54   :  { %v1181_v17 = vor.u32 %v1433_v15, %v1178_v16  ;;  %v1444_v15 = vld [vmem:[%s2149_s0 + $0x164] sm:$0xf]  ;;  %v1218_v16 = vld [vmem:[%s2149_s0 + $0x170] sm:$0xf0] }
  0x59   :  { %1389 = vmatmul.msk.bf16.gmra.mxu3 %vm588_vm1, %v1101_v18 }
  0x61   :  { %663 = vmatmul.bf16.gmra.mxu0 %v1105_v25 }
  0x62   :  { %742 = vmatmul.bf16.gmra.mxu1 %v1109_v26  ;;  %v1438_v26 = vld [vmem:[%s2149_s0 + $0x12c] sm:$0xf0] }
  0x63   :  { %821 = vmatmul.bf16.gmra.mxu2 %v1113_v27  ;;  %v1436_v27 = vld [vmem:[%s2149_s0 + $0x124] sm:$0xf]  ;;  %v1185_v32 = vor.u32 %v1438_v26, %v1184_v24 }
  0x64   :  { %v1189_v33 = vor.u32 %v1436_v27, %v1186_v28  ;;  %v1445_v28 = vld [vmem:[%s2149_s0 + $0x16c] sm:$0xf] }
  0x69   :  { %1390 = vmatmul.msk.bf16.gmra.mxu3 %vm588_vm1, %v1117_v30  ;;  %v1439_v30 = vld [vmem:[%s2149_s0 + $0x134] sm:$0xf0] }
  0x71   :  { %668 = vmatmul.bf16.gmra.mxu0 %v1121_v37  ;;  %v1193_v37 = vor.u32 %v1439_v30, %v1192_v29  ;;  %v1226_v29 = vld [vmem:[%s2149_s0 + $0x178] sm:$0xf0] }
  0x72   :  { %747 = vmatmul.bf16.gmra.mxu1 %v1125_v38 }
  0x73   :  { %826 = vmatmul.bf16.gmra.mxu2 %v1129_v39  ;;  %v1437_v39 = vld [vmem:[%s2149_s0 + $0x12c] sm:$0xf] }
  0x74   :  { %v1197_v43 = vor.u32 %v1437_v39, %v1194_v40  ;;  %v1232_v39 = vld [vmem:[%s2149_s0 + $0x180] sm:$0xf] }
  0x79   :  { %1391 = vmatmul.msk.bf16.gmra.mxu3 %vm588_vm1, %v1133_v42 }
  0x81   :  { %673 = vmatmul.bf16.gmra.mxu0 %v1137_v49 }
  0x82   :  { %752 = vmatmul.bf16.gmra.mxu1 %v1141_v50  ;;  %v1200_v50 = vld [vmem:[%s2149_s0 + $0x140] sm:$0xf] }
  0x83   :  { %831 = vmatmul.bf16.gmra.mxu2 %v1145_v51  ;;  %v1201_v58 = vor.u32 %v1442_v52, %v1200_v50 }
  0x89   :  { %1392 = vmatmul.msk.bf16.gmra.mxu3 %vm588_vm1, %v1149_v54  ;;  %v1202_v54 = vld [vmem:[%s2149_s0 + $0x150] sm:$0xf0] }
  0x8a   :  { %v1205_v59 = vor.u32 %v1440_v53, %v1202_v54 }
  0x91   :  { %678 = vmatmul.bf16.gmra.mxu0 %v1153_v61 }
  0x92   :  { %757 = vmatmul.bf16.gmra.mxu1 %v1157_v62 }
  0x93   :  { %836 = vmatmul.bf16.gmra.mxu2 %v1161_v63  ;;  %v1209_v63 = vor.u32 %v1443_v56, %v1208_v55  ;;  %v1449_v56 = vld [vmem:[%s2149_s0 + $0x18c] sm:$0xf] }
  0x99   :  { %1393 = vmatmul.msk.bf16.gmra.mxu3 %vm588_vm1, %v1165_v2  ;;  %v1210_v2 = vld [vmem:[%s2149_s0 + $0x158] sm:$0xf0] }
  0x9a   :  { %v1213_v5 = vor.u32 %v1441_v1, %v1210_v2 }
  0x9e   :  { %v644_v11 = vpop.f32.mrf.mxu0 }
  0x9f   :  { %v723_v12 = vpop.f32.mrf.mxu1 }
  0xa0   :  { %v724_v14 = vadd.f32 %v723_v12, %v644_v11  ;;  %v1216_v12 = vld [vmem:[%s2149_s0 + $0x160] sm:$0xf] }
  0xa1   :  { %683 = vmatmul.bf16.gmra.mxu0 %v1169_v9 }
  0xa2   :  { %762 = vmatmul.bf16.gmra.mxu1 %v1173_v10 }
  0xa3   :  { %841 = vmatmul.bf16.gmra.mxu2 %v1177_v13 }
  0xa6   :  { %v802_v18 = vpop.f32.mrf.mxu2  ;;  %v646_v20 = vpop.f32.mrf.mxu0 }
  0xa7   :  { %v803_v19 = vadd.f32 %v802_v18, %v724_v14  ;;  %v725_v21 = vpop.f32.mrf.mxu1  ;;  %v1446_v14 = vld [vmem:[%s2149_s0 + $0x16c] sm:$0xf0]  ;;  %v1447_v18 = vld [vmem:[%s2149_s0 + $0x174] sm:$0xf0] }
  0xa8   :  { %v726_v22 = vadd.f32 %v725_v21, %v646_v20  ;;  %v1217_v20 = vor.u32 %v1446_v14, %v1216_v12  ;;  %v1221_v21 = vor.u32 %v1444_v15, %v1218_v16  ;;  %v1455_v12 = vld [vmem:[%s2149_s0 + $0x1b4] sm:$0xf0] }
  0xa9   :  { %1394 = vmatmul.msk.bf16.gmra.mxu3 %vm588_vm1, %v1181_v17  ;;  %v1224_v17 = vld [vmem:[%s2149_s0 + $0x168] sm:$0xf] }
  0xaa   :  { %v1225_v26 = vor.u32 %v1447_v18, %v1224_v17 }
  0xac   :  { %v881_v23 = vpop.f32.mrf.mxu3 }
  0xad   :  { %v1832_v25 = vadd.f32 %v881_v23, %v803_v19 }
  0xae   :  { %v804_v31 = vpop.f32.mrf.mxu2  ;;  %v649_v35 = vpop.f32.mrf.mxu0 }
  0xaf   :  { %v805_v34 = vadd.f32 %v804_v31, %v726_v22  ;;  %v728_v36 = vpop.f32.mrf.mxu1 }
  0xb0   :  { %v729_v38 = vadd.f32 %v728_v36, %v649_v35 }
  0xb1   :  { %688 = vmatmul.bf16.gmra.mxu0 %v1185_v32  ;;  %v1229_v32 = vor.u32 %v1445_v28, %v1226_v29 }
  0xb2   :  { %767 = vmatmul.bf16.gmra.mxu1 %v1189_v33 }
  0xb3   :  { %846 = vmatmul.bf16.gmra.mxu2 %v1193_v37 }
  0xb4   :  { %v883_v41 = vpop.f32.mrf.mxu3 }
  0xb5   :  { %v1855_v42 = vadd.f32 %v883_v41, %v805_v34  ;;  %v1450_v41 = vld [vmem:[%s2149_s0 + $0x18c] sm:$0xf0] }
  0xb6   :  { %v807_v44 = vpop.f32.mrf.mxu2  ;;  %v651_v46 = vpop.f32.mrf.mxu0 }
  0xb7   :  { %v808_v45 = vadd.f32 %v807_v44, %v729_v38  ;;  %v730_v47 = vpop.f32.mrf.mxu1  ;;  %v1234_v44 = vld [vmem:[%s2149_s0 + $0x190] sm:$0xf0]  ;;  %v1972_v14 = vsel %vm951_vm2, %v1855_v42, -inf  ;;  %v1258_v42 = vld [vmem:[%s2149_s0 + $0x1b8] sm:$0xf0] }
  0xb8   :  { %v731_v48 = vadd.f32 %v730_v47, %v651_v46  ;;  %v1451_v46 = vld [vmem:[%s2149_s0 + $0x194] sm:$0xf0] }
  0xb9   :  { %1395 = vmatmul.msk.bf16.gmra.mxu3 %vm588_vm1, %v1197_v43  ;;  %v1448_v43 = vld [vmem:[%s2149_s0 + $0x184] sm:$0xf] }
  0xbc   :  { %v886_v49 = vpop.f32.mrf.mxu3 }
  0xbd   :  { %v1861_v51 = vadd.f32 %v886_v49, %v808_v45  ;;  %v1240_v45 = vld [vmem:[%s2149_s0 + $0x188] sm:$0xf]  ;;  %v1237_v49 = vor.u32 %v1448_v43, %v1234_v44 }
  0xbe   :  { %v809_v57 = vpop.f32.mrf.mxu2  ;;  %v654_v61 = vpop.f32.mrf.mxu0  ;;  %v1241_v54 = vor.u32 %v1451_v46, %v1240_v45 }
  0xbf   :  { %v810_v60 = vadd.f32 %v809_v57, %v731_v48  ;;  %v733_v62 = vpop.f32.mrf.mxu1  ;;  %v1233_v48 = vor.u32 %v1450_v41, %v1232_v39  ;;  %v1242_v57 = vld [vmem:[%s2149_s0 + $0x198] sm:$0xf0] }
  0xc0   :  { %v734_v0 = vadd.f32 %v733_v62, %v654_v61  ;;  %v1944_v61 = vsel %vm951_vm2, %v1832_v25, -inf }
  0xc1   :  { %693 = vmatmul.bf16.gmra.mxu0 %v1201_v58 }
  0xc2   :  { %772 = vmatmul.bf16.gmra.mxu1 %v1205_v59 }
  0xc3   :  { %851 = vmatmul.bf16.gmra.mxu2 %v1209_v63 }
  0xc4   :  { %v888_v3 = vpop.f32.mrf.mxu3 }
  0xc5   :  { %v1884_v4 = vadd.f32 %v888_v3, %v810_v60  ;;  %v1245_v60 = vor.u32 %v1449_v56, %v1242_v57 }
  0xc6   :  { %v812_v6 = vpop.f32.mrf.mxu2  ;;  %v656_v8 = vpop.f32.mrf.mxu0 }
  0xc7   :  { %v813_v7 = vadd.f32 %v812_v6, %v734_v0  ;;  %v735_v9 = vpop.f32.mrf.mxu1  ;;  %v1997_v43 = vsel %vm951_vm2, %v1884_v4, -inf }
  0xc8   :  { %v736_v10 = vadd.f32 %v735_v9, %v656_v8  ;;  %v1454_v8 = vld [vmem:[%s2149_s0 + $0x1ac] sm:$0xf0]  ;;  %v1452_v9 = vld [vmem:[%s2149_s0 + $0x1a4] sm:$0xf] }
  0xc9   :  { %1396 = vmatmul.msk.bf16.gmra.mxu3 %vm588_vm1, %v1213_v5 }
  0xcc   :  { %v891_v11 = vpop.f32.mrf.mxu3 }
  0xcd   :  { %v1890_v13 = vadd.f32 %v891_v11, %v813_v7  ;;  %v1248_v7 = vld [vmem:[%s2149_s0 + $0x1a0] sm:$0xf]  ;;  %v1256_v11 = vld [vmem:[%s2149_s0 + $0x1a8] sm:$0xf] }
  0xce   :  { %v814_v19 = vpop.f32.mrf.mxu2  ;;  %v659_v23 = vpop.f32.mrf.mxu0  ;;  %v1249_v18 = vor.u32 %v1454_v8, %v1248_v7 }
  0xcf   :  { %v815_v22 = vadd.f32 %v814_v19, %v736_v10  ;;  %v738_v24 = vpop.f32.mrf.mxu1  ;;  %v1250_v10 = vld [vmem:[%s2149_s0 + $0x1b0] sm:$0xf0] }
  0xd0   :  { %v739_v27 = vadd.f32 %v738_v24, %v659_v23  ;;  %v1253_v19 = vor.u32 %v1452_v9, %v1250_v10  ;;  %v1257_v23 = vor.u32 %v1455_v12, %v1256_v11 }
  0xd1   :  { %698 = vmatmul.bf16.gmra.mxu0 %v1217_v20 }
  0xd2   :  { %777 = vmatmul.bf16.gmra.mxu1 %v1221_v21 }
  0xd3   :  { %856 = vmatmul.bf16.gmra.mxu2 %v1225_v26  ;;  %v1453_v26 = vld [vmem:[%s2149_s0 + $0x1ac] sm:$0xf] }
  0xd4   :  { %v893_v30 = vpop.f32.mrf.mxu3  ;;  %v1261_v29 = vor.u32 %v1453_v26, %v1258_v42 }
  0xd5   :  { %v1913_v31 = vadd.f32 %v893_v30, %v815_v22  ;;  %v1987_v30 = vsel %vm951_vm2, %v1861_v51, -inf }
  0xd6   :  { %v817_v33 = vpop.f32.mrf.mxu2  ;;  %v661_v35 = vpop.f32.mrf.mxu0 }
  0xd7   :  { %v818_v34 = vadd.f32 %v817_v33, %v739_v27  ;;  %v740_v36 = vpop.f32.mrf.mxu1 }
  0xd8   :  { %v741_v37 = vadd.f32 %v740_v36, %v661_v35 }
  0xd9   :  { %1397 = vmatmul.msk.bf16.gmra.mxu3 %vm588_vm1, %v1229_v32 }
  0xdc   :  { %v896_v38 = vpop.f32.mrf.mxu3 }
  0xdd   :  { %v1919_v40 = vadd.f32 %v896_v38, %v818_v34 }
  0xde   :  { %v819_v47 = vpop.f32.mrf.mxu2  ;;  %v664_v52 = vpop.f32.mrf.mxu0 }
  0xdf   :  { %v820_v50 = vadd.f32 %v819_v47, %v741_v37  ;;  %v743_v53 = vpop.f32.mrf.mxu1  ;;  %v2024_v9 = vsel %vm951_vm2, %v1919_v40, -inf }
  0xe0   :  { %v744_v55 = vadd.f32 %v743_v53, %v664_v52  ;;  %v2006_v53 = vsel %vm951_vm2, %v1890_v13, -inf }
  0xe1   :  { %703 = vmatmul.bf16.gmra.mxu0 %v1233_v48 }
  0xe2   :  { %782 = vmatmul.bf16.gmra.mxu1 %v1237_v49 }
  0xe3   :  { %861 = vmatmul.bf16.gmra.mxu2 %v1241_v54 }
  0xe4   :  { %v898_v58 = vpop.f32.mrf.mxu3 }
  0xe5   :  { %v899_v59 = vadd.f32 %v898_v58, %v820_v50 }
  0xe6   :  { %v822_v0 = vpop.f32.mrf.mxu2  ;;  %v666_v2 = vpop.f32.mrf.mxu0 }
  0xe7   :  { %v1947_v62 = vsel %vm951_vm2, %v899_v59, -inf  ;;  %v823_v1 = vadd.f32 %v822_v0, %v744_v55  ;;  %v745_v3 = vpop.f32.mrf.mxu1 }
  0xe8   :  { %v954_v63 = vmax.f32 %v1944_v61, %v1947_v62  ;;  %v746_v5 = vadd.f32 %v745_v3, %v666_v2 }
  0xe9   :  { %1398 = vmatmul.msk.bf16.gmra.mxu3 %vm588_vm1, %v1245_v60 }
  0xec   :  { %v901_v6 = vpop.f32.mrf.mxu3 }
  0xed   :  { %v902_v25 = vadd.f32 %v901_v6, %v823_v1  ;;  %v2015_v1 = vsel %vm951_vm2, %v1913_v31, -inf }
  0xee   :  { %v824_v17 = vpop.f32.mrf.mxu2  ;;  %v669_v21 = vpop.f32.mrf.mxu0 }
  0xef   :  { %v1975_v15 = vsel %vm951_vm2, %v902_v25, -inf  ;;  %v825_v20 = vadd.f32 %v824_v17, %v746_v5  ;;  %v748_v22 = vpop.f32.mrf.mxu1 }
  0xf0   :  { %v961_v16 = vmax.f32 %v1972_v14, %v1975_v15  ;;  %v749_v24 = vadd.f32 %v748_v22, %v669_v21 }
  0xf1   :  { %708 = vmatmul.bf16.gmra.mxu0 %v1249_v18 }
  0xf2   :  { %787 = vmatmul.bf16.gmra.mxu1 %v1253_v19 }
  0xf3   :  { %866 = vmatmul.bf16.gmra.mxu2 %v1257_v23 }
  0xf4   :  { %v903_v27 = vpop.f32.mrf.mxu3 }
  0xf5   :  { %v904_v28 = vadd.f32 %v903_v27, %v825_v20 }
  0xf6   :  { %v827_v34 = vpop.f32.mrf.mxu2  ;;  %v671_v36 = vpop.f32.mrf.mxu0 }
  0xf7   :  { %v1990_v32 = vsel %vm951_vm2, %v904_v28, -inf  ;;  %v828_v35 = vadd.f32 %v827_v34, %v749_v24  ;;  %v750_v37 = vpop.f32.mrf.mxu1 }
  0xf8   :  { %v968_v33 = vmax.f32 %v1987_v30, %v1990_v32  ;;  %v751_v38 = vadd.f32 %v750_v37, %v671_v36 }
  0xf9   :  { %1399 = vmatmul.msk.bf16.gmra.mxu3 %vm588_vm1, %v1261_v29 }
  0xfc   :  { %v906_v39 = vpop.f32.mrf.mxu3 }
  0xfd   :  { %v907_v41 = vadd.f32 %v906_v39, %v828_v35 }
  0xfe   :  { %v829_v45 = vpop.f32.mrf.mxu2  ;;  %v674_v47 = vpop.f32.mrf.mxu0 }
  0xff   :  { %v2000_v51 = vsel %vm951_vm2, %v907_v41, -inf  ;;  %v830_v46 = vadd.f32 %v829_v45, %v751_v38  ;;  %v753_v48 = vpop.f32.mrf.mxu1 }
 0x100   :  { %v975_v44 = vmax.f32 %v1997_v43, %v2000_v51  ;;  %v754_v49 = vadd.f32 %v753_v48, %v674_v47 }
 0x104   :  { %v908_v50 = vpop.f32.mrf.mxu3 }
 0x105   :  { %v909_v52 = vadd.f32 %v908_v50, %v830_v46 }
 0x106   :  { %v832_v55 = vpop.f32.mrf.mxu2  ;;  %v676_v57 = vpop.f32.mrf.mxu0 }
 0x107   :  { %v2009_v4 = vsel %vm951_vm2, %v909_v52, -inf  ;;  %v833_v56 = vadd.f32 %v832_v55, %v754_v49  ;;  %v755_v58 = vpop.f32.mrf.mxu1 }
 0x108   :  { %v982_v54 = vmax.f32 %v2006_v53, %v2009_v4  ;;  %v756_v59 = vadd.f32 %v755_v58, %v676_v57 }
 0x10c   :  { %v911_v60 = vpop.f32.mrf.mxu3 }
 0x10d   :  { %v912_v0 = vadd.f32 %v911_v60, %v833_v56 }
 0x10e   :  { %v834_v3 = vpop.f32.mrf.mxu2  ;;  %v679_v6 = vpop.f32.mrf.mxu0 }
 0x10f   :  { %v2018_v13 = vsel %vm951_vm2, %v912_v0, -inf  ;;  %v835_v5 = vadd.f32 %v834_v3, %v756_v59  ;;  %v758_v7 = vpop.f32.mrf.mxu1 }
 0x110   :  { %v989_v2 = vmax.f32 %v2015_v1, %v2018_v13  ;;  %v759_v46 = vadd.f32 %v758_v7, %v679_v6 }
 0x114   :  { %v913_v25 = vpop.f32.mrf.mxu3 }
 0x115   :  { %v914_v8 = vadd.f32 %v913_v25, %v835_v5 }
 0x116   :  { %v837_v11 = vpop.f32.mrf.mxu2  ;;  %v681_v12 = vpop.f32.mrf.mxu0 }
 0x117   :  { %v2027_v10 = vsel %vm951_vm2, %v914_v8, -inf  ;;  %v760_v17 = vpop.f32.mrf.mxu1  ;;  %v838_v50 = vadd.f32 %v837_v11, %v759_v46  ;;  %v2066_v11 = vld [vmem:[%s2150_s2] ss:$0 sm:$0xff] }
 0x118   :  { %v996_v31 = vmax.f32 %v2024_v9, %v2027_v10  ;;  %v761_v60 = vadd.f32 %v760_v17, %v681_v12 }
 0x11c   :  { %v916_v18 = vpop.f32.mrf.mxu3 }
 0x11d   :  { %v917_v55 = vadd.f32 %v916_v18, %v838_v50 }
 0x11e   :  { %v839_v19 = vpop.f32.mrf.mxu2  ;;  %v684_v20 = vpop.f32.mrf.mxu0 }
 0x11f   :  { %v763_v21 = vpop.f32.mrf.mxu1  ;;  %v955_v0 = vsel %vm951_vm2, %v917_v55, -inf  ;;  %v840_v25 = vadd.f32 %v839_v19, %v761_v60 }
 0x120   :  { %v956_v7 = vmax.f32 %v954_v63, %v955_v0  ;;  %v764_v18 = vadd.f32 %v763_v21, %v684_v20 }
 0x124   :  { %v918_v22 = vpop.f32.mrf.mxu3 }
 0x125   :  { %v919_v46 = vadd.f32 %v918_v22, %v840_v25 }
 0x126   :  { %v842_v23 = vpop.f32.mrf.mxu2  ;;  %v686_v24 = vpop.f32.mrf.mxu0 }
 0x127   :  { %v765_v26 = vpop.f32.mrf.mxu1  ;;  %v843_v61 = vadd.f32 %v842_v23, %v764_v18 }
 0x128   :  { %v766_v25 = vadd.f32 %v765_v26, %v686_v24 }
 0x12c   :  { %v921_v42 = vpop.f32.mrf.mxu3 }
 0x12d   :  { %v922_v22 = vadd.f32 %v921_v42, %v843_v61 }
 0x12e   :  { %v2031_v40 = vpop.f32.mrf.mxu2  ;;  %v2033_v27 = vpop.f32.mrf.mxu0 }
 0x12f   :  { %v2035_v28 = vpop.f32.mrf.mxu1  ;;  %v969_v14 = vsel %vm951_vm2, %v922_v22, -inf }
 0x130   :  { %v970_v18 = vmax.f32 %v968_v33, %v969_v14 }
 0x134   :  { %v2037_v29 = vpop.f32.mrf.mxu3 }
 0x136   :  { %v2039_v34 = vpop.f32.mrf.mxu2  ;;  %v2041_v35 = vpop.f32.mrf.mxu0 }
 0x137   :  { %v2043_v36 = vpop.f32.mrf.mxu1 }
 0x13c   :  { %v2045_v37 = vpop.f32.mrf.mxu3 }
 0x13e   :  { %v2047_v38 = vpop.f32.mrf.mxu2  ;;  %v2049_v39 = vpop.f32.mrf.mxu0 }
 0x13f   :  { %v2051_v41 = vpop.f32.mrf.mxu1 }
 0x144   :  { %v2053_v45 = vpop.f32.mrf.mxu3 }
 0x146   :  { %v2055_v47 = vpop.f32.mrf.mxu2  ;;  %v696_v48 = vpop.f32.mrf.mxu0 }
 0x147   :  { %v775_v49 = vpop.f32.mrf.mxu1 }
 0x148   :  { %v776_v57 = vadd.f32 %v775_v49, %v696_v48 }
 0x14c   :  { %v2057_v52 = vpop.f32.mrf.mxu3 }
 0x14e   :  { %v854_v56 = vpop.f32.mrf.mxu2  ;;  %v699_v58 = vpop.f32.mrf.mxu0 }
 0x14f   :  { %v778_v59 = vpop.f32.mrf.mxu1  ;;  %v855_v3 = vadd.f32 %v854_v56, %v776_v57  ;;  %v962_v56 = vsel %vm951_vm2, %v919_v46, -inf }
 0x150   :  { %v779_v8 = vadd.f32 %v778_v59, %v699_v58  ;;  %v963_v20 = vmax.f32 %v961_v16, %v962_v56 }
 0x154   :  { %v933_v5 = vpop.f32.mrf.mxu3 }
 0x155   :  { %v934_v6 = vadd.f32 %v933_v5, %v855_v3 }
 0x156   :  { %v857_v48 = vpop.f32.mrf.mxu2  ;;  %v701_v50 = vpop.f32.mrf.mxu0 }
 0x157   :  { %v957_v12 = vsel %vm951_vm2, %v934_v6, -inf  ;;  %v858_v49 = vadd.f32 %v857_v48, %v779_v8  ;;  %v780_v19 = vpop.f32.mrf.mxu1  ;;  %v845_v8 = vadd.f32 %v2031_v40, %v766_v25 }
 0x158   :  { %v958_v17 = vmax.f32 %v956_v7, %v957_v12  ;;  %v781_v23 = vadd.f32 %v780_v19, %v701_v50  ;;  %v769_v12 = vadd.f32 %v2035_v28, %v2033_v27 }
 0x15a   :  { %v1005_v55 = vadd.f32 %v2066_v11, %v958_v17  ;;  %v924_v17 = vadd.f32 %v2037_v29, %v845_v8  ;;  %v848_v27 = vadd.f32 %v2039_v34, %v769_v12 }
 0x15c   :  { %v1012_v62 = vmax.f32 %v1005_v55, 0.0  ;;  %v936_v63 = vpop.f32.mrf.mxu3  ;;  %v976_v33 = vsel %vm951_vm2, %v924_v17, -inf  ;;  %v927_v56 = vadd.f32 %v2045_v37, %v848_v27 }
 0x15d   :  { %v937_v57 = vadd.f32 %v936_v63, %v858_v49  ;;  %v977_v19 = vmax.f32 %v975_v44, %v976_v33 }
 0x15e   :  { %v1019_v21 = vpack.c.bf16 %v1012_v62, %v1012_v62  ;;  %v859_v60 = vpop.f32.mrf.mxu2  ;;  %v704_v0 = vpop.f32.mrf.mxu0  ;;  %v983_v43 = vsel %vm951_vm2, %v927_v56, -inf }
 0x15f   :  { %v964_v58 = vsel %vm951_vm2, %v937_v57, -inf  ;;  %v783_v3 = vpop.f32.mrf.mxu1  ;;  %v860_v15 = vadd.f32 %v859_v60, %v781_v23  ;;  %v984_v23 = vmax.f32 %v982_v54, %v983_v43 }
 0x160   :  { %1027 = vst.msk [vmem:[%s2151_s3] sm:$0xf] %vm1026_vm3, %v1019_v21  ;;  %v965_v59 = vmax.f32 %v963_v20, %v964_v58  ;;  %v784_v6 = vadd.f32 %v783_v3, %v704_v0  ;;  %v771_v20 = vadd.f32 %v2043_v36, %v2041_v35  ;;  %v774_v3 = vadd.f32 %v2051_v41, %v2049_v39 }
 0x162   :  { %v1006_v5 = vadd.f32 %v2066_v11, %v965_v59  ;;  %v850_v58 = vadd.f32 %v2047_v38, %v771_v20  ;;  %v853_v4 = vadd.f32 %v2055_v47, %v774_v3 }
 0x164   :  { %v1013_v16 = vmax.f32 %v1006_v5, 0.0  ;;  %v938_v42 = vpop.f32.mrf.mxu3  ;;  %v929_v35 = vadd.f32 %v2053_v45, %v850_v58  ;;  %v932_v8 = vadd.f32 %v2057_v52, %v853_v4 }
 0x165   :  { %v939_v7 = vadd.f32 %v938_v42, %v860_v15 }
 0x166   :  { %v1020_v46 = vpack.c.bf16 %v1013_v16, %v1013_v16  ;;  %v862_v40 = vpop.f32.mrf.mxu2  ;;  %v706_v49 = vpop.f32.mrf.mxu0  ;;  %v990_v53 = vsel %vm951_vm2, %v929_v35, -inf  ;;  %v997_v1 = vsel %vm951_vm2, %v932_v8, -inf }
 0x167   :  { %v971_v24 = vsel %vm951_vm2, %v939_v7, -inf  ;;  %v863_v48 = vadd.f32 %v862_v40, %v784_v6  ;;  %v785_v32 = vpop.f32.mrf.mxu1  ;;  %v991_v45 = vmax.f32 %v989_v2, %v990_v53  ;;  %v998_v52 = vmax.f32 %v996_v31, %v997_v1 }
 0x168   :  { %1028 = vst.msk [vmem:[%s2151_s3 + $0x4] sm:$0xf] %vm1026_vm3, %v1020_v46  ;;  %v972_v26 = vmax.f32 %v970_v18, %v971_v24  ;;  %v786_v34 = vadd.f32 %v785_v32, %v706_v49 }
 0x16a   :  { %v1007_v30 = vadd.f32 %v2066_v11, %v972_v26 }
 0x16c   :  { %v1014_v28 = vmax.f32 %v1007_v30, 0.0  ;;  %v941_v29 = vpop.f32.mrf.mxu3 }
 0x16d   :  { %v942_v50 = vadd.f32 %v941_v29, %v863_v48 }
 0x16e   :  { %v1021_v55 = vpack.c.bf16 %v1014_v28, %v1014_v28  ;;  %v864_v63 = vpop.f32.mrf.mxu2  ;;  %v709_v44 = vpop.f32.mrf.mxu0 }
 0x16f   :  { %v978_v61 = vsel %vm951_vm2, %v942_v50, -inf  ;;  %v865_v51 = vadd.f32 %v864_v63, %v786_v34  ;;  %v788_v21 = vpop.f32.mrf.mxu1 }
 0x170   :  { %1029 = vst.msk [vmem:[%s2151_s3 + $0x8] sm:$0xf] %vm1026_vm3, %v1021_v55  ;;  %v979_v62 = vmax.f32 %v977_v19, %v978_v61  ;;  %v789_v59 = vadd.f32 %v788_v21, %v709_v44 }
 0x172   :  { %v1008_v57 = vadd.f32 %v2066_v11, %v979_v62 }
 0x174   :  { %v1015_v37 = vmax.f32 %v1008_v57, 0.0  ;;  %v943_v22 = vpop.f32.mrf.mxu3 }
 0x175   :  { %v944_v60 = vadd.f32 %v943_v22, %v865_v51 }
 0x176   :  { %v1022_v0 = vpack.c.bf16 %v1015_v37, %v1015_v37  ;;  %v867_v5 = vpop.f32.mrf.mxu2  ;;  %v711_v16 = vpop.f32.mrf.mxu0 }
 0x177   :  { %v985_v36 = vsel %vm951_vm2, %v944_v60, -inf  ;;  %v868_v25 = vadd.f32 %v867_v5, %v789_v59  ;;  %v790_v42 = vpop.f32.mrf.mxu1 }
 0x178   :  { %1030 = vst.msk [vmem:[%s2151_s3 + $0xc] sm:$0xf] %vm1026_vm3, %v1022_v0  ;;  %v986_v38 = vmax.f32 %v984_v23, %v985_v36  ;;  %v791_v18 = vadd.f32 %v790_v42, %v711_v16 }
 0x17a   :  { %v1009_v14 = vadd.f32 %v2066_v11, %v986_v38 }
 0x17c   :  { %v1016_v54 = vmax.f32 %v1009_v14, 0.0  ;;  %v946_v39 = vpop.f32.mrf.mxu3 }
 0x17d   :  { %v947_v41 = vadd.f32 %v946_v39, %v868_v25 }
 0x17e   :  { %v1023_v15 = vpack.c.bf16 %v1016_v54, %v1016_v54  ;;  %v869_v7 = vpop.f32.mrf.mxu2 }
 0x17f   :  { %v992_v6 = vsel %vm951_vm2, %v947_v41, -inf  ;;  %v870_v13 = vadd.f32 %v869_v7, %v791_v18 }
 0x180   :  { %1031 = vst.msk [vmem:[%s2151_s3 + $0x10] sm:$0xf] %vm1026_vm3, %v1023_v15  ;;  %v993_v47 = vmax.f32 %v991_v45, %v992_v6 }
 0x182   :  { %v1010_v46 = vadd.f32 %v2066_v11, %v993_v47 }
 0x184   :  { %v1017_v2 = vmax.f32 %v1010_v46, 0.0  ;;  %v948_v12 = vpop.f32.mrf.mxu3 }
 0x185   :  { %v949_v17 = vadd.f32 %v948_v12, %v870_v13 }
 0x186   :  { %v1024_v24 = vpack.c.bf16 %v1017_v2, %v1017_v2 }
 0x187   :  { %v999_v26 = vsel %vm951_vm2, %v949_v17, -inf }
 0x188   :  { %1032 = vst.msk [vmem:[%s2151_s3 + $0x14] sm:$0xf] %vm1026_vm3, %v1024_v24  ;;  %v1000_v40 = vmax.f32 %v998_v52, %v999_v26 }
 0x18a   :  { %v1011_v48 = vadd.f32 %v2066_v11, %v1000_v40 }
 0x18c   :  { %v1018_v49 = vmax.f32 %v1011_v48, 0.0 }
 0x18e   :  { %v1025_v30 = vpack.c.bf16 %v1018_v49, %v1018_v49 }
 0x190   :  { %1033 = vst.msk [vmem:[%s2151_s3 + $0x18] sm:$0xf] %vm1026_vm3, %v1025_v30 }

// kernel: cnn_forward.5
= control target key start
LH: loop header
LB: loop body
LE: loop exit
PB: predicated region body
PF: predicated region fallthrough
CT: control target
= control target key end

     0   :  { %vm1958_vm0 = vcmask 1040384   ;;  %vm1954_vm1 = vcmask 801792   ;;  %vm2759_vm2 = vcmask 1041408   ;;  %vm2755_vm3 = vcmask 949248   ;;  %s6707_s1 = inlined_call_operand.vmem [shape: bf16[1250,500], index: 1, kind: input, shape index: {}]   ;;  %s6708_s0 = inlined_call_operand.vmem [shape: bf16[8,1250], index: 0, kind: input, shape index: {}]   ;;  %s6709_s2 = inlined_call_operand.vmem [shape: f32[1,500], index: 2, kind: input, shape index: {}]   ;;  %s6710_s3 = inlined_call_operand.vmem [shape: bf16[500,10], index: 3, kind: input, shape index: {}]   ;;  %s6711_s4 = inlined_call_operand.vmem [shape: f32[1,10], index: 4, kind: input, shape index: {}]   ;;  %s6712_s5 = inlined_call_operand.vmem [shape: f32[8,10], index: 5, kind: output, shape index: {}]  }
   0x1   :  { %v2948_v0 = vld [vmem:[%s6707_s1 + $0xe0] sm:$0xf]  ;;  %v4241_v1 = vld [vmem:[%s6707_s1 + $0xec] sm:$0xf0]  ;;  %vm2815_vm4 = vcmask 80896  }
   0x2   :  { %v3076_v2 = vld [vmem:[%s6707_s1 + $0x1e0] sm:$0xf]  ;;  %v2949_v3 = vor.u32 %v4241_v1, %v2948_v0  ;;  %v4273_v4 = vld [vmem:[%s6707_s1 + $0x1ec] sm:$0xf0] }
   0x3   :  { %v3204_v5 = vld [vmem:[%s6707_s1 + $0x2e0] sm:$0xf]  ;;  %v4305_v6 = vld [vmem:[%s6707_s1 + $0x2ec] sm:$0xf0]  ;;  %v3077_v7 = vor.u32 %v4273_v4, %v3076_v2 }
   0x4   :  { %v3205_v8 = vor.u32 %v4305_v6, %v3204_v5  ;;  %v3332_v9 = vld [vmem:[%s6707_s1 + $0x3e0] sm:$0xf]  ;;  %v4337_v10 = vld [vmem:[%s6707_s1 + $0x3ec] sm:$0xf0]  ;;  %1971 = vmatpush.bf16.msra.mxu0 %v2949_v3 }
   0x5   :  { %v2932_v11 = vld [vmem:[%s6707_s1 + $0xc0] sm:$0xf]  ;;  %v3333_v12 = vor.u32 %v4337_v10, %v3332_v9  ;;  %v4237_v13 = vld [vmem:[%s6707_s1 + $0xcc] sm:$0xf0]  ;;  %1984 = vmatpush.bf16.msra.mxu1 %v3077_v7 }
   0x6   :  { %v3060_v14 = vld [vmem:[%s6707_s1 + $0x1c0] sm:$0xf]  ;;  %v4269_v15 = vld [vmem:[%s6707_s1 + $0x1cc] sm:$0xf0]  ;;  %1997 = vmatpush.bf16.msra.mxu2 %v3205_v8  ;;  %v2933_v16 = vor.u32 %v4237_v13, %v2932_v11 }
   0x7   :  { %v3061_v17 = vor.u32 %v4269_v15, %v3060_v14  ;;  %v3188_v18 = vld [vmem:[%s6707_s1 + $0x2c0] sm:$0xf]  ;;  %v4301_v19 = vld [vmem:[%s6707_s1 + $0x2cc] sm:$0xf0]  ;;  %2010 = vmatpush.bf16.msra.mxu3 %v3333_v12 }
   0x8   :  { %v3316_v20 = vld [vmem:[%s6707_s1 + $0x3c0] sm:$0xf]  ;;  %v3189_v21 = vor.u32 %v4301_v19, %v3188_v18  ;;  %v4333_v22 = vld [vmem:[%s6707_s1 + $0x3cc] sm:$0xf0]  ;;  %1972 = vmatpush.bf16.msra.mxu0 %v2933_v16 }
   0x9   :  { %v2916_v23 = vld [vmem:[%s6707_s1 + $0xa0] sm:$0xf]  ;;  %v4233_v24 = vld [vmem:[%s6707_s1 + $0xac] sm:$0xf0]  ;;  %v3317_v25 = vor.u32 %v4333_v22, %v3316_v20  ;;  %1985 = vmatpush.bf16.msra.mxu1 %v3061_v17 }
   0xa   :  { %v3044_v26 = vld [vmem:[%s6707_s1 + $0x1a0] sm:$0xf]  ;;  %v4265_v27 = vld [vmem:[%s6707_s1 + $0x1ac] sm:$0xf0]  ;;  %v2917_v29 = vor.u32 %v4233_v24, %v2916_v23  ;;  %1998 = vmatpush.bf16.msra.mxu2 %v3189_v21 }
   0xb   :  { %v3172_v28 = vld [vmem:[%s6707_s1 + $0x2a0] sm:$0xf]  ;;  %v4297_v30 = vld [vmem:[%s6707_s1 + $0x2ac] sm:$0xf0]  ;;  %v3045_v33 = vor.u32 %v4265_v27, %v3044_v26  ;;  %2011 = vmatpush.bf16.msra.mxu3 %v3317_v25 }
   0xc   :  { %v3300_v31 = vld [vmem:[%s6707_s1 + $0x3a0] sm:$0xf]  ;;  %v4329_v32 = vld [vmem:[%s6707_s1 + $0x3ac] sm:$0xf0]  ;;  %v3173_v34 = vor.u32 %v4297_v30, %v3172_v28  ;;  %1973 = vmatpush.bf16.msra.mxu0 %v2917_v29 }
   0xd   :  { %v2900_v35 = vld [vmem:[%s6707_s1 + $0x80] sm:$0xf]  ;;  %v4229_v36 = vld [vmem:[%s6707_s1 + $0x8c] sm:$0xf0]  ;;  %v3301_v38 = vor.u32 %v4329_v32, %v3300_v31  ;;  %1986 = vmatpush.bf16.msra.mxu1 %v3045_v33 }
   0xe   :  { %v3028_v37 = vld [vmem:[%s6707_s1 + $0x180] sm:$0xf]  ;;  %v4261_v39 = vld [vmem:[%s6707_s1 + $0x18c] sm:$0xf0]  ;;  %v2901_v44 = vor.u32 %v4229_v36, %v2900_v35  ;;  %1999 = vmatpush.bf16.msra.mxu2 %v3173_v34 }
   0xf   :  { %v3156_v40 = vld [vmem:[%s6707_s1 + $0x280] sm:$0xf]  ;;  %v4293_v41 = vld [vmem:[%s6707_s1 + $0x28c] sm:$0xf0]  ;;  %v3029_v45 = vor.u32 %v4261_v39, %v3028_v37  ;;  %2012 = vmatpush.bf16.msra.mxu3 %v3301_v38 }
  0x10   :  { %v3284_v42 = vld [vmem:[%s6707_s1 + $0x380] sm:$0xf]  ;;  %v4325_v43 = vld [vmem:[%s6707_s1 + $0x38c] sm:$0xf0]  ;;  %v3157_v46 = vor.u32 %v4293_v41, %v3156_v40  ;;  %1974 = vmatpush.bf16.msra.mxu0 %v2901_v44 }
  0x11   :  { %v2884_v47 = vld [vmem:[%s6707_s1 + $0x60] sm:$0xf]  ;;  %v4225_v48 = vld [vmem:[%s6707_s1 + $0x6c] sm:$0xf0]  ;;  %v3285_v50 = vor.u32 %v4325_v43, %v3284_v42  ;;  %1987 = vmatpush.bf16.msra.mxu1 %v3029_v45 }
  0x12   :  { %v3012_v49 = vld [vmem:[%s6707_s1 + $0x160] sm:$0xf]  ;;  %v4257_v51 = vld [vmem:[%s6707_s1 + $0x16c] sm:$0xf0]  ;;  %v2885_v56 = vor.u32 %v4225_v48, %v2884_v47  ;;  %2000 = vmatpush.bf16.msra.mxu2 %v3157_v46 }
  0x13   :  { %v3140_v52 = vld [vmem:[%s6707_s1 + $0x260] sm:$0xf]  ;;  %v4289_v53 = vld [vmem:[%s6707_s1 + $0x26c] sm:$0xf0]  ;;  %v3013_v57 = vor.u32 %v4257_v51, %v3012_v49  ;;  %2013 = vmatpush.bf16.msra.mxu3 %v3285_v50 }
  0x14   :  { %v3268_v54 = vld [vmem:[%s6707_s1 + $0x360] sm:$0xf]  ;;  %v4321_v55 = vld [vmem:[%s6707_s1 + $0x36c] sm:$0xf0]  ;;  %v3141_v58 = vor.u32 %v4289_v53, %v3140_v52  ;;  %1975 = vmatpush.bf16.msra.mxu0 %v2885_v56 }
  0x15   :  { %v2868_v59 = vld [vmem:[%s6707_s1 + $0x40] sm:$0xf]  ;;  %v4221_v60 = vld [vmem:[%s6707_s1 + $0x4c] sm:$0xf0]  ;;  %v3269_v62 = vor.u32 %v4321_v55, %v3268_v54  ;;  %1988 = vmatpush.bf16.msra.mxu1 %v3013_v57 }
  0x16   :  { %v2996_v61 = vld [vmem:[%s6707_s1 + $0x140] sm:$0xf]  ;;  %v4253_v63 = vld [vmem:[%s6707_s1 + $0x14c] sm:$0xf0]  ;;  %v2869_v4 = vor.u32 %v4221_v60, %v2868_v59  ;;  %2001 = vmatpush.bf16.msra.mxu2 %v3141_v58  ;;  %v22_v58 = vld [vmem:[%s6708_s0 + $0x8] sm:$0xff] }
  0x17   :  { %v3124_v0 = vld [vmem:[%s6707_s1 + $0x240] sm:$0xf]  ;;  %v4285_v1 = vld [vmem:[%s6707_s1 + $0x24c] sm:$0xf0]  ;;  %v2997_v5 = vor.u32 %v4253_v63, %v2996_v61  ;;  %2014 = vmatpush.bf16.msra.mxu3 %v3269_v62  ;;  %v357_v63 = vunpack.c.l.b16 %v22_v58 }
  0x18   :  { %v3252_v2 = vld [vmem:[%s6707_s1 + $0x340] sm:$0xf]  ;;  %v4317_v3 = vld [vmem:[%s6707_s1 + $0x34c] sm:$0xf0]  ;;  %v3125_v6 = vor.u32 %v4285_v1, %v3124_v0  ;;  %1976 = vmatpush.bf16.msra.mxu0 %v2869_v4  ;;  %v358_v0 = vunpack.c.h.b16 %v22_v58 }
  0x19   :  { %v2852_v7 = vld [vmem:[%s6707_s1 + $0x20] sm:$0xf]  ;;  %v4217_v8 = vld [vmem:[%s6707_s1 + $0x2c] sm:$0xf0]  ;;  %v3253_v10 = vor.u32 %v4317_v3, %v3252_v2  ;;  %1989 = vmatpush.bf16.msra.mxu1 %v2997_v5  ;;  %v4857_v4 = vpack.c.b16 %v357_v63, %v357_v63 }
  0x1a   :  { %v2980_v9 = vld [vmem:[%s6707_s1 + $0x120] sm:$0xf]  ;;  %v4249_v11 = vld [vmem:[%s6707_s1 + $0x12c] sm:$0xf0]  ;;  %v2853_v16 = vor.u32 %v4217_v8, %v2852_v7  ;;  %2002 = vmatpush.bf16.msra.mxu2 %v3125_v6  ;;  %v4862_v6 = vpack.c.b16 %v358_v0, %v358_v0 }
  0x1b   :  { %v3108_v12 = vld [vmem:[%s6707_s1 + $0x220] sm:$0xf]  ;;  %v4281_v13 = vld [vmem:[%s6707_s1 + $0x22c] sm:$0xf0]  ;;  %v2981_v19 = vor.u32 %v4249_v11, %v2980_v9  ;;  %2015 = vmatpush.bf16.msra.mxu3 %v3253_v10 }
  0x1c   :  { %v3236_v14 = vld [vmem:[%s6707_s1 + $0x320] sm:$0xf]  ;;  %v4313_v15 = vld [vmem:[%s6707_s1 + $0x32c] sm:$0xf0]  ;;  %v3109_v20 = vor.u32 %v4281_v13, %v3108_v12  ;;  %1977 = vmatpush.bf16.msra.mxu0 %v2853_v16 }
  0x1d   :  { %v2836_v17 = vld [vmem:[%s6707_s1] sm:$0xf]  ;;  %v4213_v18 = vld [vmem:[%s6707_s1 + $0xc] sm:$0xf0]  ;;  %v3237_v24 = vor.u32 %v4313_v15, %v3236_v14  ;;  %1990 = vmatpush.bf16.msra.mxu1 %v2981_v19 }
  0x1e   :  { %v2964_v21 = vld [vmem:[%s6707_s1 + $0x100] sm:$0xf]  ;;  %v4245_v22 = vld [vmem:[%s6707_s1 + $0x10c] sm:$0xf0]  ;;  %v2837_v31 = vor.u32 %v4213_v18, %v2836_v17  ;;  %2003 = vmatpush.bf16.msra.mxu2 %v3109_v20 }
  0x1f   :  { %v3092_v23 = vld [vmem:[%s6707_s1 + $0x200] sm:$0xf]  ;;  %v4277_v25 = vld [vmem:[%s6707_s1 + $0x20c] sm:$0xf0]  ;;  %v2965_v35 = vor.u32 %v4245_v22, %v2964_v21  ;;  %2016 = vmatpush.bf16.msra.mxu3 %v3237_v24 }
  0x20   :  { %v3220_v26 = vld [vmem:[%s6707_s1 + $0x300] sm:$0xf]  ;;  %v4309_v27 = vld [vmem:[%s6707_s1 + $0x30c] sm:$0xf0]  ;;  %v3093_v36 = vor.u32 %v4277_v25, %v3092_v23  ;;  %1978 = vmatpush.bf16.msra.mxu0 %v2837_v31 }
  0x21   :  { %v3460_v28 = vld [vmem:[%s6707_s1 + $0x4e0] sm:$0xf]  ;;  %v4369_v29 = vld [vmem:[%s6707_s1 + $0x4ec] sm:$0xf0]  ;;  %v3221_v39 = vor.u32 %v4309_v27, %v3220_v26  ;;  %1991 = vmatpush.bf16.msra.mxu1 %v2965_v35 }
  0x22   :  { %v3588_v30 = vld [vmem:[%s6707_s1 + $0x5e0] sm:$0xf]  ;;  %v4401_v32 = vld [vmem:[%s6707_s1 + $0x5ec] sm:$0xf0]  ;;  %v3461_v40 = vor.u32 %v4369_v29, %v3460_v28  ;;  %2004 = vmatpush.bf16.msra.mxu2 %v3093_v36 }
  0x23   :  { %v3716_v33 = vld [vmem:[%s6707_s1 + $0x6e0] sm:$0xf]  ;;  %v4433_v34 = vld [vmem:[%s6707_s1 + $0x6ec] sm:$0xf0]  ;;  %v3589_v41 = vor.u32 %v4401_v32, %v3588_v30  ;;  %2017 = vmatpush.bf16.msra.mxu3 %v3221_v39 }
  0x24   :  { %v3844_v37 = vld [vmem:[%s6707_s1 + $0x7e0] sm:$0xf]  ;;  %v4465_v38 = vld [vmem:[%s6707_s1 + $0x7ec] sm:$0xf0]  ;;  %v3717_v42 = vor.u32 %v4433_v34, %v3716_v33  ;;  %2023 = vmatpush.bf16.msrb.mxu0 %v3461_v40 }
  0x25   :  { %v3444_v43 = vld [vmem:[%s6707_s1 + $0x4c0] sm:$0xf]  ;;  %v4365_v44 = vld [vmem:[%s6707_s1 + $0x4cc] sm:$0xf0]  ;;  %v3845_v46 = vor.u32 %v4465_v38, %v3844_v37  ;;  %2036 = vmatpush.bf16.msrb.mxu1 %v3589_v41  ;;  %2005 = vmatmul.bf16.vlgmr.msra.gmra.mxu2 %v4857_v4 }
  0x26   :  { %v3572_v45 = vld [vmem:[%s6707_s1 + $0x5c0] sm:$0xf]  ;;  %v4397_v47 = vld [vmem:[%s6707_s1 + $0x5cc] sm:$0xf0]  ;;  %v3445_v52 = vor.u32 %v4365_v44, %v3444_v43  ;;  %2049 = vmatpush.bf16.msrb.mxu2 %v3717_v42  ;;  %2018 = vmatmul.bf16.vlgmr.msra.gmra.mxu3 %v4862_v6 }
  0x27   :  { %v3700_v48 = vld [vmem:[%s6707_s1 + $0x6c0] sm:$0xf]  ;;  %v4429_v49 = vld [vmem:[%s6707_s1 + $0x6cc] sm:$0xf0]  ;;  %v3573_v54 = vor.u32 %v4397_v47, %v3572_v45  ;;  %2062 = vmatpush.bf16.msrb.mxu3 %v3845_v46 }
  0x28   :  { %v3828_v50 = vld [vmem:[%s6707_s1 + $0x7c0] sm:$0xf]  ;;  %v4461_v51 = vld [vmem:[%s6707_s1 + $0x7cc] sm:$0xf0]  ;;  %v3701_v55 = vor.u32 %v4429_v49, %v3700_v48  ;;  %2024 = vmatpush.bf16.msrb.mxu0 %v3445_v52 }
  0x29   :  { %v3428_v53 = vld [vmem:[%s6707_s1 + $0x4a0] sm:$0xf]  ;;  %v4361_v56 = vld [vmem:[%s6707_s1 + $0x4ac] sm:$0xf0]  ;;  %v3829_v59 = vor.u32 %v4461_v51, %v3828_v50  ;;  %2037 = vmatpush.bf16.msrb.mxu1 %v3573_v54 }
  0x2a   :  { %v3556_v57 = vld [vmem:[%s6707_s1 + $0x5a0] sm:$0xf]  ;;  %v4393_v60 = vld [vmem:[%s6707_s1 + $0x5ac] sm:$0xf0]  ;;  %v3429_v3 = vor.u32 %v4361_v56, %v3428_v53  ;;  %2050 = vmatpush.bf16.msrb.mxu2 %v3701_v55 }
  0x2b   :  { %v3684_v61 = vld [vmem:[%s6707_s1 + $0x6a0] sm:$0xf]  ;;  %v4425_v62 = vld [vmem:[%s6707_s1 + $0x6ac] sm:$0xf0]  ;;  %v3557_v7 = vor.u32 %v4393_v60, %v3556_v57  ;;  %2063 = vmatpush.bf16.msrb.mxu3 %v3829_v59 }
  0x2c   :  { %v3812_v1 = vld [vmem:[%s6707_s1 + $0x7a0] sm:$0xf]  ;;  %v4457_v2 = vld [vmem:[%s6707_s1 + $0x7ac] sm:$0xf0]  ;;  %v3685_v8 = vor.u32 %v4425_v62, %v3684_v61  ;;  %2025 = vmatpush.bf16.msrb.mxu0 %v3429_v3 }
  0x2d   :  { %v21_v5 = vld [vmem:[%s6708_s0] sm:$0xff]  ;;  %v4357_v10 = vld [vmem:[%s6707_s1 + $0x48c] sm:$0xf0]  ;;  %v3813_v14 = vor.u32 %v4457_v2, %v3812_v1  ;;  %2038 = vmatpush.bf16.msrb.mxu1 %v3557_v7 }
  0x2e   :  { %v3412_v9 = vld [vmem:[%s6707_s1 + $0x480] sm:$0xf]  ;;  %v355_v12 = vunpack.c.l.b16 %v21_v5  ;;  %v356_v13 = vunpack.c.h.b16 %v21_v5  ;;  %v4389_v15 = vld [vmem:[%s6707_s1 + $0x58c] sm:$0xf0]  ;;  %2051 = vmatpush.bf16.msrb.mxu2 %v3685_v8  ;;  %v24_v5 = vld [vmem:[%s6708_s0 + $0x18] sm:$0xff] }
  0x2f   :  { %v3540_v11 = vld [vmem:[%s6707_s1 + $0x580] sm:$0xf]  ;;  %v4421_v17 = vld [vmem:[%s6707_s1 + $0x68c] sm:$0xf0]  ;;  %v3413_v22 = vor.u32 %v4357_v10, %v3412_v9  ;;  %2064 = vmatpush.bf16.msrb.mxu3 %v3813_v14 }
  0x30   :  { %v3668_v16 = vld [vmem:[%s6707_s1 + $0x680] sm:$0xf]  ;;  %v4453_v19 = vld [vmem:[%s6707_s1 + $0x78c] sm:$0xf0]  ;;  %v4889_v20 = vpack.c.b16 %v355_v12, %v355_v12  ;;  %v4892_v21 = vpack.c.b16 %v356_v13, %v356_v13  ;;  %v3541_v23 = vor.u32 %v4389_v15, %v3540_v11 }
  0x31   :  { %v3796_v18 = vld [vmem:[%s6707_s1 + $0x780] sm:$0xf]  ;;  %v3669_v24 = vor.u32 %v4421_v17, %v3668_v16  ;;  %v4353_v26 = vld [vmem:[%s6707_s1 + $0x46c] sm:$0xf0]  ;;  %2026 = vmatpush.bf16.msrb.mxu0 %v3413_v22  ;;  %v4239_v16 = vld [vmem:[%s6707_s1 + $0xe4] sm:$0xf] }
  0x32   :  { %v3396_v25 = vld [vmem:[%s6707_s1 + $0x460] sm:$0xf]  ;;  %v3797_v28 = vor.u32 %v4453_v19, %v3796_v18  ;;  %v4385_v29 = vld [vmem:[%s6707_s1 + $0x56c] sm:$0xf0]  ;;  %1979 = vmatmul.bf16.vlgmr.msra.gmra.mxu0 %v4889_v20  ;;  %1992 = vmatmul.bf16.vlgmr.msra.gmra.mxu1 %v4892_v21  ;;  %v2950_v17 = vld [vmem:[%s6707_s1 + $0xf0] sm:$0xf0]  ;;  %v361_v18 = vunpack.c.l.b16 %v24_v5 }
  0x33   :  { %v3524_v27 = vld [vmem:[%s6707_s1 + $0x560] sm:$0xf]  ;;  %v4417_v31 = vld [vmem:[%s6707_s1 + $0x66c] sm:$0xf0]  ;;  %v3397_v34 = vor.u32 %v4353_v26, %v3396_v25  ;;  %2039 = vmatpush.bf16.msrb.mxu1 %v3541_v23  ;;  %2052 = vmatpush.bf16.msrb.mxu2 %v3669_v24  ;;  %v4271_v23 = vld [vmem:[%s6707_s1 + $0x1e4] sm:$0xf]  ;;  %v362_v26 = vunpack.c.h.b16 %v24_v5 }
  0x34   :  { %v3652_v30 = vld [vmem:[%s6707_s1 + $0x660] sm:$0xf]  ;;  %v4449_v33 = vld [vmem:[%s6707_s1 + $0x76c] sm:$0xf0]  ;;  %v3525_v35 = vor.u32 %v4385_v29, %v3524_v27  ;;  %2065 = vmatpush.bf16.msrb.mxu3 %v3797_v28  ;;  %v3078_v24 = vld [vmem:[%s6707_s1 + $0x1f0] sm:$0xf0] }
  0x35   :  { %v3780_v32 = vld [vmem:[%s6707_s1 + $0x760] sm:$0xf]  ;;  %v3653_v36 = vor.u32 %v4417_v31, %v3652_v30  ;;  %v4349_v38 = vld [vmem:[%s6707_s1 + $0x44c] sm:$0xf0]  ;;  %2027 = vmatpush.bf16.msrb.mxu0 %v3397_v34  ;;  %v2953_v31 = vor.u32 %v4239_v16, %v2950_v17  ;;  %v4259_v5 = vld [vmem:[%s6707_s1 + $0x184] sm:$0xf] }
  0x36   :  { %v3380_v37 = vld [vmem:[%s6707_s1 + $0x440] sm:$0xf]  ;;  %v3781_v40 = vor.u32 %v4449_v33, %v3780_v32  ;;  %v4381_v41 = vld [vmem:[%s6707_s1 + $0x54c] sm:$0xf0]  ;;  %v4223_v16 = vld [vmem:[%s6707_s1 + $0x64] sm:$0xf] }
  0x37   :  { %v3508_v39 = vld [vmem:[%s6707_s1 + $0x540] sm:$0xf]  ;;  %v4413_v43 = vld [vmem:[%s6707_s1 + $0x64c] sm:$0xf0]  ;;  %v3381_v46 = vor.u32 %v4349_v38, %v3380_v37  ;;  %2040 = vmatpush.bf16.msrb.mxu1 %v3525_v35  ;;  %2053 = vmatpush.bf16.msrb.mxu2 %v3653_v36  ;;  %v3081_v36 = vor.u32 %v4271_v23, %v3078_v24  ;;  %v4235_v37 = vld [vmem:[%s6707_s1 + $0xc4] sm:$0xf] }
  0x38   :  { %v3636_v42 = vld [vmem:[%s6707_s1 + $0x640] sm:$0xf]  ;;  %v4445_v45 = vld [vmem:[%s6707_s1 + $0x74c] sm:$0xf0]  ;;  %v3509_v48 = vor.u32 %v4381_v41, %v3508_v39  ;;  %2066 = vmatpush.bf16.msrb.mxu3 %v3781_v40  ;;  %v2934_v38 = vld [vmem:[%s6707_s1 + $0xd0] sm:$0xf0]  ;;  %v5041_v39 = vpack.c.b16 %v361_v18, %v361_v18 }
  0x39   :  { %v3764_v44 = vld [vmem:[%s6707_s1 + $0x740] sm:$0xf]  ;;  %v3637_v49 = vor.u32 %v4413_v43, %v3636_v42  ;;  %v4345_v50 = vld [vmem:[%s6707_s1 + $0x42c] sm:$0xf0]  ;;  %2028 = vmatpush.bf16.msrb.mxu0 %v3381_v46  ;;  %v4267_v40 = vld [vmem:[%s6707_s1 + $0x1c4] sm:$0xf]  ;;  %v5051_v43 = vpack.c.b16 %v362_v26, %v362_v26 }
  0x3a   :  { %v3364_v47 = vld [vmem:[%s6707_s1 + $0x420] sm:$0xf]  ;;  %v3765_v53 = vor.u32 %v4445_v45, %v3764_v44  ;;  %v4377_v54 = vld [vmem:[%s6707_s1 + $0x52c] sm:$0xf0]  ;;  %v3062_v41 = vld [vmem:[%s6707_s1 + $0x1d0] sm:$0xf0] }
  0x3b   :  { %v3492_v51 = vld [vmem:[%s6707_s1 + $0x520] sm:$0xf]  ;;  %v4409_v56 = vld [vmem:[%s6707_s1 + $0x62c] sm:$0xf0]  ;;  %v3365_v59 = vor.u32 %v4345_v50, %v3364_v47  ;;  %2041 = vmatpush.bf16.msrb.mxu1 %v3509_v48  ;;  %2054 = vmatpush.bf16.msrb.mxu2 %v3637_v49  ;;  %v2937_v47 = vor.u32 %v4235_v37, %v2934_v38  ;;  %v2886_v17 = vld [vmem:[%s6707_s1 + $0x70] sm:$0xf0] }
  0x3c   :  { %v4956_v52 = vld [vmem:[%s6707_s1 + $0x9c0] sm:$0x11]  ;;  %v4441_v58 = vld [vmem:[%s6707_s1 + $0x72c] sm:$0xf0]  ;;  %v3493_v0 = vor.u32 %v4377_v54, %v3492_v51  ;;  %2067 = vmatpush.bf16.msrb.mxu3 %v3765_v53  ;;  %v3065_v51 = vor.u32 %v4267_v40, %v3062_v41  ;;  %v2889_v24 = vor.u32 %v4223_v16, %v2886_v17 }
  0x3d   :  { %v3620_v55 = vld [vmem:[%s6707_s1 + $0x620] sm:$0xf]  ;;  %v4341_v61 = vld [vmem:[%s6707_s1 + $0x40c] sm:$0xf0]  ;;  %v1322_v63 = vunpack.c.l.b16 %v4956_v52  ;;  %2029 = vmatpush.bf16.msrb.mxu0 %v3365_v59  ;;  %v4231_v54 = vld [vmem:[%s6707_s1 + $0xa4] sm:$0xf] }
  0x3e   :  { %v3748_v57 = vld [vmem:[%s6707_s1 + $0x720] sm:$0xf]  ;;  %v3621_v1 = vor.u32 %v4409_v56, %v3620_v55  ;;  %v4373_v2 = vld [vmem:[%s6707_s1 + $0x50c] sm:$0xf0]  ;;  %v2918_v55 = vld [vmem:[%s6707_s1 + $0xb0] sm:$0xf0] }
  0x3f   :  { %v3348_v60 = vld [vmem:[%s6707_s1 + $0x400] sm:$0xf]  ;;  %v3749_v7 = vor.u32 %v4441_v58, %v3748_v57  ;;  %v4405_v8 = vld [vmem:[%s6707_s1 + $0x60c] sm:$0xf0]  ;;  %v1638_v15 = vpack.c.b16 %v1322_v63, %v1322_v63  ;;  %2042 = vmatpush.bf16.msrb.mxu1 %v3493_v0  ;;  %v4263_v56 = vld [vmem:[%s6707_s1 + $0x1a4] sm:$0xf] }
  0x40   :  { %v3476_v62 = vld [vmem:[%s6707_s1 + $0x500] sm:$0xf]  ;;  %v23_v10 = vld [vmem:[%s6708_s0 + $0x10] sm:$0xff]  ;;  %v3349_v14 = vor.u32 %v4341_v61, %v3348_v60  ;;  %2055 = vmatpush.bf16.msrb.mxu2 %v3621_v1  ;;  %v2921_v60 = vor.u32 %v4231_v54, %v2918_v55  ;;  %v4255_v18 = vld [vmem:[%s6707_s1 + $0x164] sm:$0xf] }
  0x41   :  { %v3604_v3 = vld [vmem:[%s6707_s1 + $0x600] sm:$0xf]  ;;  %v4437_v11 = vld [vmem:[%s6707_s1 + $0x70c] sm:$0xf0]  ;;  %v3477_v19 = vor.u32 %v4373_v2, %v3476_v62  ;;  %v359_v25 = vunpack.c.l.b16 %v23_v10  ;;  %2068 = vmatpush.bf16.msrb.mxu3 %v3749_v7  ;;  %v360_v30 = vunpack.c.h.b16 %v23_v10  ;;  %v1960_v35 = vsel %vm1958_vm0, %v1638_v15, 0 }
  0x42   :  { %v3732_v9 = vld [vmem:[%s6707_s1 + $0x700] sm:$0xf]  ;;  %v4497_v13 = vld [vmem:[%s6707_s1 + $0x8ec] sm:$0xf0]  ;;  %v3605_v22 = vor.u32 %v4405_v8, %v3604_v3  ;;  %2030 = vmatpush.bf16.msrb.mxu0 %v3349_v14  ;;  %v3046_v57 = vld [vmem:[%s6707_s1 + $0x1b0] sm:$0xf0] }
  0x43   :  { %v3972_v12 = vld [vmem:[%s6707_s1 + $0x8e0] sm:$0xf]  ;;  %v3733_v27 = vor.u32 %v4437_v11, %v3732_v9  ;;  %v4493_v32 = vld [vmem:[%s6707_s1 + $0x8cc] sm:$0xf0]  ;;  %2043 = vmatpush.bf16.msrb.mxu1 %v3477_v19  ;;  %v5049_v42 = vpack.c.b16 %v359_v25, %v359_v25  ;;  %v5053_v45 = vpack.c.b16 %v360_v30, %v360_v30  ;;  %v3049_v0 = vor.u32 %v4263_v56, %v3046_v57  ;;  %v4227_v2 = vld [vmem:[%s6707_s1 + $0x84] sm:$0xf] }
  0x44   :  { %v3973_v28 = vor.u32 %v4497_v13, %v3972_v12  ;;  %v3956_v29 = vld [vmem:[%s6707_s1 + $0x8c0] sm:$0xf]  ;;  %v4521_v34 = vld [vmem:[%s6707_s1 + $0x9ac] sm:$0xf0]  ;;  %2056 = vmatpush.bf16.msrb.mxu2 %v3605_v22  ;;  %v2902_v3 = vld [vmem:[%s6707_s1 + $0x90] sm:$0xf0] }
  0x45   :  { %v4068_v33 = vld [vmem:[%s6707_s1 + $0x9a0] sm:$0xf]  ;;  %2069 = vmatpush.bf16.msrb.mxu3 %v3733_v27  ;;  %v3957_v44 = vor.u32 %v4493_v32, %v3956_v29  ;;  %v4489_v49 = vld [vmem:[%s6707_s1 + $0x8ac] sm:$0xf0]  ;;  %2031 = vmatmul.bf16.vlgmr.msrb.gmra.mxu0 %v5049_v42  ;;  %v3030_v7 = vld [vmem:[%s6707_s1 + $0x190] sm:$0xf0]  ;;  %v2905_v10 = vor.u32 %v4227_v2, %v2902_v3 }
  0x46   :  { %2075 = vmatpush.bf16.msra.mxu0 %v3973_v28  ;;  %v4069_v46 = vor.u32 %v4521_v34, %v4068_v33  ;;  %v3940_v48 = vld [vmem:[%s6707_s1 + $0x8a0] sm:$0xf]  ;;  %v4517_v53 = vld [vmem:[%s6707_s1 + $0x98c] sm:$0xf0]  ;;  %2044 = vmatmul.bf16.vlgmr.msrb.gmra.mxu1 %v5053_v45  ;;  %v3033_v14 = vor.u32 %v4259_v5, %v3030_v7  ;;  %v3014_v19 = vld [vmem:[%s6707_s1 + $0x170] sm:$0xf0] }
  0x47   :  { %2089 = vmatpush.bf16.msra.mxu1 %v1960_v35  ;;  %v4052_v50 = vld [vmem:[%s6707_s1 + $0x980] sm:$0xf]  ;;  %2057 = vmatmul.bf16.vlgmr.msrb.gmra.mxu2 %v5041_v39  ;;  %v3941_v58 = vor.u32 %v4489_v49, %v3940_v48  ;;  %v4485_v62 = vld [vmem:[%s6707_s1 + $0x88c] sm:$0xf0]  ;;  %v3017_v28 = vor.u32 %v4255_v18, %v3014_v19  ;;  %v4219_v30 = vld [vmem:[%s6707_s1 + $0x44] sm:$0xf] }
  0x48   :  { %2101 = vmatpush.bf16.msra.mxu2 %v2953_v31  ;;  %2070 = vmatmul.bf16.vlgmr.msrb.gmra.mxu3 %v5051_v43  ;;  %v4053_v59 = vor.u32 %v4517_v53, %v4052_v50  ;;  %v3924_v61 = vld [vmem:[%s6707_s1 + $0x880] sm:$0xf]  ;;  %v4513_v1 = vld [vmem:[%s6707_s1 + $0x96c] sm:$0xf0]  ;;  %v2870_v31 = vld [vmem:[%s6707_s1 + $0x50] sm:$0xf0] }
  0x49   :  { %2114 = vmatpush.bf16.msra.mxu3 %v3081_v36  ;;  %v4036_v63 = vld [vmem:[%s6707_s1 + $0x960] sm:$0xf]  ;;  %v3925_v8 = vor.u32 %v4485_v62, %v3924_v61  ;;  %v4481_v12 = vld [vmem:[%s6707_s1 + $0x86c] sm:$0xf0]  ;;  %v4251_v32 = vld [vmem:[%s6707_s1 + $0x144] sm:$0xf]  ;;  %v2873_v38 = vor.u32 %v4219_v30, %v2870_v31 }
  0x4a   :  { %2076 = vmatpush.bf16.msra.mxu0 %v3957_v44  ;;  %v4037_v9 = vor.u32 %v4513_v1, %v4036_v63  ;;  %v3908_v11 = vld [vmem:[%s6707_s1 + $0x860] sm:$0xf]  ;;  %v4509_v15 = vld [vmem:[%s6707_s1 + $0x94c] sm:$0xf0]  ;;  %v2998_v33 = vld [vmem:[%s6707_s1 + $0x150] sm:$0xf0] }
  0x4b   :  { %2090 = vmatpush.bf16.msra.mxu1 %v4069_v46  ;;  %v4020_v13 = vld [vmem:[%s6707_s1 + $0x940] sm:$0xf]  ;;  %v3909_v22 = vor.u32 %v4481_v12, %v3908_v11  ;;  %v4477_v26 = vld [vmem:[%s6707_s1 + $0x84c] sm:$0xf0]  ;;  %v4215_v44 = vld [vmem:[%s6707_s1 + $0x24] sm:$0xf]  ;;  %v3001_v46 = vor.u32 %v4251_v32, %v2998_v33 }
  0x4c   :  { %2102 = vmatpush.bf16.msra.mxu2 %v2937_v47  ;;  %v4021_v23 = vor.u32 %v4509_v15, %v4020_v13  ;;  %v3892_v25 = vld [vmem:[%s6707_s1 + $0x840] sm:$0xf]  ;;  %v4505_v29 = vld [vmem:[%s6707_s1 + $0x92c] sm:$0xf0]  ;;  %v2854_v47 = vld [vmem:[%s6707_s1 + $0x30] sm:$0xf0] }
  0x4d   :  { %2115 = vmatpush.bf16.msra.mxu3 %v3065_v51  ;;  %v4004_v27 = vld [vmem:[%s6707_s1 + $0x920] sm:$0xf]  ;;  %v3893_v34 = vor.u32 %v4477_v26, %v3892_v25  ;;  %v4473_v36 = vld [vmem:[%s6707_s1 + $0x82c] sm:$0xf0]  ;;  %v4247_v48 = vld [vmem:[%s6707_s1 + $0x124] sm:$0xf] }
  0x4e   :  { %2077 = vmatpush.bf16.msra.mxu0 %v3941_v58  ;;  %v3876_v35 = vld [vmem:[%s6707_s1 + $0x820] sm:$0xf]  ;;  %v4005_v37 = vor.u32 %v4505_v29, %v4004_v27  ;;  %v4501_v41 = vld [vmem:[%s6707_s1 + $0x90c] sm:$0xf0]  ;;  %v2982_v49 = vld [vmem:[%s6707_s1 + $0x130] sm:$0xf0] }
  0x4f   :  { %2091 = vmatpush.bf16.msra.mxu1 %v4053_v59  ;;  %v3988_v40 = vld [vmem:[%s6707_s1 + $0x900] sm:$0xf]  ;;  %v4303_v50 = vld [vmem:[%s6707_s1 + $0x2e4] sm:$0xf]  ;;  %v3206_v51 = vld [vmem:[%s6707_s1 + $0x2f0] sm:$0xf0]  ;;  %v3877_v54 = vor.u32 %v4473_v36, %v3876_v35  ;;  %v2857_v59 = vor.u32 %v4215_v44, %v2854_v47  ;;  %v2985_v63 = vor.u32 %v4247_v48, %v2982_v49 }
  0x50   :  { %2103 = vmatpush.bf16.msra.mxu2 %v2921_v60  ;;  %v25_v53 = vld [vmem:[%s6708_s0 + $0x20] sm:$0xff]  ;;  %v4469_v56 = vld [vmem:[%s6707_s1 + $0x80c] sm:$0xf0]  ;;  %v3989_v58 = vor.u32 %v4501_v41, %v3988_v40  ;;  %v2838_v61 = vld [vmem:[%s6707_s1 + $0x10] sm:$0xf0] }
  0x51   :  { %2116 = vmatpush.bf16.msra.mxu3 %v3049_v0  ;;  %v3860_v55 = vld [vmem:[%s6707_s1 + $0x800] sm:$0xf]  ;;  %v364_v57 = vunpack.c.h.b16 %v25_v53  ;;  %v4211_v60 = vld [vmem:[%s6707_s1 + $0x4] sm:$0xf]  ;;  %v3209_v0 = vor.u32 %v4303_v50, %v3206_v51  ;;  %v2966_v1 = vld [vmem:[%s6707_s1 + $0x110] sm:$0xf0]  ;;  %v363_v13 = vunpack.c.l.b16 %v25_v53 }
  0x52   :  { %2078 = vmatpush.bf16.msra.mxu0 %v3925_v8  ;;  %v4243_v62 = vld [vmem:[%s6707_s1 + $0x104] sm:$0xf]  ;;  %v3334_v3 = vld [vmem:[%s6707_s1 + $0x3f0] sm:$0xf0]  ;;  %v2841_v15 = vor.u32 %v4211_v60, %v2838_v61 }
  0x53   :  { %2092 = vmatpush.bf16.msra.mxu1 %v4037_v9  ;;  %v4335_v2 = vld [vmem:[%s6707_s1 + $0x3e4] sm:$0xf]  ;;  %v3190_v7 = vld [vmem:[%s6707_s1 + $0x2d0] sm:$0xf0]  ;;  %v3861_v9 = vor.u32 %v4469_v56, %v3860_v55  ;;  %v2969_v17 = vor.u32 %v4243_v62, %v2966_v1 }
  0x54   :  { %2104 = vmatpush.bf16.msra.mxu2 %v2905_v10  ;;  %v4299_v5 = vld [vmem:[%s6707_s1 + $0x2c4] sm:$0xf]  ;;  %v3462_v10 = vld [vmem:[%s6707_s1 + $0x4f0] sm:$0xf0]  ;;  %v3337_v16 = vor.u32 %v4335_v2, %v3334_v3 }
  0x55   :  { %2117 = vmatpush.bf16.msra.mxu3 %v3033_v14  ;;  %v4367_v8 = vld [vmem:[%s6707_s1 + $0x4e4] sm:$0xf]  ;;  %v3590_v12 = vld [vmem:[%s6707_s1 + $0x5f0] sm:$0xf0]  ;;  %v5230_v14 = vpack.c.b16 %v364_v57, %v364_v57  ;;  %v3193_v18 = vor.u32 %v4299_v5, %v3190_v7 }
  0x56   :  { %2079 = vmatpush.bf16.msra.mxu0 %v3909_v22  ;;  %v4399_v11 = vld [vmem:[%s6707_s1 + $0x5e4] sm:$0xf]  ;;  %v3318_v22 = vld [vmem:[%s6707_s1 + $0x3d0] sm:$0xf0] }
  0x57   :  { %2093 = vmatpush.bf16.msra.mxu1 %v4021_v23  ;;  %v4331_v19 = vld [vmem:[%s6707_s1 + $0x3c4] sm:$0xf]  ;;  %v3465_v23 = vor.u32 %v4367_v8, %v3462_v10  ;;  %v3174_v26 = vld [vmem:[%s6707_s1 + $0x2b0] sm:$0xf0] }
  0x58   :  { %2105 = vmatpush.bf16.msra.mxu2 %v2889_v24  ;;  %v3593_v24 = vor.u32 %v4399_v11, %v3590_v12  ;;  %v4295_v25 = vld [vmem:[%s6707_s1 + $0x2a4] sm:$0xf]  ;;  %v3446_v29 = vld [vmem:[%s6707_s1 + $0x4d0] sm:$0xf0]  ;;  %v3321_v32 = vor.u32 %v4331_v19, %v3318_v22 }
  0x59   :  { %2118 = vmatpush.bf16.msra.mxu3 %v3017_v28  ;;  %v4363_v27 = vld [vmem:[%s6707_s1 + $0x4c4] sm:$0xf]  ;;  %v5247_v28 = vpack.c.b16 %v363_v13, %v363_v13  ;;  %v3574_v31 = vld [vmem:[%s6707_s1 + $0x5d0] sm:$0xf0]  ;;  %v3177_v33 = vor.u32 %v4295_v25, %v3174_v26 }
  0x5a   :  { %2080 = vmatpush.bf16.msra.mxu0 %v3893_v34  ;;  %v4395_v30 = vld [vmem:[%s6707_s1 + $0x5c4] sm:$0xf]  ;;  %v3302_v35 = vld [vmem:[%s6707_s1 + $0x3b0] sm:$0xf0]  ;;  %v3449_v36 = vor.u32 %v4363_v27, %v3446_v29 }
  0x5b   :  { %2094 = vmatpush.bf16.msra.mxu1 %v4005_v37  ;;  %v4327_v34 = vld [vmem:[%s6707_s1 + $0x3a4] sm:$0xf]  ;;  %v3577_v37 = vor.u32 %v4395_v30, %v3574_v31  ;;  %v3158_v40 = vld [vmem:[%s6707_s1 + $0x290] sm:$0xf0] }
  0x5c   :  { %2106 = vmatpush.bf16.msra.mxu2 %v2873_v38  ;;  %v4291_v38 = vld [vmem:[%s6707_s1 + $0x284] sm:$0xf]  ;;  %v3430_v44 = vld [vmem:[%s6707_s1 + $0x4b0] sm:$0xf0]  ;;  %v3305_v48 = vor.u32 %v4327_v34, %v3302_v35 }
  0x5d   :  { %2119 = vmatpush.bf16.msra.mxu3 %v3001_v46  ;;  %v4359_v41 = vld [vmem:[%s6707_s1 + $0x4a4] sm:$0xf]  ;;  %v3558_v47 = vld [vmem:[%s6707_s1 + $0x5b0] sm:$0xf0]  ;;  %v3161_v49 = vor.u32 %v4291_v38, %v3158_v40 }
  0x5e   :  { %2081 = vmatpush.bf16.msra.mxu0 %v3877_v54  ;;  %v4391_v46 = vld [vmem:[%s6707_s1 + $0x5a4] sm:$0xf]  ;;  %v3286_v51 = vld [vmem:[%s6707_s1 + $0x390] sm:$0xf0]  ;;  %v3433_v53 = vor.u32 %v4359_v41, %v3430_v44 }
  0x5f   :  { %2095 = vmatpush.bf16.msra.mxu1 %v3989_v58  ;;  %v4323_v50 = vld [vmem:[%s6707_s1 + $0x384] sm:$0xf]  ;;  %v3561_v54 = vor.u32 %v4391_v46, %v3558_v47  ;;  %v3142_v56 = vld [vmem:[%s6707_s1 + $0x270] sm:$0xf0] }
  0x60   :  { %2107 = vmatpush.bf16.msra.mxu2 %v2857_v59  ;;  %v4287_v55 = vld [vmem:[%s6707_s1 + $0x264] sm:$0xf]  ;;  %v3414_v58 = vld [vmem:[%s6707_s1 + $0x490] sm:$0xf0]  ;;  %v3289_v61 = vor.u32 %v4323_v50, %v3286_v51  ;;  %v1323_v50 = vunpack.c.h.b16 %v4956_v52 }
  0x61   :  { %2120 = vmatpush.bf16.msra.mxu3 %v2985_v63  ;;  %v4355_v57 = vld [vmem:[%s6707_s1 + $0x484] sm:$0xf]  ;;  %v3542_v60 = vld [vmem:[%s6707_s1 + $0x590] sm:$0xf0]  ;;  %v3145_v62 = vor.u32 %v4287_v55, %v3142_v56 }
  0x62   :  { %2082 = vmatpush.bf16.msra.mxu0 %v3861_v9  ;;  %4082 = vmatmul.msk.bf16.vlgmr.msra.gmra.mxu1 %vm1954_vm1, %v5230_v14  ;;  %v4387_v59 = vld [vmem:[%s6707_s1 + $0x584] sm:$0xf]  ;;  %v3417_v1 = vor.u32 %v4355_v57, %v3414_v58  ;;  %v3126_v5 = vld [vmem:[%s6707_s1 + $0x250] sm:$0xf0] }
  0x63   :  { %2127 = vmatpush.bf16.msrb.mxu1 %v3209_v0  ;;  %v4319_v63 = vld [vmem:[%s6707_s1 + $0x364] sm:$0xf]  ;;  %v3270_v0 = vld [vmem:[%s6707_s1 + $0x370] sm:$0xf0]  ;;  %v3545_v2 = vor.u32 %v4387_v59, %v3542_v60 }
  0x64   :  { %2108 = vmatpush.bf16.msra.mxu2 %v2841_v15  ;;  %v4283_v3 = vld [vmem:[%s6707_s1 + $0x244] sm:$0xf]  ;;  %v3398_v8 = vld [vmem:[%s6707_s1 + $0x470] sm:$0xf0]  ;;  %v3273_v11 = vor.u32 %v4319_v63, %v3270_v0 }
  0x65   :  { %2121 = vmatpush.bf16.msra.mxu3 %v2969_v17  ;;  %2083 = vmatmul.bf16.vlgmr.msra.gmra.mxu0 %v5247_v28  ;;  %v4351_v7 = vld [vmem:[%s6707_s1 + $0x464] sm:$0xf]  ;;  %v3526_v10 = vld [vmem:[%s6707_s1 + $0x570] sm:$0xf0]  ;;  %v3129_v12 = vor.u32 %v4283_v3, %v3126_v5 }
  0x66   :  { %2140 = vmatpush.bf16.msrb.mxu0 %v3337_v16  ;;  %v4383_v9 = vld [vmem:[%s6707_s1 + $0x564] sm:$0xf]  ;;  %v3254_v15 = vld [vmem:[%s6707_s1 + $0x350] sm:$0xf0]  ;;  %v3401_v16 = vor.u32 %v4351_v7, %v3398_v8 }
  0x67   :  { %2128 = vmatpush.bf16.msrb.mxu1 %v3193_v18  ;;  %2109 = vmatmul.bf16.vlgmr.msra.gmra.mxu2 %v4889_v20  ;;  %v4315_v13 = vld [vmem:[%s6707_s1 + $0x344] sm:$0xf]  ;;  %v3529_v17 = vor.u32 %v4383_v9, %v3526_v10  ;;  %v3110_v19 = vld [vmem:[%s6707_s1 + $0x230] sm:$0xf0] }
  0x68   :  { %2153 = vmatpush.bf16.msrb.mxu2 %v3465_v23  ;;  %2122 = vmatmul.bf16.vlgmr.msra.gmra.mxu3 %v4892_v21  ;;  %v4279_v18 = vld [vmem:[%s6707_s1 + $0x224] sm:$0xf]  ;;  %v3382_v23 = vld [vmem:[%s6707_s1 + $0x450] sm:$0xf0]  ;;  %v3257_v26 = vor.u32 %v4315_v13, %v3254_v15 }
  0x69   :  { %2166 = vmatpush.bf16.msrb.mxu3 %v3593_v24  ;;  %v4347_v22 = vld [vmem:[%s6707_s1 + $0x444] sm:$0xf]  ;;  %v3510_v25 = vld [vmem:[%s6707_s1 + $0x550] sm:$0xf0]  ;;  %v3113_v27 = vor.u32 %v4279_v18, %v3110_v19 }
  0x6a   :  { %2141 = vmatpush.bf16.msrb.mxu0 %v3321_v32  ;;  %v4379_v24 = vld [vmem:[%s6707_s1 + $0x544] sm:$0xf]  ;;  %v3238_v30 = vld [vmem:[%s6707_s1 + $0x330] sm:$0xf0]  ;;  %v3385_v31 = vor.u32 %v4347_v22, %v3382_v23 }
  0x6b   :  { %2129 = vmatpush.bf16.msrb.mxu1 %v3177_v33  ;;  %v4311_v29 = vld [vmem:[%s6707_s1 + $0x324] sm:$0xf]  ;;  %v3513_v32 = vor.u32 %v4379_v24, %v3510_v25  ;;  %v3094_v34 = vld [vmem:[%s6707_s1 + $0x210] sm:$0xf0] }
  0x6c   :  { %2154 = vmatpush.bf16.msrb.mxu2 %v3449_v36  ;;  %v4275_v33 = vld [vmem:[%s6707_s1 + $0x204] sm:$0xf]  ;;  %v3366_v36 = vld [vmem:[%s6707_s1 + $0x430] sm:$0xf0]  ;;  %v3241_v40 = vor.u32 %v4311_v29, %v3238_v30 }
  0x6d   :  { %2167 = vmatpush.bf16.msrb.mxu3 %v3577_v37  ;;  %v4343_v35 = vld [vmem:[%s6707_s1 + $0x424] sm:$0xf]  ;;  %v3494_v38 = vld [vmem:[%s6707_s1 + $0x530] sm:$0xf0]  ;;  %v3097_v46 = vor.u32 %v4275_v33, %v3094_v34 }
  0x6e   :  { %2142 = vmatpush.bf16.msrb.mxu0 %v3305_v48  ;;  %v4375_v37 = vld [vmem:[%s6707_s1 + $0x524] sm:$0xf]  ;;  %v3718_v44 = vld [vmem:[%s6707_s1 + $0x6f0] sm:$0xf0]  ;;  %v3369_v51 = vor.u32 %v4343_v35, %v3366_v36 }
  0x6f   :  { %2130 = vmatpush.bf16.msrb.mxu1 %v3161_v49  ;;  %v4431_v41 = vld [vmem:[%s6707_s1 + $0x6e4] sm:$0xf]  ;;  %v3222_v48 = vld [vmem:[%s6707_s1 + $0x310] sm:$0xf0] }
  0x70   :  { %2155 = vmatpush.bf16.msrb.mxu2 %v3433_v53  ;;  %v4307_v47 = vld [vmem:[%s6707_s1 + $0x304] sm:$0xf]  ;;  %v3497_v53 = vor.u32 %v4375_v37, %v3494_v38  ;;  %v3846_v56 = vld [vmem:[%s6707_s1 + $0x7f0] sm:$0xf0]  ;;  %v3721_v57 = vor.u32 %v4431_v41, %v3718_v44 }
  0x71   :  { %2168 = vmatpush.bf16.msrb.mxu3 %v3561_v54  ;;  %v4339_v49 = vld [vmem:[%s6707_s1 + $0x404] sm:$0xf]  ;;  %v3350_v54 = vld [vmem:[%s6707_s1 + $0x410] sm:$0xf0]  ;;  %v3225_v60 = vor.u32 %v4307_v47, %v3222_v48 }
  0x72   :  { %2143 = vmatpush.bf16.msrb.mxu0 %v3289_v61  ;;  %v4463_v55 = vld [vmem:[%s6707_s1 + $0x7e4] sm:$0xf]  ;;  %v3478_v58 = vld [vmem:[%s6707_s1 + $0x510] sm:$0xf0] }
  0x73   :  { %2131 = vmatpush.bf16.msrb.mxu1 %v3145_v62  ;;  %v4371_v52 = vld [vmem:[%s6707_s1 + $0x504] sm:$0xf]  ;;  %v3702_v61 = vld [vmem:[%s6707_s1 + $0x6d0] sm:$0xf0]  ;;  %v3849_v0 = vor.u32 %v4463_v55, %v3846_v56 }
  0x74   :  { %2156 = vmatpush.bf16.msrb.mxu2 %v3417_v1  ;;  %v4427_v59 = vld [vmem:[%s6707_s1 + $0x6c4] sm:$0xf]  ;;  %v3974_v63 = vld [vmem:[%s6707_s1 + $0x8f0] sm:$0xf0]  ;;  %v1639_v1 = vpack.c.b16 %v1323_v50, %v1323_v50  ;;  %v3481_v3 = vor.u32 %v4371_v52, %v3478_v58 }
  0x75   :  { %2169 = vmatpush.bf16.msrb.mxu3 %v3545_v2  ;;  %v4495_v62 = vld [vmem:[%s6707_s1 + $0x8e4] sm:$0xf]  ;;  %v3353_v2 = vor.u32 %v4339_v49, %v3350_v54  ;;  %v3830_v7 = vld [vmem:[%s6707_s1 + $0x7d0] sm:$0xf0]  ;;  %v3705_v8 = vor.u32 %v4427_v59, %v3702_v61 }
  0x76   :  { %2144 = vmatpush.bf16.msrb.mxu0 %v3273_v11  ;;  %v4459_v5 = vld [vmem:[%s6707_s1 + $0x7c4] sm:$0xf]  ;;  %v3977_v9 = vor.u32 %v4495_v62, %v3974_v63  ;;  %v3686_v11 = vld [vmem:[%s6707_s1 + $0x6b0] sm:$0xf0]  ;;  %v1963_v15 = vsel %vm1958_vm0, %v1639_v1, 0 }
  0x77   :  { %2132 = vmatpush.bf16.msrb.mxu1 %v3129_v12  ;;  %v4423_v10 = vld [vmem:[%s6707_s1 + $0x6a4] sm:$0xf]  ;;  %v3958_v13 = vld [vmem:[%s6707_s1 + $0x8d0] sm:$0xf0] }
  0x78   :  { %2157 = vmatpush.bf16.msrb.mxu2 %v3401_v16  ;;  %v4491_v12 = vld [vmem:[%s6707_s1 + $0x8c4] sm:$0xf]  ;;  %v3833_v16 = vor.u32 %v4459_v5, %v3830_v7  ;;  %v4070_v18 = vld [vmem:[%s6707_s1 + $0x9b0] sm:$0xf0]  ;;  %v3689_v23 = vor.u32 %v4423_v10, %v3686_v11 }
  0x79   :  { %2170 = vmatpush.bf16.msrb.mxu3 %v3529_v17  ;;  %v4519_v17 = vld [vmem:[%s6707_s1 + $0x9a4] sm:$0xf]  ;;  %v3814_v22 = vld [vmem:[%s6707_s1 + $0x7b0] sm:$0xf0]  ;;  %v3961_v24 = vor.u32 %v4491_v12, %v3958_v13 }
  0x7a   :  { %2145 = vmatpush.bf16.msrb.mxu0 %v3257_v26  ;;  %v4455_v19 = vld [vmem:[%s6707_s1 + $0x7a4] sm:$0xf]  ;;  %v4073_v26 = vor.u32 %v4519_v17, %v4070_v18  ;;  %v3942_v30 = vld [vmem:[%s6707_s1 + $0x8b0] sm:$0xf0] }
  0x7b   :  { %2133 = vmatpush.bf16.msrb.mxu1 %v3113_v27  ;;  %v4419_v25 = vld [vmem:[%s6707_s1 + $0x684] sm:$0xf]  ;;  %v3670_v27 = vld [vmem:[%s6707_s1 + $0x690] sm:$0xf0] }
  0x7c   :  { %2158 = vmatpush.bf16.msrb.mxu2 %v3385_v31  ;;  %v4487_v29 = vld [vmem:[%s6707_s1 + $0x8a4] sm:$0xf]  ;;  %v3817_v31 = vor.u32 %v4455_v19, %v3814_v22  ;;  %v4054_v33 = vld [vmem:[%s6707_s1 + $0x990] sm:$0xf0]  ;;  %v3673_v36 = vor.u32 %v4419_v25, %v3670_v27  ;;  %v2956_v27 = vld [vmem:[%s6707_s1 + $0xe8] sm:$0xf] }
  0x7d   :  { %2171 = vmatpush.bf16.msrb.mxu3 %v3513_v32  ;;  %v4515_v32 = vld [vmem:[%s6707_s1 + $0x984] sm:$0xf]  ;;  %v3798_v35 = vld [vmem:[%s6707_s1 + $0x790] sm:$0xf0]  ;;  %v3945_v37 = vor.u32 %v4487_v29, %v3942_v30  ;;  %v4242_v29 = vld [vmem:[%s6707_s1 + $0xf4] sm:$0xf0] }
  0x7e   :  { %2146 = vmatpush.bf16.msrb.mxu0 %v3241_v40  ;;  %v4451_v34 = vld [vmem:[%s6707_s1 + $0x784] sm:$0xf]  ;;  %v4057_v40 = vor.u32 %v4515_v32, %v4054_v33  ;;  %v3654_v41 = vld [vmem:[%s6707_s1 + $0x670] sm:$0xf0]  ;;  %v3084_v30 = vld [vmem:[%s6707_s1 + $0x1e8] sm:$0xf] }
  0x7f   :  { %2134 = vmatpush.bf16.msrb.mxu1 %v3097_v46  ;;  %v4415_v38 = vld [vmem:[%s6707_s1 + $0x664] sm:$0xf]  ;;  %v3926_v46 = vld [vmem:[%s6707_s1 + $0x890] sm:$0xf0]  ;;  %v3801_v47 = vor.u32 %v4451_v34, %v3798_v35 }
  0x80   :  { %2159 = vmatpush.bf16.msrb.mxu2 %v3369_v51  ;;  %v4483_v44 = vld [vmem:[%s6707_s1 + $0x884] sm:$0xf]  ;;  %v4038_v49 = vld [vmem:[%s6707_s1 + $0x970] sm:$0xf0] }
  0x81   :  { %2172 = vmatpush.bf16.msrb.mxu3 %v3497_v53  ;;  %v4511_v48 = vld [vmem:[%s6707_s1 + $0x964] sm:$0xf]  ;;  %v3782_v51 = vld [vmem:[%s6707_s1 + $0x770] sm:$0xf0]  ;;  %v3657_v53 = vor.u32 %v4415_v38, %v3654_v41  ;;  %v3929_v54 = vor.u32 %v4483_v44, %v3926_v46  ;;  %v2940_v46 = vld [vmem:[%s6707_s1 + $0xc8] sm:$0xf] }
  0x82   :  { %2147 = vmatpush.bf16.msrb.mxu0 %v3225_v60  ;;  %2135 = vmatmul.bf16.vlgmr.msrb.gmra.mxu1 %v4857_v4  ;;  %v4447_v50 = vld [vmem:[%s6707_s1 + $0x764] sm:$0xf]  ;;  %v4041_v56 = vor.u32 %v4511_v48, %v4038_v49  ;;  %v3910_v58 = vld [vmem:[%s6707_s1 + $0x870] sm:$0xf0]  ;;  %v4238_v49 = vld [vmem:[%s6707_s1 + $0xd4] sm:$0xf0] }
  0x83   :  { %2179 = vmatpush.bf16.msra.mxu1 %v3721_v57  ;;  %v4411_v55 = vld [vmem:[%s6707_s1 + $0x644] sm:$0xf]  ;;  %v3638_v57 = vld [vmem:[%s6707_s1 + $0x650] sm:$0xf0]  ;;  %v3785_v59 = vor.u32 %v4447_v50, %v3782_v51  ;;  %v3340_v50 = vld [vmem:[%s6707_s1 + $0x3e8] sm:$0xf] }
  0x84   :  { %2160 = vmatpush.bf16.msrb.mxu2 %v3353_v2  ;;  %v4479_v52 = vld [vmem:[%s6707_s1 + $0x864] sm:$0xf]  ;;  %v4022_v61 = vld [vmem:[%s6707_s1 + $0x950] sm:$0xf0]  ;;  %v4338_v51 = vld [vmem:[%s6707_s1 + $0x3f4] sm:$0xf0] }
  0x85   :  { %2173 = vmatpush.bf16.msrb.mxu3 %v3481_v3  ;;  %2148 = vmatmul.bf16.vlgmr.msrb.gmra.mxu0 %v4862_v6  ;;  %v4507_v60 = vld [vmem:[%s6707_s1 + $0x944] sm:$0xf]  ;;  %v3766_v63 = vld [vmem:[%s6707_s1 + $0x750] sm:$0xf0]  ;;  %v3913_v1 = vor.u32 %v4479_v52, %v3910_v58  ;;  %v4302_v52 = vld [vmem:[%s6707_s1 + $0x2d4] sm:$0xf0]  ;;  %v2941_v58 = vor.u32 %v4238_v49, %v2940_v46 }
  0x86   :  { %2192 = vmatpush.bf16.msra.mxu0 %v3849_v0  ;;  %v4443_v62 = vld [vmem:[%s6707_s1 + $0x744] sm:$0xf]  ;;  %v3641_v0 = vor.u32 %v4411_v55, %v3638_v57  ;;  %v4025_v3 = vor.u32 %v4507_v60, %v4022_v61  ;;  %v3622_v5 = vld [vmem:[%s6707_s1 + $0x630] sm:$0xf0]  ;;  %v3196_v57 = vld [vmem:[%s6707_s1 + $0x2c8] sm:$0xf] }
  0x87   :  { %2180 = vmatpush.bf16.msra.mxu1 %v3705_v8  ;;  %2161 = vmatmul.bf16.vlgmr.msrb.gmra.mxu2 %v5049_v42  ;;  %v4407_v2 = vld [vmem:[%s6707_s1 + $0x624] sm:$0xf]  ;;  %v3894_v8 = vld [vmem:[%s6707_s1 + $0x850] sm:$0xf0]  ;;  %v2924_v60 = vld [vmem:[%s6707_s1 + $0xa8] sm:$0xf] }
  0x88   :  { %2205 = vmatpush.bf16.msra.mxu2 %v3977_v9  ;;  %2174 = vmatmul.bf16.vlgmr.msrb.gmra.mxu3 %v5053_v45  ;;  %v4475_v7 = vld [vmem:[%s6707_s1 + $0x844] sm:$0xf]  ;;  %v3769_v9 = vor.u32 %v4443_v62, %v3766_v63  ;;  %v4006_v11 = vld [vmem:[%s6707_s1 + $0x930] sm:$0xf0]  ;;  %v4234_v62 = vld [vmem:[%s6707_s1 + $0xb4] sm:$0xf0] }
  0x89   :  { %2219 = vmatpush.bf16.msra.mxu3 %v1963_v15  ;;  %v4503_v10 = vld [vmem:[%s6707_s1 + $0x924] sm:$0xf]  ;;  %v3750_v13 = vld [vmem:[%s6707_s1 + $0x730] sm:$0xf0]  ;;  %v3625_v15 = vor.u32 %v4407_v2, %v3622_v5  ;;  %v3324_v63 = vld [vmem:[%s6707_s1 + $0x3c8] sm:$0xf] }
  0x8a   :  { %2193 = vmatpush.bf16.msra.mxu0 %v3833_v16  ;;  %v4439_v12 = vld [vmem:[%s6707_s1 + $0x724] sm:$0xf]  ;;  %v3897_v16 = vor.u32 %v4475_v7, %v3894_v8  ;;  %v3606_v18 = vld [vmem:[%s6707_s1 + $0x610] sm:$0xf0]  ;;  %v4009_v22 = vor.u32 %v4503_v10, %v4006_v11  ;;  %v4266_v2 = vld [vmem:[%s6707_s1 + $0x1b4] sm:$0xf0]  ;;  %v2925_v8 = vor.u32 %v4234_v62, %v2924_v60 }
  0x8b   :  { %2181 = vmatpush.bf16.msra.mxu1 %v3689_v23  ;;  %v4403_v17 = vld [vmem:[%s6707_s1 + $0x604] sm:$0xf]  ;;  %v3878_v23 = vld [vmem:[%s6707_s1 + $0x830] sm:$0xf0]  ;;  %v3180_v5 = vld [vmem:[%s6707_s1 + $0x2a8] sm:$0xf] }
  0x8c   :  { %2206 = vmatpush.bf16.msra.mxu2 %v3961_v24  ;;  %v4471_v19 = vld [vmem:[%s6707_s1 + $0x824] sm:$0xf]  ;;  %v3990_v25 = vld [vmem:[%s6707_s1 + $0x910] sm:$0xf0]  ;;  %v3609_v34 = vor.u32 %v4403_v17, %v3606_v18  ;;  %v4298_v7 = vld [vmem:[%s6707_s1 + $0x2b4] sm:$0xf0] }
  0x8d   :  { %2220 = vmatpush.bf16.msra.mxu3 %v4073_v26  ;;  %v4499_v24 = vld [vmem:[%s6707_s1 + $0x904] sm:$0xf]  ;;  %v3753_v26 = vor.u32 %v4439_v12, %v3750_v13  ;;  %v3734_v33 = vld [vmem:[%s6707_s1 + $0x710] sm:$0xf0]  ;;  %v3881_v35 = vor.u32 %v4471_v19, %v3878_v23  ;;  %v2908_v10 = vld [vmem:[%s6707_s1 + $0x88] sm:$0xf]  ;;  %v3181_v18 = vor.u32 %v4298_v7, %v3180_v5 }
  0x8e   :  { %2194 = vmatpush.bf16.msra.mxu0 %v3817_v31  ;;  %v4274_v31 = vld [vmem:[%s6707_s1 + $0x1f4] sm:$0xf0]  ;;  %v4435_v32 = vld [vmem:[%s6707_s1 + $0x704] sm:$0xf]  ;;  %v3993_v38 = vor.u32 %v4499_v24, %v3990_v25  ;;  %v3862_v44 = vld [vmem:[%s6707_s1 + $0x810] sm:$0xf0] }
  0x8f   :  { %2182 = vmatpush.bf16.msra.mxu1 %v3673_v36  ;;  %v3212_v36 = vld [vmem:[%s6707_s1 + $0x2e8] sm:$0xf]  ;;  %v4467_v41 = vld [vmem:[%s6707_s1 + $0x804] sm:$0xf]  ;;  %v3737_v48 = vor.u32 %v4435_v32, %v3734_v33  ;;  %v4230_v12 = vld [vmem:[%s6707_s1 + $0x94] sm:$0xf0] }
  0x90   :  { %2207 = vmatpush.bf16.msra.mxu2 %v3945_v37  ;;  %v4306_v37 = vld [vmem:[%s6707_s1 + $0x2f4] sm:$0xf0]  ;;  %v3308_v13 = vld [vmem:[%s6707_s1 + $0x3a8] sm:$0xf]  ;;  %v2909_v23 = vor.u32 %v4230_v12, %v2908_v10 }
  0x91   :  { %2221 = vmatpush.bf16.msra.mxu3 %v4057_v40  ;;  %v2957_v40 = vor.u32 %v4242_v29, %v2956_v27  ;;  %v3213_v55 = vor.u32 %v4306_v37, %v3212_v36  ;;  %v4262_v17 = vld [vmem:[%s6707_s1 + $0x194] sm:$0xf0]  ;;  %v3164_v19 = vld [vmem:[%s6707_s1 + $0x288] sm:$0xf] }
  0x92   :  { %2195 = vmatpush.bf16.msra.mxu0 %v3801_v47  ;;  %v3085_v47 = vor.u32 %v4274_v31, %v3084_v30  ;;  %v2892_v25 = vld [vmem:[%s6707_s1 + $0x68] sm:$0xf]  ;;  %v4226_v27 = vld [vmem:[%s6707_s1 + $0x74] sm:$0xf0] }
  0x93   :  { %2183 = vmatpush.bf16.msra.mxu1 %v3657_v53  ;;  %v3068_v53 = vld [vmem:[%s6707_s1 + $0x1c8] sm:$0xf]  ;;  %v4326_v30 = vld [vmem:[%s6707_s1 + $0x394] sm:$0xf0]  ;;  %v2893_v36 = vor.u32 %v4226_v27, %v2892_v25 }
  0x94   :  { %2208 = vmatpush.bf16.msra.mxu2 %v3929_v54  ;;  %v4270_v54 = vld [vmem:[%s6707_s1 + $0x1d4] sm:$0xf0]  ;;  %v3292_v29 = vld [vmem:[%s6707_s1 + $0x388] sm:$0xf] }
  0x95   :  { %2222 = vmatpush.bf16.msra.mxu3 %v4041_v56  ;;  %v3865_v56 = vor.u32 %v4467_v41, %v3862_v44  ;;  %v3069_v61 = vor.u32 %v4270_v54, %v3068_v53  ;;  %v3020_v31 = vld [vmem:[%s6707_s1 + $0x168] sm:$0xf]  ;;  %v4258_v32 = vld [vmem:[%s6707_s1 + $0x174] sm:$0xf0]  ;;  %v3293_v37 = vor.u32 %v4326_v30, %v3292_v29 }
  0x96   :  { %2196 = vmatpush.bf16.msra.mxu0 %v3785_v59  ;;  %v3341_v59 = vor.u32 %v4338_v51, %v3340_v50  ;;  %v4222_v41 = vld [vmem:[%s6707_s1 + $0x54] sm:$0xf0]  ;;  %v3276_v44 = vld [vmem:[%s6707_s1 + $0x368] sm:$0xf]  ;;  %v5727_v50 = vld [vmem:[%s6709_s2] sm:$0xf] }
  0x97   :  { %2184 = vmatpush.bf16.msra.mxu1 %v3641_v0  ;;  %v4334_v0 = vld [vmem:[%s6707_s1 + $0x3d4] sm:$0xf0]  ;;  %v3132_v51 = vld [vmem:[%s6707_s1 + $0x248] sm:$0xf]  ;;  %v342_v60 = vperm.slane %v5727_v50, 0 }
  0x98   :  { %2209 = vmatpush.bf16.msra.mxu2 %v3913_v1  ;;  %v3052_v1 = vld [vmem:[%s6707_s1 + $0x1a8] sm:$0xf]  ;;  %v4322_v46 = vld [vmem:[%s6707_s1 + $0x374] sm:$0xf0] }
  0x99   :  { %2223 = vmatpush.bf16.msra.mxu3 %v4025_v3  ;;  %v3197_v3 = vor.u32 %v4302_v52, %v3196_v57  ;;  %v3053_v11 = vor.u32 %v4266_v2, %v3052_v1  ;;  %v4286_v53 = vld [vmem:[%s6707_s1 + $0x254] sm:$0xf0]  ;;  %v2844_v5 = vld [vmem:[%s6707_s1 + $0x8] sm:$0xf] }
  0x9a   :  { %2197 = vmatpush.bf16.msra.mxu0 %v3769_v9  ;;  %v3325_v9 = vor.u32 %v4334_v0, %v3324_v63  ;;  %v4218_v57 = vld [vmem:[%s6707_s1 + $0x34] sm:$0xf0]  ;;  %v3133_v63 = vor.u32 %v4286_v53, %v3132_v51  ;;  %v3116_v0 = vld [vmem:[%s6707_s1 + $0x228] sm:$0xf] }
  0x9b   :  { %2185 = vmatpush.bf16.msra.mxu1 %v3625_v15  ;;  %v4330_v15 = vld [vmem:[%s6707_s1 + $0x3b4] sm:$0xf0]  ;;  %v3244_v12 = vld [vmem:[%s6707_s1 + $0x328] sm:$0xf] }
  0x9c   :  { %2210 = vmatpush.bf16.msra.mxu2 %v3897_v16  ;;  %v3036_v16 = vld [vmem:[%s6707_s1 + $0x188] sm:$0xf]  ;;  %v3309_v24 = vor.u32 %v4330_v15, %v3308_v13  ;;  %v4250_v62 = vld [vmem:[%s6707_s1 + $0x134] sm:$0xf0] }
  0x9d   :  { %2224 = vmatpush.bf16.msra.mxu3 %v4009_v22  ;;  %v4294_v22 = vld [vmem:[%s6707_s1 + $0x294] sm:$0xf0]  ;;  %v3100_v25 = vld [vmem:[%s6707_s1 + $0x208] sm:$0xf] }
  0x9e   :  { %2198 = vmatpush.bf16.msra.mxu0 %v3753_v26  ;;  %v3037_v26 = vor.u32 %v4262_v17, %v3036_v16  ;;  %v3165_v33 = vor.u32 %v4294_v22, %v3164_v19  ;;  %v4282_v1 = vld [vmem:[%s6707_s1 + $0x234] sm:$0xf0]  ;;  %v3596_v22 = vld [vmem:[%s6707_s1 + $0x5e8] sm:$0xf] }
  0x9f   :  { %2186 = vmatpush.bf16.msra.mxu1 %v3609_v34  ;;  %v3148_v34 = vld [vmem:[%s6707_s1 + $0x268] sm:$0xf]  ;;  %v4214_v7 = vld [vmem:[%s6707_s1 + $0x14] sm:$0xf0]  ;;  %v3117_v17 = vor.u32 %v4282_v1, %v3116_v0 }
  0xa0   :  { %2211 = vmatpush.bf16.msra.mxu2 %v3881_v35  ;;  %v4290_v35 = vld [vmem:[%s6707_s1 + $0x274] sm:$0xf0]  ;;  %v2845_v30 = vor.u32 %v4214_v7, %v2844_v5  ;;  %v3836_v0 = vld [vmem:[%s6707_s1 + $0x7c8] sm:$0xf] }
  0xa1   :  { %2225 = vmatpush.bf16.msra.mxu3 %v3993_v38  ;;  %v2876_v38 = vld [vmem:[%s6707_s1 + $0x48] sm:$0xf]  ;;  %v3149_v49 = vor.u32 %v4290_v35, %v3148_v34  ;;  %v4314_v13 = vld [vmem:[%s6707_s1 + $0x334] sm:$0xf0] }
  0xa2   :  { %2199 = vmatpush.bf16.msra.mxu0 %v3737_v48  ;;  %2187 = vmatmul.bf16.vlgmr.msra.gmra.mxu1 %v5041_v39  ;;  %v4254_v48 = vld [vmem:[%s6707_s1 + $0x154] sm:$0xf0]  ;;  %v2877_v54 = vor.u32 %v4222_v41, %v2876_v38  ;;  %v3452_v38 = vld [vmem:[%s6707_s1 + $0x4c8] sm:$0xf] }
  0xa3   :  { %2231 = vmatpush.bf16.msrb.mxu1 %v2957_v40  ;;  %v3021_v40 = vor.u32 %v4258_v32, %v3020_v31  ;;  %v4370_v19 = vld [vmem:[%s6707_s1 + $0x4f4] sm:$0xf0]  ;;  %v3245_v31 = vor.u32 %v4314_v13, %v3244_v12  ;;  %v3724_v32 = vld [vmem:[%s6707_s1 + $0x6e8] sm:$0xf] }
  0xa4   :  { %2212 = vmatpush.bf16.msra.mxu2 %v3865_v56  ;;  %4083 = vmatmul.msk.bf16.vlgmr.msra.gmra.mxu3 %vm1954_vm1, %v5230_v14  ;;  %v2860_v56 = vld [vmem:[%s6707_s1 + $0x28] sm:$0xf]  ;;  %v4398_v51 = vld [vmem:[%s6707_s1 + $0x5d4] sm:$0xf0] }
  0xa5   :  { %2244 = vmatpush.bf16.msrb.mxu3 %v3085_v47  ;;  %2200 = vmatmul.bf16.vlgmr.msra.gmra.mxu0 %v5051_v43  ;;  %v3004_v47 = vld [vmem:[%s6707_s1 + $0x148] sm:$0xf]  ;;  %v2861_v2 = vor.u32 %v4218_v57, %v2860_v56  ;;  %v4430_v57 = vld [vmem:[%s6707_s1 + $0x6d4] sm:$0xf0] }
  0xa6   :  { %2257 = vmatpush.bf16.msrb.mxu0 %v3213_v55  ;;  %v3277_v55 = vor.u32 %v4322_v46, %v3276_v44  ;;  %v3005_v52 = vor.u32 %v4254_v48, %v3004_v47  ;;  %v4366_v46 = vld [vmem:[%s6707_s1 + $0x4d4] sm:$0xf0]  ;;  %v3852_v47 = vld [vmem:[%s6707_s1 + $0x7e8] sm:$0xf] }
  0xa7   :  { %2232 = vmatpush.bf16.msrb.mxu1 %v2941_v58  ;;  %2213 = vmatmul.bf16.vlgmr.msra.gmra.mxu2 %v5247_v28  ;;  %v3260_v58 = vld [vmem:[%s6707_s1 + $0x348] sm:$0xf]  ;;  %v4466_v48 = vld [vmem:[%s6707_s1 + $0x7f4] sm:$0xf0] }
  0xa8   :  { %2270 = vmatpush.bf16.msrb.mxu2 %v3341_v59  ;;  %v4318_v59 = vld [vmem:[%s6707_s1 + $0x354] sm:$0xf0]  ;;  %v3708_v56 = vld [vmem:[%s6707_s1 + $0x6c8] sm:$0xf] }
  0xa9   :  { %2245 = vmatpush.bf16.msrb.mxu3 %v3069_v61  ;;  %v2988_v61 = vld [vmem:[%s6707_s1 + $0x128] sm:$0xf]  ;;  %v2019_v29 = vpop.f32.mrf.mxu3  ;;  %v4462_v1 = vld [vmem:[%s6707_s1 + $0x7d4] sm:$0xf0]  ;;  %v3709_v7 = vor.u32 %v4430_v57, %v3708_v56 }
  0xaa   :  { %2258 = vmatpush.bf16.msrb.mxu0 %v3197_v3  ;;  %v3261_v3 = vor.u32 %v4318_v59, %v3260_v58  ;;  %v2989_v10 = vor.u32 %v4250_v62, %v2988_v61  ;;  %v3453_v58 = vor.u32 %v4366_v46, %v3452_v38  ;;  %v3853_v59 = vor.u32 %v4466_v48, %v3852_v47  ;;  %v4394_v5 = vld [vmem:[%s6707_s1 + $0x5b4] sm:$0xf0]  ;;  %v3420_v13 = vld [vmem:[%s6707_s1 + $0x488] sm:$0xf] }
  0xab   :  { %2233 = vmatpush.bf16.msrb.mxu1 %v2925_v8  ;;  %v2972_v8 = vld [vmem:[%s6707_s1 + $0x108] sm:$0xf]  ;;  %v3837_v12 = vor.u32 %v4462_v1, %v3836_v0  ;;  %v4418_v38 = vld [vmem:[%s6707_s1 + $0x674] sm:$0xf0] }
  0xac   :  { %2271 = vmatpush.bf16.msrb.mxu2 %v3325_v9  ;;  %v4350_v47 = vld [vmem:[%s6707_s1 + $0x454] sm:$0xf0]  ;;  %v3788_v48 = vld [vmem:[%s6707_s1 + $0x768] sm:$0xf] }
  0xad   :  { %2246 = vmatpush.bf16.msrb.mxu3 %v3053_v11  ;;  %v4246_v11 = vld [vmem:[%s6707_s1 + $0x114] sm:$0xf0] }
  0xae   :  { %2259 = vmatpush.bf16.msrb.mxu0 %v3181_v18  ;;  %v3468_v18 = vld [vmem:[%s6707_s1 + $0x4e8] sm:$0xf]  ;;  %v2973_v34 = vor.u32 %v4246_v11, %v2972_v8  ;;  %v4346_v1 = vld [vmem:[%s6707_s1 + $0x434] sm:$0xf0] }
  0xaf   :  { %2234 = vmatpush.bf16.msrb.mxu1 %v2909_v23  ;;  %v1980_v9 = vpop.f32.mrf.mxu0  ;;  %v1993_v16 = vpop.f32.mrf.mxu1  ;;  %v3469_v35 = vor.u32 %v4370_v19, %v3468_v18  ;;  %v4458_v18 = vld [vmem:[%s6707_s1 + $0x7b4] sm:$0xf0]  ;;  %v3548_v19 = vld [vmem:[%s6707_s1 + $0x588] sm:$0xf] }
  0xb0   :  { %2272 = vmatpush.bf16.msrb.mxu2 %v3309_v24  ;;  %v1981_v15 = vadd.f32 %v1980_v9, %v342_v60  ;;  %v2006_v23 = vpop.f32.mrf.mxu2  ;;  %v4402_v24 = vld [vmem:[%s6707_s1 + $0x5f4] sm:$0xf0]  ;;  %v3436_v60 = vld [vmem:[%s6707_s1 + $0x4a8] sm:$0xf] }
  0xb1   :  { %2247 = vmatpush.bf16.msrb.mxu3 %v3037_v26  ;;  %v4278_v26 = vld [vmem:[%s6707_s1 + $0x214] sm:$0xf0]  ;;  %v3597_v41 = vor.u32 %v4402_v24, %v3596_v22  ;;  %v2021_v8 = vpop.f32.mrf.mxu3  ;;  %v3692_v9 = vld [vmem:[%s6707_s1 + $0x6a8] sm:$0xf] }
  0xb2   :  { %2260 = vmatpush.bf16.msrb.mxu0 %v3165_v33  ;;  %v1994_v27 = vadd.f32 %v1993_v16, %v1981_v15  ;;  %v4434_v33 = vld [vmem:[%s6707_s1 + $0x6f4] sm:$0xf0]  ;;  %v3101_v44 = vor.u32 %v4278_v26, %v3100_v25  ;;  %v3676_v24 = vld [vmem:[%s6707_s1 + $0x688] sm:$0xf] }
  0xb3   :  { %2235 = vmatpush.bf16.msrb.mxu1 %v2893_v36  ;;  %v3228_v36 = vld [vmem:[%s6707_s1 + $0x308] sm:$0xf]  ;;  %v3725_v53 = vor.u32 %v4434_v33, %v3724_v32  ;;  %v4358_v16 = vld [vmem:[%s6707_s1 + $0x494] sm:$0xf0] }
  0xb4   :  { %2273 = vmatpush.bf16.msrb.mxu2 %v3293_v37  ;;  %v4310_v37 = vld [vmem:[%s6707_s1 + $0x314] sm:$0xf0]  ;;  %v3421_v26 = vor.u32 %v4358_v16, %v3420_v13  ;;  %v3804_v32 = vld [vmem:[%s6707_s1 + $0x788] sm:$0xf] }
  0xb5   :  { %2248 = vmatpush.bf16.msrb.mxu3 %v3021_v40  ;;  %v2007_v40 = vadd.f32 %v2006_v23, %v1994_v27  ;;  %v4390_v22 = vld [vmem:[%s6707_s1 + $0x594] sm:$0xf0] }
  0xb6   :  { %2261 = vmatpush.bf16.msrb.mxu0 %v3149_v49  ;;  %v3580_v49 = vld [vmem:[%s6707_s1 + $0x5c8] sm:$0xf]  ;;  %v4422_v25 = vld [vmem:[%s6707_s1 + $0x694] sm:$0xf0] }
  0xb7   :  { %2236 = vmatpush.bf16.msrb.mxu1 %v2877_v54  ;;  %v5826_v54 = vadd.f32 %v2019_v29, %v2007_v40  ;;  %v1995_v61 = vpop.f32.mrf.mxu1  ;;  %v3581_v62 = vor.u32 %v4398_v51, %v3580_v49  ;;  %v3404_v29 = vld [vmem:[%s6707_s1 + $0x468] sm:$0xf]  ;;  %v4454_v33 = vld [vmem:[%s6707_s1 + $0x794] sm:$0xf0] }
  0xb8   :  { %2274 = vmatpush.bf16.msrb.mxu2 %v3277_v55  ;;  %v3229_v55 = vor.u32 %v4310_v37, %v3228_v36  ;;  %v3677_v36 = vor.u32 %v4422_v25, %v3676_v24  ;;  %v3660_v37 = vld [vmem:[%s6707_s1 + $0x668] sm:$0xf]  ;;  %v4450_v49 = vld [vmem:[%s6707_s1 + $0x774] sm:$0xf0] }
  0xb9   :  { %2249 = vmatpush.bf16.msrb.mxu3 %v3005_v52  ;;  %v1982_v52 = vpop.f32.mrf.mxu0  ;;  %v3516_v51 = vld [vmem:[%s6707_s1 + $0x548] sm:$0xf]  ;;  %v3789_v61 = vor.u32 %v4450_v49, %v3788_v48  ;;  %v4442_v25 = vld [vmem:[%s6707_s1 + $0x734] sm:$0xf0] }
  0xba   :  { %2262 = vmatpush.bf16.msrb.mxu0 %v3133_v63  ;;  %v4362_v63 = vld [vmem:[%s6707_s1 + $0x4b4] sm:$0xf0]  ;;  %v3756_v24 = vld [vmem:[%s6707_s1 + $0x728] sm:$0xf] }
  0xbb   :  { %2237 = vmatpush.bf16.msrb.mxu1 %v2861_v2  ;;  %v2008_v2 = vpop.f32.mrf.mxu2  ;;  %v3437_v11 = vor.u32 %v4362_v63, %v3436_v60  ;;  %v4438_v48 = vld [vmem:[%s6707_s1 + $0x714] sm:$0xf0]  ;;  %v3964_v49 = vld [vmem:[%s6707_s1 + $0x8c8] sm:$0xf] }
  0xbc   :  { %2275 = vmatpush.bf16.msrb.mxu2 %v3261_v3  ;;  %v3564_v3 = vld [vmem:[%s6707_s1 + $0x5a8] sm:$0xf] }
  0xbd   :  { %2250 = vmatpush.bf16.msrb.mxu3 %v2989_v10  ;;  %v4426_v10 = vld [vmem:[%s6707_s1 + $0x6b4] sm:$0xf0]  ;;  %v3565_v15 = vor.u32 %v4394_v5, %v3564_v3  ;;  %v3772_v2 = vld [vmem:[%s6707_s1 + $0x748] sm:$0xf] }
  0xbe   :  { %2263 = vmatpush.bf16.msrb.mxu0 %v3117_v17  ;;  %v3820_v17 = vld [vmem:[%s6707_s1 + $0x7a8] sm:$0xf]  ;;  %v3693_v23 = vor.u32 %v4426_v10, %v3692_v9  ;;  %v4446_v3 = vld [vmem:[%s6707_s1 + $0x754] sm:$0xf0] }
  0xbf   :  { %2238 = vmatpush.bf16.msrb.mxu1 %v2845_v30  ;;  %v3821_v27 = vor.u32 %v4458_v18, %v3820_v17  ;;  %v3549_v30 = vor.u32 %v4390_v22, %v3548_v19  ;;  %v3500_v5 = vld [vmem:[%s6707_s1 + $0x528] sm:$0xf]  ;;  %v4342_v19 = vld [vmem:[%s6707_s1 + $0x414] sm:$0xf0] }
  0xc0   :  { %2276 = vmatpush.bf16.msrb.mxu2 %v3245_v31  ;;  %v4354_v31 = vld [vmem:[%s6707_s1 + $0x474] sm:$0xf0]  ;;  %v3628_v10 = vld [vmem:[%s6707_s1 + $0x628] sm:$0xf] }
  0xc1   :  { %2251 = vmatpush.bf16.msrb.mxu3 %v2973_v34  ;;  %v3532_v34 = vld [vmem:[%s6707_s1 + $0x568] sm:$0xf]  ;;  %v3405_v40 = vor.u32 %v4354_v31, %v3404_v29  ;;  %v4498_v31 = vld [vmem:[%s6707_s1 + $0x8f4] sm:$0xf0] }
  0xc2   :  { %2264 = vmatpush.bf16.msrb.mxu0 %v3101_v44  ;;  %2239 = vmatmul.bf16.vlgmr.msrb.gmra.mxu1 %v4889_v20  ;;  %v3388_v44 = vld [vmem:[%s6707_s1 + $0x448] sm:$0xf]  ;;  %v2032_v56 = vpop.f32.mrf.mxu0 }
  0xc3   :  { %2283 = vmatpush.bf16.msra.mxu1 %v3469_v35  ;;  %v4386_v35 = vld [vmem:[%s6707_s1 + $0x574] sm:$0xf0]  ;;  %v2033_v57 = vadd.f32 %v2032_v56, %v5826_v54  ;;  %v2045_v52 = vpop.f32.mrf.mxu1  ;;  %v3389_v60 = vor.u32 %v4350_v47, %v3388_v44  ;;  %v5941_v54 = vld [vmem:[%s6707_s1 + $0x9c8] sm:$0x11]  ;;  %v3086_v56 = vld [vmem:[%s6707_s1 + $0x1f8] sm:$0xf0] }
  0xc4   :  { %2277 = vmatpush.bf16.msrb.mxu2 %v3229_v55  ;;  %2252 = vmatmul.bf16.vlgmr.msrb.gmra.mxu3 %v4892_v21  ;;  %v3533_v46 = vor.u32 %v4386_v35, %v3532_v34  ;;  %v3661_v55 = vor.u32 %v4418_v38, %v3660_v37  ;;  %v3356_v18 = vld [vmem:[%s6707_s1 + $0x408] sm:$0xf]  ;;  %v4406_v35 = vld [vmem:[%s6707_s1 + $0x614] sm:$0xf0]  ;;  %v3757_v38 = vor.u32 %v4442_v25, %v3756_v24  ;;  %v3054_v24 = vld [vmem:[%s6707_s1 + $0x1b8] sm:$0xf0] }
  0xc5   :  { %2296 = vmatpush.bf16.msra.mxu3 %v3597_v41  ;;  %2265 = vmatmul.bf16.vlgmr.msrb.gmra.mxu0 %v4857_v4  ;;  %v3805_v41 = vor.u32 %v4454_v33, %v3804_v32  ;;  %v2046_v0 = vadd.f32 %v2045_v52, %v2033_v57  ;;  %v3612_v34 = vld [vmem:[%s6707_s1 + $0x608] sm:$0xf]  ;;  %v3357_v37 = vor.u32 %v4342_v19, %v3356_v18 }
  0xc6   :  { %2309 = vmatpush.bf16.msra.mxu0 %v3725_v53  ;;  %v4382_v53 = vld [vmem:[%s6707_s1 + $0x554] sm:$0xf0]  ;;  %v3740_v47 = vld [vmem:[%s6707_s1 + $0x708] sm:$0xf] }
  0xc7   :  { %2284 = vmatpush.bf16.msra.mxu1 %v3453_v58  ;;  %2278 = vmatmul.bf16.vlgmr.msrb.gmra.mxu2 %v4862_v6  ;;  %v3644_v58 = vld [vmem:[%s6707_s1 + $0x648] sm:$0xf]  ;;  %v3517_v63 = vor.u32 %v4382_v53, %v3516_v51  ;;  %v3613_v51 = vor.u32 %v4406_v35, %v3612_v34  ;;  %v4494_v53 = vld [vmem:[%s6707_s1 + $0x8d4] sm:$0xf0] }
  0xc8   :  { %2322 = vmatpush.bf16.msra.mxu2 %v3853_v59  ;;  %v4414_v59 = vld [vmem:[%s6707_s1 + $0x654] sm:$0xf0]  ;;  %v4076_v52 = vld [vmem:[%s6707_s1 + $0x9a8] sm:$0xf] }
  0xc9   :  { %2297 = vmatpush.bf16.msra.mxu3 %v3581_v62  ;;  %v3372_v62 = vld [vmem:[%s6707_s1 + $0x428] sm:$0xf]  ;;  %v3645_v8 = vor.u32 %v4414_v59, %v3644_v58  ;;  %v4522_v58 = vld [vmem:[%s6707_s1 + $0x9b4] sm:$0xf0] }
  0xca   :  { %2310 = vmatpush.bf16.msra.mxu0 %v3709_v7  ;;  %v4378_v7 = vld [vmem:[%s6707_s1 + $0x534] sm:$0xf0]  ;;  %v2058_v9 = vpop.f32.mrf.mxu2  ;;  %v3373_v13 = vor.u32 %v4346_v1, %v3372_v62  ;;  %v2034_v32 = vpop.f32.mrf.mxu0  ;;  %v4236_v62 = vld [vmem:[%s6707_s1 + $0xcc] sm:$0xf]  ;;  %v3965_v1 = vor.u32 %v4494_v53, %v3964_v49  ;;  %v3932_v18 = vld [vmem:[%s6707_s1 + $0x888] sm:$0xf] }
  0xcb   :  { %2285 = vmatpush.bf16.msra.mxu1 %v3437_v11  ;;  %v4410_v11 = vld [vmem:[%s6707_s1 + $0x634] sm:$0xf0]  ;;  %v2059_v16 = vadd.f32 %v2058_v9, %v2046_v0  ;;  %v2071_v17 = vpop.f32.mrf.mxu3  ;;  %v3501_v22 = vor.u32 %v4378_v7, %v3500_v5  ;;  %v4077_v5 = vor.u32 %v4522_v58, %v4076_v52  ;;  %v3070_v9 = vld [vmem:[%s6707_s1 + $0x1d8] sm:$0xf0]  ;;  %v4044_v25 = vld [vmem:[%s6707_s1 + $0x968] sm:$0xf] }
  0xcc   :  { %2323 = vmatpush.bf16.msra.mxu2 %v3837_v12  ;;  %v1324_v12 = vunpack.c.l.b16 %v5941_v54  ;;  %v3629_v29 = vor.u32 %v4410_v11, %v3628_v10  ;;  %v4490_v7 = vld [vmem:[%s6707_s1 + $0x8b4] sm:$0xf0]  ;;  %v4060_v10 = vld [vmem:[%s6707_s1 + $0x988] sm:$0xf]  ;;  %v3022_v52 = vld [vmem:[%s6707_s1 + $0x178] sm:$0xf0] }
  0xcd   :  { %2298 = vmatpush.bf16.msra.mxu3 %v3565_v15  ;;  %v3773_v15 = vor.u32 %v4446_v3, %v3772_v2  ;;  %v3948_v3 = vld [vmem:[%s6707_s1 + $0x8a8] sm:$0xf]  ;;  %v4518_v11 = vld [vmem:[%s6707_s1 + $0x994] sm:$0xf0] }
  0xce   :  { %2311 = vmatpush.bf16.msra.mxu0 %v3693_v23  ;;  %v3484_v23 = vld [vmem:[%s6707_s1 + $0x508] sm:$0xf]  ;;  %v1640_v33 = vpack.c.b16 %v1324_v12, %v1324_v12  ;;  %v4061_v19 = vor.u32 %v4518_v11, %v4060_v10  ;;  %v343_v10 = vperm.slane %v5727_v50, 1  ;;  %v4216_v50 = vld [vmem:[%s6707_s1 + $0x2c] sm:$0xf] }
  0xcf   :  { %2286 = vmatpush.bf16.msra.mxu1 %v3421_v26  ;;  %v5980_v26 = vadd.f32 %v2071_v17, %v2059_v16  ;;  %v3949_v16 = vor.u32 %v4490_v7, %v3948_v3  ;;  %v3916_v34 = vld [vmem:[%s6707_s1 + $0x868] sm:$0xf] }
  0xd0   :  { %2324 = vmatpush.bf16.msra.mxu2 %v3821_v27  ;;  %v4374_v27 = vld [vmem:[%s6707_s1 + $0x514] sm:$0xf0]  ;;  %v1966_v57 = vsel %vm1958_vm0, %v1640_v33, 0  ;;  %v3900_v53 = vld [vmem:[%s6707_s1 + $0x848] sm:$0xf] }
  0xd1   :  { %2299 = vmatpush.bf16.msra.mxu3 %v3549_v30  ;;  %v3980_v30 = vld [vmem:[%s6707_s1 + $0x8e8] sm:$0xf]  ;;  %v3485_v44 = vor.u32 %v4374_v27, %v3484_v23  ;;  %v4264_v23 = vld [vmem:[%s6707_s1 + $0x1ac] sm:$0xf]  ;;  %v4514_v27 = vld [vmem:[%s6707_s1 + $0x974] sm:$0xf0] }
  0xd2   :  { %2312 = vmatpush.bf16.msra.mxu0 %v3677_v36  ;;  %v2047_v36 = vpop.f32.mrf.mxu1  ;;  %v3057_v33 = vor.u32 %v4264_v23, %v3054_v24  ;;  %v4045_v35 = vor.u32 %v4514_v27, %v4044_v25  ;;  %v3884_v3 = vld [vmem:[%s6707_s1 + $0x828] sm:$0xf]  ;;  %v4470_v27 = vld [vmem:[%s6707_s1 + $0x814] sm:$0xf0] }
  0xd3   :  { %2287 = vmatpush.bf16.msra.mxu1 %v3405_v40  ;;  %v4240_v40 = vld [vmem:[%s6707_s1 + $0xec] sm:$0xf]  ;;  %v2073_v0 = vpop.f32.mrf.mxu3  ;;  %v4482_v36 = vld [vmem:[%s6707_s1 + $0x874] sm:$0xf0]  ;;  %v3996_v11 = vld [vmem:[%s6707_s1 + $0x908] sm:$0xf] }
  0xd4   :  { %2325 = vmatpush.bf16.msra.mxu2 %v3805_v41  ;;  %v2958_v41 = vld [vmem:[%s6707_s1 + $0xf8] sm:$0xf0]  ;;  %v3917_v49 = vor.u32 %v4482_v36, %v3916_v34  ;;  %v3868_v23 = vld [vmem:[%s6707_s1 + $0x808] sm:$0xf]  ;;  %v4336_v36 = vld [vmem:[%s6707_s1 + $0x3ec] sm:$0xf] }
  0xd5   :  { %2300 = vmatpush.bf16.msra.mxu3 %v3533_v46  ;;  %v3981_v46 = vor.u32 %v4498_v31, %v3980_v30  ;;  %v2961_v59 = vor.u32 %v4240_v40, %v2958_v41  ;;  %v4228_v30 = vld [vmem:[%s6707_s1 + $0x8c] sm:$0xf]  ;;  %v2910_v31 = vld [vmem:[%s6707_s1 + $0x98] sm:$0xf0]  ;;  %v4028_v40 = vld [vmem:[%s6707_s1 + $0x948] sm:$0xf] }
  0xd6   :  { %2313 = vmatpush.bf16.msra.mxu0 %v3661_v55  ;;  %v4272_v55 = vld [vmem:[%s6707_s1 + $0x1ec] sm:$0xf]  ;;  %v4510_v41 = vld [vmem:[%s6707_s1 + $0x954] sm:$0xf0]  ;;  %v2878_v0 = vld [vmem:[%s6707_s1 + $0x58] sm:$0xf0] }
  0xd7   :  { %2288 = vmatpush.bf16.msra.mxu1 %v3389_v60  ;;  %v2060_v60 = vpop.f32.mrf.mxu2  ;;  %v3089_v2 = vor.u32 %v4272_v55, %v3086_v56  ;;  %v4029_v55 = vor.u32 %v4510_v41, %v4028_v40  ;;  %v4478_v56 = vld [vmem:[%s6707_s1 + $0x854] sm:$0xf0]  ;;  %v3198_v40 = vld [vmem:[%s6707_s1 + $0x2d8] sm:$0xf0]  ;;  %v4212_v41 = vld [vmem:[%s6707_s1 + $0xc] sm:$0xf] }
  0xd8   :  { %2326 = vmatpush.bf16.msra.mxu2 %v3789_v61  ;;  %v3741_v61 = vor.u32 %v4438_v48, %v3740_v47  ;;  %v4224_v47 = vld [vmem:[%s6707_s1 + $0x6c] sm:$0xf]  ;;  %v2894_v48 = vld [vmem:[%s6707_s1 + $0x78] sm:$0xf0]  ;;  %v4506_v60 = vld [vmem:[%s6707_s1 + $0x934] sm:$0xf0] }
  0xd9   :  { %2301 = vmatpush.bf16.msra.mxu3 %v3517_v63  ;;  %v2942_v63 = vld [vmem:[%s6707_s1 + $0xd8] sm:$0xf0] }
  0xda   :  { %2314 = vmatpush.bf16.msra.mxu0 %v3645_v8  ;;  %v4268_v8 = vld [vmem:[%s6707_s1 + $0x1cc] sm:$0xf]  ;;  %v2945_v12 = vor.u32 %v4236_v62, %v2942_v63 }
  0xdb   :  { %2289 = vmatpush.bf16.msra.mxu1 %v3373_v13  ;;  %v4232_v13 = vld [vmem:[%s6707_s1 + $0xac] sm:$0xf]  ;;  %v3073_v17 = vor.u32 %v4268_v8, %v3070_v9  ;;  %v3006_v9 = vld [vmem:[%s6707_s1 + $0x158] sm:$0xf0] }
  0xdc   :  { %2327 = vmatpush.bf16.msra.mxu2 %v3773_v15  ;;  %v2926_v15 = vld [vmem:[%s6707_s1 + $0xb8] sm:$0xf0]  ;;  %v4220_v63 = vld [vmem:[%s6707_s1 + $0x4c] sm:$0xf] }
  0xdd   :  { %2302 = vmatpush.bf16.msra.mxu3 %v3501_v22  ;;  %v4486_v22 = vld [vmem:[%s6707_s1 + $0x894] sm:$0xf0]  ;;  %v4252_v8 = vld [vmem:[%s6707_s1 + $0x14c] sm:$0xf] }
  0xde   :  { %2315 = vmatpush.bf16.msra.mxu0 %v3629_v29  ;;  %v2929_v29 = vor.u32 %v4232_v13, %v2926_v15  ;;  %v3933_v32 = vor.u32 %v4486_v22, %v3932_v18  ;;  %v2881_v13 = vor.u32 %v4220_v63, %v2878_v0  ;;  %v4304_v15 = vld [vmem:[%s6707_s1 + $0x2ec] sm:$0xf]  ;;  %v2862_v18 = vld [vmem:[%s6707_s1 + $0x38] sm:$0xf0]  ;;  %v3009_v22 = vor.u32 %v4252_v8, %v3006_v9 }
  0xdf   :  { %2290 = vmatpush.bf16.msra.mxu1 %v3357_v37  ;;  %v4260_v37 = vld [vmem:[%s6707_s1 + $0x18c] sm:$0xf]  ;;  %v2865_v34 = vor.u32 %v4216_v50, %v2862_v18  ;;  %v3598_v0 = vld [vmem:[%s6707_s1 + $0x5f8] sm:$0xf0] }
  0xe0   :  { %2328 = vmatpush.bf16.msra.mxu2 %v3757_v38  ;;  %v3038_v38 = vld [vmem:[%s6707_s1 + $0x198] sm:$0xf0]  ;;  %v4400_v63 = vld [vmem:[%s6707_s1 + $0x5ec] sm:$0xf] }
  0xe1   :  { %2303 = vmatpush.bf16.msra.mxu3 %v3485_v44  ;;  %v2913_v44 = vor.u32 %v4228_v30, %v2910_v31  ;;  %v2990_v30 = vld [vmem:[%s6707_s1 + $0x138] sm:$0xf0]  ;;  %v4360_v18 = vld [vmem:[%s6707_s1 + $0x4ac] sm:$0xf] }
  0xe2   :  { %2316 = vmatpush.bf16.msra.mxu0 %v3613_v51  ;;  %2291 = vmatmul.bf16.vlgmr.msra.gmra.mxu1 %v5049_v42  ;;  %v3041_v51 = vor.u32 %v4260_v37, %v3038_v38  ;;  %v2084_v58 = vpop.f32.mrf.mxu0  ;;  %v3342_v37 = vld [vmem:[%s6707_s1 + $0x3f8] sm:$0xf0] }
  0xe3   :  { %2335 = vmatpush.bf16.msrb.mxu1 %v3981_v46  ;;  %v2097_v46 = vpop.f32.mrf.mxu1  ;;  %v2085_v62 = vadd.f32 %v2084_v58, %v5980_v26  ;;  %v4474_v26 = vld [vmem:[%s6707_s1 + $0x834] sm:$0xf0]  ;;  %v4296_v58 = vld [vmem:[%s6707_s1 + $0x2ac] sm:$0xf]  ;;  %v3582_v50 = vld [vmem:[%s6707_s1 + $0x5d8] sm:$0xf0] }
  0xe4   :  { %2329 = vmatpush.bf16.msra.mxu2 %v3741_v61  ;;  %2304 = vmatmul.bf16.vlgmr.msra.gmra.mxu3 %v5053_v45  ;;  %v2897_v61 = vor.u32 %v4224_v47, %v2894_v48  ;;  %v3869_v47 = vor.u32 %v4470_v27, %v3868_v23  ;;  %v4368_v48 = vld [vmem:[%s6707_s1 + $0x4ec] sm:$0xf] }
  0xe5   :  { %2349 = vmatpush.bf16.msrb.mxu3 %v1966_v57  ;;  %2317 = vmatmul.bf16.vlgmr.msra.gmra.mxu0 %v5041_v39  ;;  %v4256_v57 = vld [vmem:[%s6707_s1 + $0x16c] sm:$0xf] }
  0xe6   :  { %2361 = vmatpush.bf16.msrb.mxu0 %v2961_v59  ;;  %v4012_v59 = vld [vmem:[%s6707_s1 + $0x928] sm:$0xf]  ;;  %v4324_v27 = vld [vmem:[%s6707_s1 + $0x38c] sm:$0xf] }
  0xe7   :  { %2336 = vmatpush.bf16.msrb.mxu1 %v3965_v1  ;;  %2330 = vmatmul.bf16.vlgmr.msra.gmra.mxu2 %v5051_v43  ;;  %v3901_v1 = vor.u32 %v4478_v56, %v3900_v53  ;;  %v4013_v7 = vor.u32 %v4506_v60, %v4012_v59  ;;  %v3345_v53 = vor.u32 %v4336_v36, %v3342_v37  ;;  %v2974_v56 = vld [vmem:[%s6707_s1 + $0x118] sm:$0xf0]  ;;  %v4332_v59 = vld [vmem:[%s6707_s1 + $0x3cc] sm:$0xf] }
  0xe8   :  { %2374 = vmatpush.bf16.msrb.mxu2 %v3089_v2  ;;  %v3025_v2 = vor.u32 %v4256_v57, %v3022_v52  ;;  %v3326_v60 = vld [vmem:[%s6707_s1 + $0x3d8] sm:$0xf0] }
  0xe9   :  { %2350 = vmatpush.bf16.msrb.mxu3 %v4077_v5  ;;  %v6141_v5 = vadd.f32 %v2097_v46, %v2085_v62 }
  0xea   :  { %2362 = vmatpush.bf16.msrb.mxu0 %v2945_v12  ;;  %v4502_v12 = vld [vmem:[%s6707_s1 + $0x914] sm:$0xf0]  ;;  %v2110_v24 = vpop.f32.mrf.mxu2  ;;  %v2086_v38 = vpop.f32.mrf.mxu0 }
  0xeb   :  { %2337 = vmatpush.bf16.msrb.mxu1 %v3949_v16  ;;  %v2099_v16 = vpop.f32.mrf.mxu1  ;;  %v3997_v25 = vor.u32 %v4502_v12, %v3996_v11  ;;  %v2111_v31 = vadd.f32 %v2110_v24, %v343_v10  ;;  %v3601_v10 = vor.u32 %v4400_v63, %v3598_v0  ;;  %v4292_v11 = vld [vmem:[%s6707_s1 + $0x28c] sm:$0xf]  ;;  %v3534_v63 = vld [vmem:[%s6707_s1 + $0x578] sm:$0xf0] }
  0xec   :  { %2375 = vmatpush.bf16.msrb.mxu2 %v3073_v17  ;;  %v3214_v17 = vld [vmem:[%s6707_s1 + $0x2f8] sm:$0xf0]  ;;  %v4328_v12 = vld [vmem:[%s6707_s1 + $0x3ac] sm:$0xf] }
  0xed   :  { %2351 = vmatpush.bf16.msrb.mxu3 %v4061_v19  ;;  %v3885_v19 = vor.u32 %v4474_v26, %v3884_v3 }
  0xee   :  { %2363 = vmatpush.bf16.msrb.mxu0 %v2929_v29  ;;  %v4248_v29 = vld [vmem:[%s6707_s1 + $0x12c] sm:$0xf] }
  0xef   :  { %2338 = vmatpush.bf16.msrb.mxu1 %v3933_v32  ;;  %v2123_v32 = vpop.f32.mrf.mxu3 }
  0xf0   :  { %2376 = vmatpush.bf16.msrb.mxu2 %v3057_v33  ;;  %v3217_v33 = vor.u32 %v4304_v15, %v3214_v17  ;;  %v6198_v46 = vadd.f32 %v2123_v32, %v2111_v31  ;;  %v3166_v15 = vld [vmem:[%s6707_s1 + $0x298] sm:$0xf0]  ;;  %v4396_v17 = vld [vmem:[%s6707_s1 + $0x5cc] sm:$0xf] }
  0xf1   :  { %2352 = vmatpush.bf16.msrb.mxu3 %v4045_v35  ;;  %v4300_v35 = vld [vmem:[%s6707_s1 + $0x2cc] sm:$0xf]  ;;  %v3169_v23 = vor.u32 %v4292_v11, %v3166_v15  ;;  %v3585_v24 = vor.u32 %v4396_v17, %v3582_v50  ;;  %v3246_v11 = vld [vmem:[%s6707_s1 + $0x338] sm:$0xf0] }
  0xf2   :  { %2364 = vmatpush.bf16.msrb.mxu0 %v2913_v44  ;;  %v2846_v44 = vld [vmem:[%s6707_s1 + $0x18] sm:$0xf0]  ;;  %v3201_v57 = vor.u32 %v4300_v35, %v3198_v40  ;;  %v2112_v3 = vpop.f32.mrf.mxu2  ;;  %v4392_v32 = vld [vmem:[%s6707_s1 + $0x5ac] sm:$0xf] }
  0xf3   :  { %2339 = vmatpush.bf16.msrb.mxu1 %v3917_v49  ;;  %v3470_v49 = vld [vmem:[%s6707_s1 + $0x4f8] sm:$0xf0]  ;;  %v2849_v52 = vor.u32 %v4212_v41, %v2846_v44  ;;  %v4284_v40 = vld [vmem:[%s6707_s1 + $0x24c] sm:$0xf] }
  0xf4   :  { %2377 = vmatpush.bf16.msrb.mxu2 %v3041_v51  ;;  %v2993_v51 = vor.u32 %v4248_v29, %v2990_v30  ;;  %v3473_v62 = vor.u32 %v4368_v48, %v3470_v49  ;;  %v3294_v29 = vld [vmem:[%s6707_s1 + $0x398] sm:$0xf0]  ;;  %v4320_v41 = vld [vmem:[%s6707_s1 + $0x36c] sm:$0xf] }
  0xf5   :  { %2353 = vmatpush.bf16.msrb.mxu3 %v4029_v55  ;;  %v4244_v55 = vld [vmem:[%s6707_s1 + $0x10c] sm:$0xf]  ;;  %v3150_v30 = vld [vmem:[%s6707_s1 + $0x278] sm:$0xf0]  ;;  %v3297_v36 = vor.u32 %v4324_v27, %v3294_v29 }
  0xf6   :  { %2365 = vmatpush.bf16.msrb.mxu0 %v2897_v61  ;;  %v3182_v61 = vld [vmem:[%s6707_s1 + $0x2b8] sm:$0xf0]  ;;  %v2977_v26 = vor.u32 %v4244_v55, %v2974_v56 }
  0xf7   :  { %2340 = vmatpush.bf16.msrb.mxu1 %v3901_v1  ;;  %v4364_v1 = vld [vmem:[%s6707_s1 + $0x4cc] sm:$0xf]  ;;  %v2125_v8 = vpop.f32.mrf.mxu3  ;;  %v3185_v9 = vor.u32 %v4296_v58, %v3182_v61  ;;  %v3422_v35 = vld [vmem:[%s6707_s1 + $0x498] sm:$0xf0] }
  0xf8   :  { %2378 = vmatpush.bf16.msrb.mxu2 %v3025_v2  ;;  %v3454_v2 = vld [vmem:[%s6707_s1 + $0x4d8] sm:$0xf0]  ;;  %v4316_v58 = vld [vmem:[%s6707_s1 + $0x34c] sm:$0xf] }
  0xf9   :  { %2354 = vmatpush.bf16.msrb.mxu3 %v4013_v7  ;;  %v3329_v7 = vor.u32 %v4332_v59, %v3326_v60  ;;  %v3457_v16 = vor.u32 %v4364_v1, %v3454_v2  ;;  %v3550_v48 = vld [vmem:[%s6707_s1 + $0x598] sm:$0xf0]  ;;  %v4348_v1 = vld [vmem:[%s6707_s1 + $0x44c] sm:$0xf] }
  0xfa   :  { %2366 = vmatpush.bf16.msrb.mxu0 %v2881_v13  ;;  %v3310_v13 = vld [vmem:[%s6707_s1 + $0x3b8] sm:$0xf0] }
  0xfb   :  { %2341 = vmatpush.bf16.msrb.mxu1 %v3885_v19  ;;  %v3438_v19 = vld [vmem:[%s6707_s1 + $0x4b8] sm:$0xf0] }
  0xfc   :  { %2379 = vmatpush.bf16.msrb.mxu2 %v3009_v22  ;;  %v3313_v22 = vor.u32 %v4328_v12, %v3310_v13  ;;  %v3441_v31 = vor.u32 %v4360_v18, %v3438_v19  ;;  %v3262_v59 = vld [vmem:[%s6707_s1 + $0x358] sm:$0xf0]  ;;  %v4380_v13 = vld [vmem:[%s6707_s1 + $0x54c] sm:$0xf] }
  0xfd   :  { %2355 = vmatpush.bf16.msrb.mxu3 %v3997_v25  ;;  %v4288_v25 = vld [vmem:[%s6707_s1 + $0x26c] sm:$0xf]  ;;  %v3118_v60 = vld [vmem:[%s6707_s1 + $0x238] sm:$0xf0]  ;;  %v3265_v3 = vor.u32 %v4316_v58, %v3262_v59 }
  0xfe   :  { %2367 = vmatpush.bf16.msrb.mxu0 %v2865_v34  ;;  %v4356_v34 = vld [vmem:[%s6707_s1 + $0x48c] sm:$0xf]  ;;  %v3153_v37 = vor.u32 %v4288_v25, %v3150_v30  ;;  %v3390_v2 = vld [vmem:[%s6707_s1 + $0x458] sm:$0xf0] }
  0xff   :  { %2342 = vmatpush.bf16.msrb.mxu1 %v3869_v47  ;;  %v3425_v44 = vor.u32 %v4356_v34, %v3422_v35  ;;  %v4388_v47 = vld [vmem:[%s6707_s1 + $0x58c] sm:$0xf]  ;;  %v6307_v49 = vpop.f32.mrf.mxu1  ;;  %v3393_v12 = vor.u32 %v4348_v1, %v3390_v2  ;;  %v3518_v15 = vld [vmem:[%s6707_s1 + $0x558] sm:$0xf0] }
 0x100   :  { %4084 = vmatmul.msk.bf16.vlgmr.msrb.gmra.mxu3 %vm1954_vm1, %v5230_v14  ;;  %2380 = vmatpush.bf16.msrb.mxu2 %v2993_v51  ;;  %v4352_v51 = vld [vmem:[%s6707_s1 + $0x46c] sm:$0xf]  ;;  %v3726_v50 = vld [vmem:[%s6707_s1 + $0x6f8] sm:$0xf0]  ;;  %v3521_v25 = vor.u32 %v4380_v13, %v3518_v15 }
 0x101   :  { %2387 = vmatpush.bf16.msra.mxu3 %v3217_v33  ;;  %v3566_v33 = vld [vmem:[%s6707_s1 + $0x5b8] sm:$0xf0]  ;;  %v4344_v18 = vld [vmem:[%s6707_s1 + $0x42c] sm:$0xf] }
 0x102   :  { %2368 = vmatpush.bf16.msrb.mxu0 %v2849_v52  ;;  %2343 = vmatmul.bf16.vlgmr.msrb.gmra.mxu1 %v5247_v28  ;;  %v3569_v38 = vor.u32 %v4392_v32, %v3566_v33  ;;  %v4280_v52 = vld [vmem:[%s6707_s1 + $0x22c] sm:$0xf]  ;;  %v6333_v0 = vpop.f32.mrf.mxu0  ;;  %v3374_v19 = vld [vmem:[%s6707_s1 + $0x438] sm:$0xf0]  ;;  %v1325_v32 = vunpack.c.h.b16 %v5941_v54 }
 0x103   :  { %2400 = vmatpush.bf16.msra.mxu1 %v3345_v53  ;;  %v3406_v53 = vld [vmem:[%s6707_s1 + $0x478] sm:$0xf0]  ;;  %v4376_v30 = vld [vmem:[%s6707_s1 + $0x52c] sm:$0xf]  ;;  %v3377_v35 = vor.u32 %v4344_v18, %v3374_v19 }
 0x104   :  { %2381 = vmatpush.bf16.msrb.mxu2 %v2977_v26  ;;  %v3409_v61 = vor.u32 %v4352_v51, %v3406_v53  ;;  %v4276_v26 = vld [vmem:[%s6707_s1 + $0x20c] sm:$0xf]  ;;  %v3230_v29 = vld [vmem:[%s6707_s1 + $0x318] sm:$0xf0] }
 0x105   :  { %2388 = vmatpush.bf16.msra.mxu3 %v3201_v57  ;;  %2369 = vmatmul.bf16.vlgmr.msrb.gmra.mxu0 %v4889_v20  ;;  %v3134_v20 = vld [vmem:[%s6707_s1 + $0x258] sm:$0xf0]  ;;  %v3553_v57 = vor.u32 %v4388_v47, %v3550_v48  ;;  %v4372_v53 = vld [vmem:[%s6707_s1 + $0x50c] sm:$0xf] }
 0x106   :  { %2413 = vmatpush.bf16.msra.mxu0 %v3473_v62  ;;  %v3137_v56 = vor.u32 %v4284_v40, %v3134_v20  ;;  %v4384_v62 = vld [vmem:[%s6707_s1 + $0x56c] sm:$0xf]  ;;  %v3710_v54 = vld [vmem:[%s6707_s1 + $0x6d8] sm:$0xf0] }
 0x107   :  { %2401 = vmatpush.bf16.msra.mxu1 %v3329_v7  ;;  %2382 = vmatmul.bf16.vlgmr.msrb.gmra.mxu2 %v4892_v21  ;;  %v3278_v21 = vld [vmem:[%s6707_s1 + $0x378] sm:$0xf0]  ;;  %v3121_v7 = vor.u32 %v4280_v52, %v3118_v60  ;;  %v3537_v8 = vor.u32 %v4384_v62, %v3534_v63  ;;  %v2138_v17 = vpop.f32.mrf.mxu1  ;;  %v4460_v58 = vld [vmem:[%s6707_s1 + $0x7cc] sm:$0xf] }
 0x108   :  { %2426 = vmatpush.bf16.msra.mxu2 %v3601_v10  ;;  %v3281_v55 = vor.u32 %v4320_v41, %v3278_v21  ;;  %v4312_v10 = vld [vmem:[%s6707_s1 + $0x32c] sm:$0xf]  ;;  %v3358_v21 = vld [vmem:[%s6707_s1 + $0x418] sm:$0xf0] }
 0x109   :  { %2389 = vmatpush.bf16.msra.mxu3 %v3185_v9  ;;  %v3102_v9 = vld [vmem:[%s6707_s1 + $0x218] sm:$0xf0]  ;;  %v4340_v41 = vld [vmem:[%s6707_s1 + $0x40c] sm:$0xf] }
 0x10a   :  { %2414 = vmatpush.bf16.msra.mxu0 %v3457_v16  ;;  %v4432_v16 = vld [vmem:[%s6707_s1 + $0x6ec] sm:$0xf]  ;;  %v6374_v27 = vpop.f32.mrf.mxu2  ;;  %v2151_v40 = vpop.f32.mrf.mxu0  ;;  %v3982_v47 = vld [vmem:[%s6707_s1 + $0x8f8] sm:$0xf0] }
 0x10b   :  { %2402 = vmatpush.bf16.msra.mxu1 %v3313_v22  ;;  %v3249_v22 = vor.u32 %v4312_v10, %v3246_v11  ;;  %v3729_v33 = vor.u32 %v4432_v16, %v3726_v50  ;;  %v6386_v34 = vpop.f32.mrf.mxu3  ;;  %v3486_v52 = vld [vmem:[%s6707_s1 + $0x518] sm:$0xf0]  ;;  %v4424_v60 = vld [vmem:[%s6707_s1 + $0x6ac] sm:$0xf] }
 0x10c   :  { %2427 = vmatpush.bf16.msra.mxu2 %v3585_v24  ;;  %v3105_v24 = vor.u32 %v4276_v26, %v3102_v9  ;;  %v3838_v59 = vld [vmem:[%s6707_s1 + $0x7d8] sm:$0xf0]  ;;  %v4492_v63 = vld [vmem:[%s6707_s1 + $0x8cc] sm:$0xf]  ;;  %v3489_v2 = vor.u32 %v4372_v53, %v3486_v52 }
 0x10d   :  { %2390 = vmatpush.bf16.msra.mxu3 %v3169_v23  ;;  %v4308_v23 = vld [vmem:[%s6707_s1 + $0x30c] sm:$0xf]  ;;  %v3966_v1 = vld [vmem:[%s6707_s1 + $0x8d8] sm:$0xf0] }
 0x10e   :  { %2415 = vmatpush.bf16.msra.mxu0 %v3441_v31  ;;  %v3502_v31 = vld [vmem:[%s6707_s1 + $0x538] sm:$0xf0]  ;;  %v3233_v20 = vor.u32 %v4308_v23, %v3230_v29  ;;  %v4456_v9 = vld [vmem:[%s6707_s1 + $0x7ac] sm:$0xf]  ;;  %v3969_v13 = vor.u32 %v4492_v63, %v3966_v1 }
 0x10f   :  { %2403 = vmatpush.bf16.msra.mxu1 %v3297_v36  ;;  %v4428_v36 = vld [vmem:[%s6707_s1 + $0x6cc] sm:$0xf]  ;;  %v3505_v48 = vor.u32 %v4376_v30, %v3502_v31  ;;  %v3822_v10 = vld [vmem:[%s6707_s1 + $0x7b8] sm:$0xf0] }
 0x110   :  { %2428 = vmatpush.bf16.msra.mxu2 %v3569_v38  ;;  %v3854_v38 = vld [vmem:[%s6707_s1 + $0x7f8] sm:$0xf0]  ;;  %v4520_v15 = vld [vmem:[%s6707_s1 + $0x9ac] sm:$0xf]  ;;  %v3825_v18 = vor.u32 %v4456_v9, %v3822_v10 }
 0x111   :  { %2391 = vmatpush.bf16.msra.mxu3 %v3153_v37  ;;  %v4464_v37 = vld [vmem:[%s6707_s1 + $0x7ec] sm:$0xf]  ;;  %v4078_v16 = vld [vmem:[%s6707_s1 + $0x9b8] sm:$0xf0] }
 0x112   :  { %2416 = vmatpush.bf16.msra.mxu0 %v3425_v44  ;;  %v4496_v44 = vld [vmem:[%s6707_s1 + $0x8ec] sm:$0xf]  ;;  %v3857_v51 = vor.u32 %v4464_v37, %v3854_v38  ;;  %v3950_v50 = vld [vmem:[%s6707_s1 + $0x8b8] sm:$0xf0] }
 0x113   :  { %2404 = vmatpush.bf16.msra.mxu1 %v3281_v55  ;;  %v1641_v55 = vpack.c.b16 %v1325_v32, %v1325_v32  ;;  %v3985_v62 = vor.u32 %v4496_v44, %v3982_v47  ;;  %v2177_v11 = vpop.f32.mrf.mxu3  ;;  %v4488_v17 = vld [vmem:[%s6707_s1 + $0x8ac] sm:$0xf]  ;;  %v4062_v31 = vld [vmem:[%s6707_s1 + $0x998] sm:$0xf0] }
 0x114   :  { %2429 = vmatpush.bf16.msra.mxu2 %v3553_v57  ;;  %v3361_v57 = vor.u32 %v4340_v41, %v3358_v21  ;;  %v4416_v23 = vld [vmem:[%s6707_s1 + $0x66c] sm:$0xf]  ;;  %v3953_v29 = vor.u32 %v4488_v17, %v3950_v50  ;;  %v3790_v38 = vld [vmem:[%s6707_s1 + $0x778] sm:$0xf0] }
 0x115   :  { %2392 = vmatpush.bf16.msra.mxu3 %v3137_v56  ;;  %v3713_v56 = vor.u32 %v4428_v36, %v3710_v54  ;;  %v1969_v26 = vsel %vm1958_vm0, %v1641_v55, 0  ;;  %v4516_v30 = vld [vmem:[%s6707_s1 + $0x98c] sm:$0xf]  ;;  %v3646_v40 = vld [vmem:[%s6707_s1 + $0x658] sm:$0xf0] }
 0x116   :  { %2417 = vmatpush.bf16.msra.mxu0 %v3409_v61  ;;  %v3694_v61 = vld [vmem:[%s6707_s1 + $0x6b8] sm:$0xf0]  ;;  %v4484_v32 = vld [vmem:[%s6707_s1 + $0x88c] sm:$0xf]  ;;  %v4065_v37 = vor.u32 %v4516_v30, %v4062_v31 }
 0x117   :  { %2405 = vmatpush.bf16.msra.mxu1 %v3265_v3  ;;  %v3841_v3 = vor.u32 %v4460_v58, %v3838_v59  ;;  %v4512_v41 = vld [vmem:[%s6707_s1 + $0x96c] sm:$0xf]  ;;  %v4046_v21 = vld [vmem:[%s6707_s1 + $0x978] sm:$0xf0] }
 0x118   :  { %2430 = vmatpush.bf16.msra.mxu2 %v3537_v8  ;;  %v3697_v8 = vor.u32 %v4424_v60, %v3694_v61  ;;  %v4480_v44 = vld [vmem:[%s6707_s1 + $0x86c] sm:$0xf]  ;;  %v3918_v47 = vld [vmem:[%s6707_s1 + $0x878] sm:$0xf0]  ;;  %v4049_v53 = vor.u32 %v4512_v41, %v4046_v21  ;;  %v4527_v21 = vld [vmem:[%s6710_s3 + $0x20] sm:$0xff] }
 0x119   :  { %2393 = vmatpush.bf16.msra.mxu3 %v3121_v7  ;;  %v2164_v7 = vpop.f32.mrf.mxu2  ;;  %v4408_v55 = vld [vmem:[%s6707_s1 + $0x62c] sm:$0xf]  ;;  %v3630_v58 = vld [vmem:[%s6707_s1 + $0x638] sm:$0xf0]  ;;  %v3921_v59 = vor.u32 %v4480_v44, %v3918_v47 }
 0x11a   :  { %2418 = vmatpush.bf16.msra.mxu0 %v3393_v12  ;;  %v3678_v12 = vld [vmem:[%s6707_s1 + $0x698] sm:$0xf0]  ;;  %v4508_v60 = vld [vmem:[%s6707_s1 + $0x94c] sm:$0xf] }
 0x11b   :  { %2406 = vmatpush.bf16.msra.mxu1 %v3249_v22  ;;  %v4081_v22 = vor.u32 %v4520_v15, %v4078_v16  ;;  %v4030_v61 = vld [vmem:[%s6707_s1 + $0x958] sm:$0xf0]  ;;  %v4440_v7 = vld [vmem:[%s6707_s1 + $0x72c] sm:$0xf] }
 0x11c   :  { %2431 = vmatpush.bf16.msra.mxu2 %v3521_v25  ;;  %v3662_v25 = vld [vmem:[%s6707_s1 + $0x678] sm:$0xf0]  ;;  %v4504_v11 = vld [vmem:[%s6707_s1 + $0x92c] sm:$0xf] }
 0x11d   :  { %2394 = vmatpush.bf16.msra.mxu3 %v3105_v24  ;;  %v3806_v24 = vld [vmem:[%s6707_s1 + $0x798] sm:$0xf0]  ;;  %v3665_v36 = vor.u32 %v4416_v23, %v3662_v25  ;;  %v4500_v25 = vld [vmem:[%s6707_s1 + $0x90c] sm:$0xf] }
 0x11e   :  { %2419 = vmatpush.bf16.msra.mxu0 %v3377_v35  ;;  %v3902_v63 = vld [vmem:[%s6707_s1 + $0x858] sm:$0xf0]  ;;  %v4468_v31 = vld [vmem:[%s6707_s1 + $0x80c] sm:$0xf] }
 0x11f   :  { %2407 = vmatpush.bf16.msra.mxu1 %v3233_v20  ;;  %v6507_v20 = vpop.f32.mrf.mxu1  ;;  %v3614_v9 = vld [vmem:[%s6707_s1 + $0x618] sm:$0xf0] }
 0x120   :  { %2395 = vmatmul.bf16.vlgmr.msra.gmra.mxu3 %v4857_v4  ;;  %2432 = vmatpush.bf16.msra.mxu2 %v3505_v48  ;;  %v4420_v4 = vld [vmem:[%s6707_s1 + $0x68c] sm:$0xf]  ;;  %v3886_v15 = vld [vmem:[%s6707_s1 + $0x838] sm:$0xf0] }
 0x121   :  { %2439 = vmatpush.bf16.msrb.mxu3 %v3729_v33  ;;  %v3681_v19 = vor.u32 %v4420_v4, %v3678_v12  ;;  %v3934_v33 = vld [vmem:[%s6707_s1 + $0x898] sm:$0xf0] }
 0x122   :  { %2420 = vmatpush.bf16.msra.mxu0 %v3361_v57  ;;  %2408 = vmatmul.bf16.vlgmr.msra.gmra.mxu1 %v4862_v6  ;;  %v4452_v6 = vld [vmem:[%s6707_s1 + $0x78c] sm:$0xf]  ;;  %v3937_v54 = vor.u32 %v4484_v32, %v3934_v33  ;;  %v3774_v57 = vld [vmem:[%s6707_s1 + $0x758] sm:$0xf0]  ;;  %v6524_v52 = vpop.f32.mrf.mxu0 }
 0x123   :  { %2452 = vmatpush.bf16.msrb.mxu1 %v3857_v51  ;;  %v3809_v35 = vor.u32 %v4452_v6, %v3806_v24  ;;  %v4014_v12 = vld [vmem:[%s6707_s1 + $0x938] sm:$0xf0] }
 0x124   :  { %2433 = vmatpush.bf16.msra.mxu2 %v3489_v2  ;;  %v3633_v2 = vor.u32 %v4408_v55, %v3630_v58  ;;  %v3742_v23 = vld [vmem:[%s6707_s1 + $0x718] sm:$0xf0]  ;;  %v4545_v55 = vld [vmem:[%s6710_s3 + $0xb0] sm:$0xff] }
 0x125   :  { %2440 = vmatpush.bf16.msrb.mxu3 %v3713_v56  ;;  %2421 = vmatmul.bf16.vlgmr.msra.gmra.mxu0 %v5049_v42  ;;  %v4448_v42 = vld [vmem:[%s6707_s1 + $0x76c] sm:$0xf]  ;;  %v4530_v6 = vld [vmem:[%s6710_s3 + $0x38] sm:$0xff] }
 0x126   :  { %2465 = vmatpush.bf16.msrb.mxu0 %v3985_v62  ;;  %v3793_v48 = vor.u32 %v4448_v42, %v3790_v38  ;;  %v4444_v56 = vld [vmem:[%s6707_s1 + $0x74c] sm:$0xf]  ;;  %v3870_v32 = vld [vmem:[%s6707_s1 + $0x818] sm:$0xf0]  ;;  %v2137_v38 = vadd.f32 %v6307_v49, %v6198_v46 }
 0x127   :  { %2453 = vmatpush.bf16.msrb.mxu1 %v3841_v3  ;;  %2434 = vmatmul.bf16.vlgmr.msra.gmra.mxu2 %v5053_v45  ;;  %v4412_v45 = vld [vmem:[%s6707_s1 + $0x64c] sm:$0xf]  ;;  %v3777_v1 = vor.u32 %v4444_v56, %v3774_v57  ;;  %v4033_v3 = vor.u32 %v4508_v60, %v4030_v61  ;;  %v6550_v4 = vpop.f32.mrf.mxu3  ;;  %v2190_v16 = vpop.f32.mrf.mxu1  ;;  %v4534_v47 = vld [vmem:[%s6710_s3 + $0x58] sm:$0xff]  ;;  %v4523_v61 = vld [vmem:[%s6710_s3] sm:$0xff] }
 0x128   :  { %2479 = vmatpush.bf16.msrb.mxu2 %v1969_v26  ;;  %v3649_v51 = vor.u32 %v4412_v45, %v3646_v40  ;;  %v4476_v62 = vld [vmem:[%s6707_s1 + $0x84c] sm:$0xf]  ;;  %v3873_v45 = vor.u32 %v4468_v31, %v3870_v32  ;;  %v4546_v40 = vld [vmem:[%s6710_s3 + $0xb8] sm:$0xff] }
 0x129   :  { %2441 = vmatpush.bf16.msrb.mxu3 %v3697_v8  ;;  %v4404_v26 = vld [vmem:[%s6707_s1 + $0x60c] sm:$0xf]  ;;  %v3758_v8 = vld [vmem:[%s6707_s1 + $0x738] sm:$0xf0]  ;;  %v3905_v10 = vor.u32 %v4476_v62, %v3902_v63  ;;  %v2491_v63 = vmax.f32 %v6141_v5, 0.0 }
 0x12a   :  { %2466 = vmatpush.bf16.msrb.mxu0 %v3969_v13  ;;  %v4472_v13 = vld [vmem:[%s6707_s1 + $0x82c] sm:$0xf]  ;;  %v3761_v17 = vor.u32 %v4440_v7, %v3758_v8  ;;  %v2214_v50 = vpop.f32.mrf.mxu2  ;;  %v2203_v30 = vpop.f32.mrf.mxu0  ;;  %v4542_v5 = vld [vmem:[%s6710_s3 + $0x98] sm:$0xff] }
 0x12b   :  { %2454 = vmatpush.bf16.msrb.mxu1 %v3825_v18  ;;  %v3617_v18 = vor.u32 %v4404_v26, %v3614_v9  ;;  %v3889_v24 = vor.u32 %v4472_v13, %v3886_v15  ;;  %v4528_v46 = vld [vmem:[%s6710_s3 + $0x28] sm:$0xff]  ;;  %v2495_v7 = vpack.c.bf16 %v2491_v63, %v2491_v63 }
 0x12c   :  { %2480 = vmatpush.bf16.msrb.mxu2 %v4081_v22  ;;  %v4436_v22 = vld [vmem:[%s6707_s1 + $0x70c] sm:$0xf] }
 0x12d   :  { %2442 = vmatpush.bf16.msrb.mxu3 %v3681_v19  ;;  %v4017_v19 = vor.u32 %v4504_v11, %v4014_v12  ;;  %v3745_v33 = vor.u32 %v4436_v22, %v3742_v23  ;;  %v4536_v49 = vld [vmem:[%s6710_s3 + $0x68] sm:$0xff]  ;;  %v4559_v11 = vld [vmem:[%s6709_s2] sm:$0xf] }
 0x12e   :  { %2467 = vmatpush.bf16.msrb.mxu0 %v3953_v29  ;;  %v3998_v29 = vld [vmem:[%s6707_s1 + $0x918] sm:$0xf0]  ;;  %v344_v12 = vperm.slane %v4559_v11, 2  ;;  %v4540_v13 = vld [vmem:[%s6710_s3 + $0x88] sm:$0xff] }
 0x12f   :  { %2455 = vmatpush.bf16.msrb.mxu1 %v3809_v35  ;;  %v4001_v35 = vor.u32 %v4500_v25, %v3998_v29  ;;  %v2229_v42 = vpop.f32.mrf.mxu3 }
 0x130   :  { %2481 = vmatpush.bf16.msrb.mxu2 %v4065_v37  ;;  %v4529_v37 = vld [vmem:[%s6710_s3 + $0x30] sm:$0xff] }
 0x131   :  { %2443 = vmatpush.bf16.msrb.mxu3 %v3665_v36  ;;  %v4538_v36 = vld [vmem:[%s6710_s3 + $0x78] sm:$0xff] }
 0x132   :  { %2468 = vmatpush.bf16.msrb.mxu0 %v3937_v54  ;;  %v4537_v54 = vld [vmem:[%s6710_s3 + $0x70] sm:$0xff]  ;;  %v2216_v41 = vpop.f32.mrf.mxu2 }
 0x133   :  { %2456 = vmatpush.bf16.msrb.mxu1 %v3793_v48  ;;  %v4525_v48 = vld [vmem:[%s6710_s3 + $0x10] sm:$0xff] }
 0x134   :  { %2482 = vmatpush.bf16.msrb.mxu2 %v4049_v53 }
 0x135   :  { %2444 = vmatpush.bf16.msrb.mxu3 %v3649_v51 }
 0x136   :  { %2469 = vmatpush.bf16.msrb.mxu0 %v3921_v59  ;;  %v4544_v59 = vld [vmem:[%s6710_s3 + $0xa8] sm:$0xff] }
 0x137   :  { %2457 = vmatpush.bf16.msrb.mxu1 %v3777_v1 }
 0x138   :  { %2483 = vmatpush.bf16.msrb.mxu2 %v4033_v3  ;;  %v4531_v3 = vld [vmem:[%s6710_s3 + $0x40] sm:$0xff] }
 0x139   :  { %2445 = vmatpush.bf16.msrb.mxu3 %v3633_v2  ;;  %v4543_v2 = vld [vmem:[%s6710_s3 + $0xa0] sm:$0xff] }
 0x13a   :  { %2470 = vmatpush.bf16.msrb.mxu0 %v3905_v10  ;;  %v4541_v10 = vld [vmem:[%s6710_s3 + $0x90] sm:$0xff] }
 0x13b   :  { %2458 = vmatpush.bf16.msrb.mxu1 %v3761_v17  ;;  %v4539_v17 = vld [vmem:[%s6710_s3 + $0x80] sm:$0xff] }
 0x13c   :  { %2484 = vmatpush.bf16.msrb.mxu2 %v4017_v19 }
 0x13d   :  { %2446 = vmatpush.bf16.msrb.mxu3 %v3617_v18 }
 0x13e   :  { %2471 = vmatpush.bf16.msrb.mxu0 %v3889_v24 }
 0x13f   :  { %2459 = vmatpush.bf16.msrb.mxu1 %v3745_v33  ;;  %v2240_v44 = vpop.f32.mrf.mxu1 }
 0x140   :  { %2447 = vmatmul.bf16.vlgmr.msrb.gmra.mxu3 %v5041_v39  ;;  %2485 = vmatpush.bf16.msrb.mxu2 %v4001_v35  ;;  %v2150_v39 = vadd.f32 %v6333_v0, %v2137_v38  ;;  %v4535_v0 = vld [vmem:[%s6710_s3 + $0x60] sm:$0xff]  ;;  %v2241_v15 = vadd.f32 %v2240_v44, %v344_v12  ;;  %v4552_v44 = vld [vmem:[%s6710_s3 + $0xe8] sm:$0xff] }
 0x141   :  { %2763 = vmatpush.bf16.msra.mxu3 %v4530_v6 }
 0x142   :  { %2472 = vmatpush.bf16.msrb.mxu0 %v3873_v45  ;;  %2460 = vmatmul.bf16.vlgmr.msrb.gmra.mxu1 %v5051_v43  ;;  %v2163_v43 = vadd.f32 %v6374_v27, %v2150_v39  ;;  %v2266_v51 = vpop.f32.mrf.mxu0 }
 0x143   :  { %2776 = vmatpush.bf16.msra.mxu1 %v4538_v36  ;;  %4085 = vmatmul.msk.bf16.vlgmr.msrb.gmra.mxu2 %vm1954_vm1, %v5230_v14  ;;  %v4526_v14 = vld [vmem:[%s6710_s3 + $0x18] sm:$0xff] }
 0x144   :  { %2789 = vmatpush.bf16.msra.mxu2 %v4546_v40  ;;  %v2561_v40 = vld [vmem:[%s6710_s3 + $0xf8] sm:$0x3] }
 0x145   :  { %2764 = vmatpush.bf16.msra.mxu3 %v4529_v37  ;;  %2473 = vmatmul.bf16.vlgmr.msrb.gmra.mxu0 %v5247_v28  ;;  %v2176_v28 = vadd.f32 %v6386_v34, %v2163_v43  ;;  %v4533_v34 = vld [vmem:[%s6710_s3 + $0x50] sm:$0xff]  ;;  %v2691_v41 = vunpack.c.l.b16 %v2561_v40 }
 0x147   :  { %2777 = vmatpush.bf16.msra.mxu1 %v4537_v54  ;;  %v2189_v27 = vadd.f32 %v6507_v20, %v2176_v28  ;;  %v4524_v20 = vld [vmem:[%s6710_s3 + $0x8] sm:$0xff]  ;;  %v2253_v57 = vpop.f32.mrf.mxu3  ;;  %v2242_v58 = vpop.f32.mrf.mxu1 }
 0x148   :  { %2790 = vmatpush.bf16.msra.mxu2 %v4545_v55  ;;  %v2254_v18 = vadd.f32 %v2253_v57, %v2241_v15  ;;  %v4548_v55 = vld [vmem:[%s6710_s3 + $0xc8] sm:$0xff]  ;;  %v4547_v58 = vld [vmem:[%s6710_s3 + $0xc0] sm:$0xff] }
 0x149   :  { %2765 = vmatpush.bf16.msra.mxu3 %v4528_v46  ;;  %v2202_v53 = vadd.f32 %v6524_v52, %v2189_v27  ;;  %v4532_v52 = vld [vmem:[%s6710_s3 + $0x48] sm:$0xff]  ;;  %v4551_v27 = vld [vmem:[%s6710_s3 + $0xe0] sm:$0xff] }
 0x14a   :  { %v2279_v62 = vpop.f32.mrf.mxu2  ;;  %v2268_v1 = vpop.f32.mrf.mxu0  ;;  %v2267_v22 = vadd.f32 %v2266_v51, %v2254_v18 }
 0x14b   :  { %2778 = vmatpush.bf16.msra.mxu1 %v4536_v49  ;;  %v2215_v56 = vadd.f32 %v2214_v50, %v2202_v53  ;;  %v2723_v49 = vpack.c.b16 %v2691_v41, %v2691_v41  ;;  %v4549_v53 = vld [vmem:[%s6710_s3 + $0xd0] sm:$0xff] }
 0x14c   :  { %2791 = vmatpush.bf16.msra.mxu2 %v4544_v59  ;;  %v2280_v25 = vadd.f32 %v2279_v62, %v2267_v22  ;;  %v4554_v22 = vld [vmem:[%s6711_s4] ss:$0 sm:$0xff] }
 0x14d   :  { %2766 = vmatpush.bf16.msra.mxu3 %v4527_v21  ;;  %v2228_v60 = vadd.f32 %v6550_v4, %v2215_v56  ;;  %v2761_v21 = vsel %vm2759_vm2, %v2723_v49, 0 }
 0x14e   :  { %2802 = vmatpush.bf16.msra.mxu0 %v2761_v21 }
 0x14f   :  { %2779 = vmatpush.bf16.msra.mxu1 %v4535_v0  ;;  %v2492_v26 = vmax.f32 %v2228_v60, 0.0  ;;  %v2255_v8 = vpop.f32.mrf.mxu3 }
 0x150   :  { %2792 = vmatpush.bf16.msra.mxu2 %v4543_v2 }
 0x151   :  { %2767 = vmatpush.bf16.msra.mxu3 %v4526_v14  ;;  %v2496_v4 = vpack.c.bf16 %v2492_v26, %v2492_v26  ;;  %v4553_v14 = vld [vmem:[%s6710_s3 + $0xf0] sm:$0xff] }
 0x152   :  { %v2281_v9 = vpop.f32.mrf.mxu2  ;;  %2803 = vmatpush.bf16.msra.mxu0 %v4553_v14 }
 0x153   :  { %2780 = vmatpush.bf16.msra.mxu1 %v4534_v47 }
 0x154   :  { %2793 = vmatpush.bf16.msra.mxu2 %v4542_v5 }
 0x155   :  { %2768 = vmatpush.bf16.msra.mxu3 %v4525_v48  ;;  %v4550_v48 = vld [vmem:[%s6710_s3 + $0xd8] sm:$0xff] }
 0x156   :  { %2804 = vmatpush.bf16.msra.mxu0 %v4552_v44 }
 0x157   :  { %2781 = vmatpush.bf16.msra.mxu1 %v4533_v34 }
 0x158   :  { %2794 = vmatpush.bf16.msra.mxu2 %v4541_v10 }
 0x159   :  { %2769 = vmatpush.bf16.msra.mxu3 %v4524_v20  ;;  %v345_v20 = vperm.slane %v4559_v11, 3 }
 0x15a   :  { %2805 = vmatpush.bf16.msra.mxu0 %v4551_v27 }
 0x15b   :  { %2782 = vmatpush.bf16.msra.mxu1 %v4532_v52 }
 0x15c   :  { %2795 = vmatpush.bf16.msra.mxu2 %v4540_v13 }
 0x15d   :  { %2770 = vmatpush.bf16.msra.mxu3 %v4523_v61 }
 0x15e   :  { %2806 = vmatpush.bf16.msra.mxu0 %v4550_v48 }
 0x15f   :  { %2783 = vmatpush.bf16.msra.mxu1 %v4531_v3  ;;  %v2292_v16 = vpop.f32.mrf.mxu1 }
 0x160   :  { %2771 = vmatmul.bf16.vlgmr.msra.gmra.mxu3 %v2495_v7  ;;  %2796 = vmatpush.bf16.msra.mxu2 %v4539_v17  ;;  %v2293_v30 = vadd.f32 %v2292_v16, %v2280_v25 }
 0x162   :  { %2784 = vmatmul.bf16.vlgmr.msra.gmra.mxu1 %v2496_v4  ;;  %v2318_v50 = vpop.f32.mrf.mxu0  ;;  %2807 = vmatpush.bf16.msra.mxu0 %v4549_v53 }
 0x166   :  { %2808 = vmatpush.bf16.msra.mxu0 %v4548_v55 }
 0x167   :  { %v2305_v19 = vpop.f32.mrf.mxu3  ;;  %v2294_v23 = vpop.f32.mrf.mxu1 }
 0x168   :  { %v2306_v32 = vadd.f32 %v2305_v19, %v2293_v30 }
 0x16a   :  { %v2331_v6 = vpop.f32.mrf.mxu2  ;;  %v2320_v24 = vpop.f32.mrf.mxu0  ;;  %v2319_v33 = vadd.f32 %v2318_v50, %v2306_v32  ;;  %2809 = vmatpush.bf16.msra.mxu0 %v4547_v58 }
 0x16c   :  { %v2332_v35 = vadd.f32 %v2331_v6, %v2319_v33 }
 0x16f   :  { %v2307_v29 = vpop.f32.mrf.mxu3 }
 0x172   :  { %v2333_v31 = vpop.f32.mrf.mxu2 }
 0x17f   :  { %v2344_v36 = vpop.f32.mrf.mxu1 }
 0x180   :  { %v2345_v37 = vadd.f32 %v2344_v36, %v2332_v35 }
 0x182   :  { %v2370_v38 = vpop.f32.mrf.mxu0 }
 0x183   :  { %v2357_v45 = vpop.f32.mrf.mxu3  ;;  %v2371_v52 = vadd.f32 %v2370_v38, %v345_v20 }
 0x184   :  { %v2358_v42 = vadd.f32 %v2357_v45, %v2345_v37 }
 0x186   :  { %v2493_v54 = vmax.f32 %v2358_v42, 0.0 }
 0x187   :  { %v2346_v39 = vpop.f32.mrf.mxu1 }
 0x188   :  { %v2497_v46 = vpack.c.bf16 %v2493_v54, %v2493_v54 }
 0x18a   :  { %2797 = vmatmul.bf16.vlgmr.msra.gmra.mxu2 %v2497_v46  ;;  %v2383_v43 = vpop.f32.mrf.mxu2  ;;  %v2372_v28 = vpop.f32.mrf.mxu0 }
 0x18b   :  { %v2359_v0 = vpop.f32.mrf.mxu3  ;;  %v2384_v62 = vadd.f32 %v2383_v43, %v2371_v52 }
 0x192   :  { %v2385_v47 = vpop.f32.mrf.mxu2 }
 0x19f   :  { %v2409_v51 = vpop.f32.mrf.mxu1 }
 0x1a2   :  { %v2422_v56 = vpop.f32.mrf.mxu0 }
 0x1a3   :  { %v2396_v34 = vpop.f32.mrf.mxu3 }
 0x1a4   :  { %v2397_v63 = vadd.f32 %v2396_v34, %v2384_v62 }
 0x1a6   :  { %v2410_v2 = vadd.f32 %v2409_v51, %v2397_v63 }
 0x1a7   :  { %v2411_v57 = vpop.f32.mrf.mxu1 }
 0x1a8   :  { %v2423_v3 = vadd.f32 %v2422_v56, %v2410_v2 }
 0x1aa   :  { %v2435_v59 = vpop.f32.mrf.mxu2  ;;  %v2424_v61 = vpop.f32.mrf.mxu0 }
 0x1ab   :  { %v2398_v60 = vpop.f32.mrf.mxu3  ;;  %v2436_v7 = vadd.f32 %v2435_v59, %v2423_v3 }
 0x1b2   :  { %v2437_v1 = vpop.f32.mrf.mxu2 }
 0x1bf   :  { %v2461_v26 = vpop.f32.mrf.mxu1 }
 0x1c2   :  { %v2474_v8 = vpop.f32.mrf.mxu0 }
 0x1c3   :  { %v2448_v5 = vpop.f32.mrf.mxu3 }
 0x1c4   :  { %v2449_v4 = vadd.f32 %v2448_v5, %v2436_v7 }
 0x1c6   :  { %v2462_v9 = vadd.f32 %v2461_v26, %v2449_v4  ;;  %v2487_v10 = vpop.f32.mrf.mxu2 }
 0x1c7   :  { %v2463_v12 = vpop.f32.mrf.mxu1 }
 0x1c8   :  { %v2475_v11 = vadd.f32 %v2474_v8, %v2462_v9 }
 0x1ca   :  { %v2488_v13 = vadd.f32 %v2487_v10, %v2475_v11  ;;  %v2476_v15 = vpop.f32.mrf.mxu0 }
 0x1cb   :  { %v2450_v16 = vpop.f32.mrf.mxu3 }
 0x1cc   :  { %v2494_v17 = vmax.f32 %v2488_v13, 0.0 }
 0x1ce   :  { %v2498_v50 = vpack.c.bf16 %v2494_v17, %v2494_v17  ;;  %v2489_v18 = vpop.f32.mrf.mxu2 }
 0x1d0   :  { %4210 = vmatmul.msk.bf16.vlgmr.msra.gmra.mxu0 %vm2755_vm3, %v2498_v50 }
 0x1df   :  { %v2785_v19 = vpop.f32.mrf.mxu1 }
 0x1e3   :  { %v2772_v23 = vpop.f32.mrf.mxu3 }
 0x1e4   :  { %v2773_v6 = vadd.f32 %v4554_v22, %v2772_v23 }
 0x1e6   :  { %v2786_v24 = vadd.f32 %v2785_v19, %v2773_v6 }
 0x1e7   :  { %v2787_v25 = vpop.f32.mrf.mxu1 }
 0x1eb   :  { %v2774_v29 = vpop.f32.mrf.mxu3 }
 0x20d   :  { %v2798_v30 = vpop.f32.mrf.mxu2 }
 0x20e   :  { %v2799_v32 = vadd.f32 %v2798_v30, %v2786_v24 }
 0x215   :  { %v2800_v31 = vpop.f32.mrf.mxu2 }
 0x24d   :  { %v2811_v33 = vpop.f32.mrf.mxu0 }
 0x24e   :  { %v2812_v35 = vadd.f32 %v2811_v33, %v2799_v32 }
 0x250   :  { %v2816_v36 = vsel %vm2815_vm4, %v2812_v35, -inf }
 0x251   :  { %2817 = vmax.xlane.f32.xlu0 %v2816_v36 }
 0x255   :  { %v2813_v37 = vpop.f32.mrf.mxu0 }
 0x2c4   :  { %v2818_v45 = vpop.xlane.xlu0 %2817 }
 0x2c5   :  { %v2819_v42 = vsub.f32 %v2812_v35, %v2818_v45 }
 0x2c7   :  { %v2820_v38 = vmul.f32 1.442695, %v2819_v42 }
 0x2c9   :  { %4555 = vpow2.f32 %v2820_v38 }
 0x2cf   :  { %v4556_v40 = vpop.eup %4555 }
 0x2d0   :  { %v2822_v54 = vsel %vm2815_vm4, %v4556_v40, 0.0 }
 0x2d1   :  { %2823 = vadd.xlane.f32.xlu0 %v2822_v54 }
 0x344   :  { %v2824_v41 = vpop.xlane.xlu0 %2823 }
 0x345   :  { %4557 = vlog2.f32 %v2824_v41 }
 0x34b   :  { %v4558_v46 = vpop.eup %4557 }
 0x34c   :  { %v2826_v39 = vmul.f32 0.6931472, %v4558_v46 }
 0x34e   :  { %v2827_v49 = vadd.f32 %v2826_v39, %v2818_v45 }
 0x350   :  { %v2828_v21 = vsub.f32 %v2812_v35, %v2827_v49 }
 0x352   :  { %2829 = vst.msk [vmem:[%s6712_s5] sm:$0xff] %vm2815_vm4, %v2828_v21 }

</bundles_post_ra>
